<compile_context>
chip_gen: v6e
topology: v6e:2x2x1
jax: 0.10.0
libtpu: 0.0.40
codegen_flags: <defaults>
</compile_context>

<pallas_src>
import functools
import math

import jax
import jax.numpy as jnp
from jax.experimental import pallas as pl


# ----------------------------- Pallas kernels ------------------------------ #

def _gatv2_layer_kernel(x_ref, wlr_ref, blr_ref, att_ref, we_ref, bias_ref,
                        wdense_ref, maskb_ref, o_ref, *, heads, channels,
                        negative_slope):
    """One full GATv2Conv layer (+ conv bias + outer ReLU) in a single kernel."""
    # Fused lin_l / lin_r projection: one lane-dense matmul -> (N, 2*H*C).
    proj = (jnp.dot(x_ref[...], wlr_ref[...], preferred_element_type=jnp.float32)
            + blr_ref[...])
    hc = heads * channels
    xl = proj[:, :hc]          # lin_l(x): source-side features (messages)
    xr = proj[:, hc:]          # lin_r(x): target-side features
    wd = wdense_ref[...]       # (N, N) dense edge weights, wd[i, j] = w(j -> i)
    mb = maskb_ref[...]        # (N, N) additive mask: 0 on edges, -1e30 elsewhere
    att = att_ref[...]         # (1, H*C) learned attention vector
    we = we_ref[...]           # (1, H*C) lin_edge weight (edge_dim=1, no bias)

    outs = []
    for h in range(heads):                     # all heads in one grid step (static loop)
        sl = slice(h * channels, (h + 1) * channels)
        xl_h = xl[:, sl]                       # (N, C)
        xr_h = xr[:, sl]                       # (N, C)
        att_h = att[:, sl]                     # (1, C)
        we_h = we[:, sl]                       # (1, C)
        # GATv2 scoring: att . leaky_relu(xr_i + xl_j + w_ij * We), per (i, j).
        z = (xr_h[:, None, :] + xl_h[None, :, :]
             + wd[:, :, None] * we_h[None, :, :])             # (N, N, C)
        lz = jnp.where(z > 0, z, negative_slope * z)
        e = jnp.sum(lz * att_h[None, :, :], axis=-1) + mb      # (N, N)
        # Softmax over sources j (every row has >=1 valid entry: the self loop).
        m = jnp.max(e, axis=-1, keepdims=True)
        p = jnp.exp(e - m)
        s = jnp.sum(p, axis=-1, keepdims=True)
        unnorm = jnp.dot(p, xl_h, preferred_element_type=jnp.float32)   # (N, C)
        # Deferred normalization on (N, C), reciprocal on the EUP slot.
        outs.append(unnorm * pl.reciprocal(s, approx=True))
    out = jnp.concatenate(outs, axis=-1)                       # (N, H*C) lane-dense
    o_ref[...] = jnp.maximum(out + bias_ref[...], 0.0)         # conv bias + outer ReLU


def gatv2_layer(x, w_lr, b_lr, att, we, bias, wdense, mask_bias, *, heads, channels):
    n, fin = x.shape
    hc = heads * channels
    kernel = functools.partial(_gatv2_layer_kernel, heads=heads, channels=channels,
                               negative_slope=0.2)
    return pl.pallas_call(
        kernel,
        out_shape=jax.ShapeDtypeStruct((n, hc), jnp.float32),
        grid=(1,),
        in_specs=[
            pl.BlockSpec((n, fin), lambda i: (0, 0)),
            pl.BlockSpec((fin, 2 * hc), lambda i: (0, 0)),
            pl.BlockSpec((1, 2 * hc), lambda i: (0, 0)),
            pl.BlockSpec((1, hc), lambda i: (0, 0)),
            pl.BlockSpec((1, hc), lambda i: (0, 0)),
            pl.BlockSpec((1, hc), lambda i: (0, 0)),
            pl.BlockSpec((n, n), lambda i: (0, 0)),
            pl.BlockSpec((n, n), lambda i: (0, 0)),
        ],
        out_specs=pl.BlockSpec((n, hc), lambda i: (0, 0)),
    )(x, w_lr, b_lr, att, we, bias, wdense, mask_bias)


def _linear_kernel(x_ref, w_ref, b_ref, o_ref):
    o_ref[...] = (jnp.dot(x_ref[...], w_ref[...], preferred_element_type=jnp.float32)
                  + b_ref[...])


def linear(x, w, b):
    """y = x @ w + b (final layer; whole-array blocks at these sizes)."""
    # TODO(synk): for large N / Fout, row-tile with a grid and pad Fout to 128.
    n, fin = x.shape
    fout = w.shape[1]
    return pl.pallas_call(
        _linear_kernel,
        out_shape=jax.ShapeDtypeStruct((n, fout), jnp.float32),
        grid=(1,),
        in_specs=[pl.BlockSpec((n, fin), lambda i: (0, 0)),
                  pl.BlockSpec((fin, fout), lambda i: (0, 0)),
                  pl.BlockSpec((1, fout), lambda i: (0, 0))],
        out_specs=pl.BlockSpec((n, fout), lambda i: (0, 0)),
    )(x, w, b.reshape(1, fout))


# ------------------------------ Model wrapper ------------------------------ #

class GATv2NetPallas:
    """JAX/Pallas port of GATv2NetWeights (GATv2Conv stack + ReLU + final Linear)."""

    def __init__(self, input_size, output_size, hidden_size, num_layers,
                 drop_prob, heads=4, key=None):
        self.heads = heads
        self.hidden = hidden_size
        self.drop_prob = drop_prob  # eval-mode: unused
        key = jax.random.PRNGKey(0) if key is None else key
        hc = heads * hidden_size

        def glorot(k, shape):
            lim = math.sqrt(6.0 / (shape[0] + shape[-1]))
            return jax.random.uniform(k, shape, jnp.float32, -lim, lim)

        self.layers = []
        in_dim = input_size
        for _ in range(num_layers):
            key, kl, kr, ka, ke = jax.random.split(key, 5)
            wl = glorot(kl, (in_dim, hc))          # lin_l
            wr = glorot(kr, (in_dim, hc))          # lin_r
            w_lr = jnp.concatenate([wl, wr], axis=1)   # fused projection weight
            b_lr = jnp.zeros((1, 2 * hc), jnp.float32)
            att = glorot(ka, (1, hc))              # attention vector (per head/channel)
            we = glorot(ke, (1, hc))               # lin_edge (edge_dim=1, no bias)
            bias = jnp.zeros((1, hc), jnp.float32)
            self.layers.append((w_lr, b_lr, att, we, bias))
            in_dim = hc
        key, kf, kb = jax.random.split(key, 3)
        self.final_w = glorot(kf, (in_dim, output_size))
        self.final_b = jax.random.normal(kb, (output_size,), jnp.float32) * 0.01

    def __call__(self, x, edge_index, edge_weight):
        n = x.shape[0]
        src, dst = edge_index[0], edge_index[1]
        w = edge_weight.astype(jnp.float32)

        # GATv2Conv(add_self_loops=True): remove existing self loops, then add one per
        # node with fill_value='mean' (mean of remaining edge weights).
        non_self = (src != dst).astype(jnp.float32)
        mean_w = jnp.sum(w * non_self) / jnp.maximum(jnp.sum(non_self), 1.0)
        diag = jnp.arange(n)
        wdense = jnp.zeros((n, n), jnp.float32).at[dst, src].set(w)
        wdense = wdense.at[diag, diag].set(mean_w)
        adj = jnp.zeros((n, n), jnp.float32).at[dst, src].set(1.0)
        adj = adj.at[diag, diag].set(1.0)
        # Additive mask bias, built once and shared by every layer/head.
        mask_bias = (adj - 1.0) * 1e30

        h = x.astype(jnp.float32)
        for (w_lr, b_lr, att, we, bias) in self.layers:
            h = gatv2_layer(h, w_lr, b_lr, att, we, bias, wdense, mask_bias,
                            heads=self.heads, channels=self.hidden)
            # outer F.dropout: identity (eval mode)
        return linear(h, self.final_w, self.final_b)


# ---------------------------------- main ----------------------------------- #

if __name__ == "__main__":
    N = 16
    input_size, hidden_size, output_size = 8, 8, 4
    heads, num_layers = 4, 2

    key = jax.random.PRNGKey(0)
    kx, kw, kp = jax.random.split(key, 3)
    x = jax.random.normal(kx, (N, input_size), jnp.float32)

    # Bidirectional ring graph, no pre-existing self loops; edge weights are used
    # (edge_attr = edge_weight.view(-1, 1) -> lin_edge).
    idx = jnp.arange(N, dtype=jnp.int32)
    src = jnp.concatenate([idx, (idx + 1) % N])
    dst = jnp.concatenate([(idx + 1) % N, idx])
    edge_index = jnp.stack([src, dst])                               # (2, E)
    edge_weight = jax.random.uniform(kw, (edge_index.shape[1],),
                                     jnp.float32, 0.5, 1.5)

    model = GATv2NetPallas(input_size, output_size, hidden_size, num_layers,
                           drop_prob=0.1, heads=heads, key=kp)
    out = model(x, edge_index, edge_weight)
    jax.block_until_ready(out)
    assert out.shape == (N, output_size), out.shape
    assert bool(jnp.all(jnp.isfinite(out)))
    print("KERNEL_OK")
</pallas_src>

<mosaic_0001>
module attributes {stable_mosaic.version = 11 : i64} {
  func.func @_gatv2_layer_kernel(%arg0: i32, %arg1: memref<16x8xf32, #tpu.memory_space<vmem>>, %arg2: memref<8x64xf32, #tpu.memory_space<vmem>>, %arg3: memref<1x64xf32, #tpu.memory_space<vmem>>, %arg4: memref<1x32xf32, #tpu.memory_space<vmem>>, %arg5: memref<1x32xf32, #tpu.memory_space<vmem>>, %arg6: memref<1x32xf32, #tpu.memory_space<vmem>>, %arg7: memref<16x16xf32, #tpu.memory_space<vmem>>, %arg8: memref<16x16xf32, #tpu.memory_space<vmem>>, %arg9: memref<16x32xf32, #tpu.memory_space<vmem>>) attributes {dimension_semantics = [#tpu.dimension_semantics<arbitrary>], iteration_bounds = array<i64: 1>, scalar_prefetch = 0 : i64, scratch_operands = 0 : i64, tpu.core_type = #tpu.core_type<tc>, window_params = [{pipeline_mode = #tpu.pipeline_mode<synchronous>, transform_indices = @transform_0, window_bounds = array<i64: 16, 8>}, {pipeline_mode = #tpu.pipeline_mode<synchronous>, transform_indices = @transform_1, window_bounds = array<i64: 8, 64>}, {pipeline_mode = #tpu.pipeline_mode<synchronous>, transform_indices = @transform_2, window_bounds = array<i64: 1, 64>}, {pipeline_mode = #tpu.pipeline_mode<synchronous>, transform_indices = @transform_3, window_bounds = array<i64: 1, 32>}, {pipeline_mode = #tpu.pipeline_mode<synchronous>, transform_indices = @transform_4, window_bounds = array<i64: 1, 32>}, {pipeline_mode = #tpu.pipeline_mode<synchronous>, transform_indices = @transform_5, window_bounds = array<i64: 1, 32>}, {pipeline_mode = #tpu.pipeline_mode<synchronous>, transform_indices = @transform_6, window_bounds = array<i64: 16, 16>}, {pipeline_mode = #tpu.pipeline_mode<synchronous>, transform_indices = @transform_7, window_bounds = array<i64: 16, 16>}, {pipeline_mode = #tpu.pipeline_mode<synchronous>, transform_indices = @transform_8, window_bounds = array<i64: 16, 32>}]} {
    %c0 = arith.constant 0 : index
    %c0_0 = arith.constant 0 : index
    %0 = vector.load %arg1[%c0, %c0_0] : memref<16x8xf32, #tpu.memory_space<vmem>>, vector<16x8xf32>
    %c0_1 = arith.constant 0 : index
    %c0_2 = arith.constant 0 : index
    %1 = vector.load %arg2[%c0_1, %c0_2] : memref<8x64xf32, #tpu.memory_space<vmem>>, vector<8x64xf32>
    %cst = arith.constant dense<0.000000e+00> : vector<16x64xf32>
    %2 = tpu.matmul %0, %1, %cst {dimension_numbers = #tpu.dot_dimension_numbers<[1], [0], [0], [1], [0, 0, 1, 1], [], []>} : vector<16x8xf32>, vector<8x64xf32>, vector<16x64xf32> -> vector<16x64xf32>
    %c0_3 = arith.constant 0 : index
    %c0_4 = arith.constant 0 : index
    %3 = vector.load %arg3[%c0_3, %c0_4] : memref<1x64xf32, #tpu.memory_space<vmem>>, vector<1x64xf32>
    %4 = vector.broadcast %3 : vector<1x64xf32> to vector<16x64xf32>
    %5 = arith.addf %2, %4 : vector<16x64xf32>
    %6 = vector.extract_strided_slice %5 {offsets = [0, 0], sizes = [16, 32], strides = [1, 1]} : vector<16x64xf32> to vector<16x32xf32>
    %7 = vector.extract_strided_slice %5 {offsets = [0, 32], sizes = [16, 32], strides = [1, 1]} : vector<16x64xf32> to vector<16x32xf32>
    %c0_5 = arith.constant 0 : index
    %c0_6 = arith.constant 0 : index
    %8 = vector.load %arg7[%c0_5, %c0_6] : memref<16x16xf32, #tpu.memory_space<vmem>>, vector<16x16xf32>
    %c0_7 = arith.constant 0 : index
    %c0_8 = arith.constant 0 : index
    %9 = vector.load %arg8[%c0_7, %c0_8] : memref<16x16xf32, #tpu.memory_space<vmem>>, vector<16x16xf32>
    %c0_9 = arith.constant 0 : index
    %c0_10 = arith.constant 0 : index
    %10 = vector.load %arg4[%c0_9, %c0_10] : memref<1x32xf32, #tpu.memory_space<vmem>>, vector<1x32xf32>
    %c0_11 = arith.constant 0 : index
    %c0_12 = arith.constant 0 : index
    %11 = vector.load %arg5[%c0_11, %c0_12] : memref<1x32xf32, #tpu.memory_space<vmem>>, vector<1x32xf32>
    %12 = vector.extract_strided_slice %6 {offsets = [0, 0], sizes = [16, 8], strides = [1, 1]} : vector<16x32xf32> to vector<16x8xf32>
    %13 = vector.extract_strided_slice %7 {offsets = [0, 0], sizes = [16, 8], strides = [1, 1]} : vector<16x32xf32> to vector<16x8xf32>
    %14 = vector.extract_strided_slice %10 {offsets = [0, 0], sizes = [1, 8], strides = [1, 1]} : vector<1x32xf32> to vector<1x8xf32>
    %15 = vector.extract_strided_slice %11 {offsets = [0, 0], sizes = [1, 8], strides = [1, 1]} : vector<1x32xf32> to vector<1x8xf32>
    %16 = vector.shape_cast %13 : vector<16x8xf32> to vector<16x1x8xf32>
    %17 = vector.shape_cast %12 : vector<16x8xf32> to vector<1x16x8xf32>
    %18 = vector.broadcast %16 : vector<16x1x8xf32> to vector<16x16x8xf32>
    %19 = vector.broadcast %17 : vector<1x16x8xf32> to vector<16x16x8xf32>
    %20 = arith.addf %18, %19 : vector<16x16x8xf32>
    %21 = vector.shape_cast %8 : vector<16x16xf32> to vector<16x16x1xf32>
    %22 = vector.shape_cast %15 : vector<1x8xf32> to vector<1x1x8xf32>
    %23 = vector.broadcast %21 : vector<16x16x1xf32> to vector<16x16x8xf32>
    %24 = vector.broadcast %22 : vector<1x1x8xf32> to vector<16x16x8xf32>
    %25 = arith.mulf %23, %24 : vector<16x16x8xf32>
    %26 = arith.addf %20, %25 : vector<16x16x8xf32>
    %cst_13 = arith.constant 0.000000e+00 : f32
    %27 = vector.broadcast %cst_13 : f32 to vector<16x16x8xf32>
    %28 = arith.cmpf ogt, %26, %27 : vector<16x16x8xf32>
    %cst_14 = arith.constant 2.000000e-01 : f32
    %29 = vector.broadcast %cst_14 : f32 to vector<16x16x8xf32>
    %30 = arith.mulf %29, %26 : vector<16x16x8xf32>
    %31 = arith.select %28, %26, %30 : vector<16x16x8xi1>, vector<16x16x8xf32>
    %32 = vector.shape_cast %14 : vector<1x8xf32> to vector<1x1x8xf32>
    %33 = vector.broadcast %32 : vector<1x1x8xf32> to vector<16x16x8xf32>
    %34 = arith.mulf %31, %33 : vector<16x16x8xf32>
    %cst_15 = arith.constant dense<0.000000e+00> : vector<16x16xf32>
    %35 = vector.multi_reduction <add>, %34, %cst_15 [2] : vector<16x16x8xf32> to vector<16x16xf32>
    %36 = arith.addf %35, %9 : vector<16x16xf32>
    %cst_16 = arith.constant dense<0xFF800000> : vector<16xf32>
    %37 = vector.multi_reduction <maximumf>, %36, %cst_16 [1] : vector<16x16xf32> to vector<16xf32>
    %38 = vector.shape_cast %37 : vector<16xf32> to vector<16x1xf32>
    %39 = vector.broadcast %38 : vector<16x1xf32> to vector<16x16xf32>
    %40 = arith.subf %36, %39 : vector<16x16xf32>
    %41 = math.exp %40 : vector<16x16xf32>
    %cst_17 = arith.constant dense<0.000000e+00> : vector<16xf32>
    %42 = vector.multi_reduction <add>, %41, %cst_17 [1] : vector<16x16xf32> to vector<16xf32>
    %43 = vector.shape_cast %42 : vector<16xf32> to vector<16x1xf32>
    %cst_18 = arith.constant dense<0.000000e+00> : vector<16x8xf32>
    %44 = tpu.matmul %41, %12, %cst_18 {dimension_numbers = #tpu.dot_dimension_numbers<[1], [0], [0], [1], [0, 0, 1, 1], [], []>} : vector<16x16xf32>, vector<16x8xf32>, vector<16x8xf32> -> vector<16x8xf32>
    %45 = tpu.reciprocal %43 {approx = true} : vector<16x1xf32> -> vector<16x1xf32>
    %46 = vector.broadcast %45 : vector<16x1xf32> to vector<16x8xf32>
    %47 = arith.mulf %44, %46 : vector<16x8xf32>
    %48 = vector.extract_strided_slice %6 {offsets = [0, 8], sizes = [16, 8], strides = [1, 1]} : vector<16x32xf32> to vector<16x8xf32>
    %49 = vector.extract_strided_slice %7 {offsets = [0, 8], sizes = [16, 8], strides = [1, 1]} : vector<16x32xf32> to vector<16x8xf32>
    %50 = vector.extract_strided_slice %10 {offsets = [0, 8], sizes = [1, 8], strides = [1, 1]} : vector<1x32xf32> to vector<1x8xf32>
    %51 = vector.extract_strided_slice %11 {offsets = [0, 8], sizes = [1, 8], strides = [1, 1]} : vector<1x32xf32> to vector<1x8xf32>
    %52 = vector.shape_cast %49 : vector<16x8xf32> to vector<16x1x8xf32>
    %53 = vector.shape_cast %48 : vector<16x8xf32> to vector<1x16x8xf32>
    %54 = vector.broadcast %52 : vector<16x1x8xf32> to vector<16x16x8xf32>
    %55 = vector.broadcast %53 : vector<1x16x8xf32> to vector<16x16x8xf32>
    %56 = arith.addf %54, %55 : vector<16x16x8xf32>
    %57 = vector.shape_cast %8 : vector<16x16xf32> to vector<16x16x1xf32>
    %58 = vector.shape_cast %51 : vector<1x8xf32> to vector<1x1x8xf32>
    %59 = vector.broadcast %57 : vector<16x16x1xf32> to vector<16x16x8xf32>
    %60 = vector.broadcast %58 : vector<1x1x8xf32> to vector<16x16x8xf32>
    %61 = arith.mulf %59, %60 : vector<16x16x8xf32>
    %62 = arith.addf %56, %61 : vector<16x16x8xf32>
    %cst_19 = arith.constant 0.000000e+00 : f32
    %63 = vector.broadcast %cst_19 : f32 to vector<16x16x8xf32>
    %64 = arith.cmpf ogt, %62, %63 : vector<16x16x8xf32>
    %cst_20 = arith.constant 2.000000e-01 : f32
    %65 = vector.broadcast %cst_20 : f32 to vector<16x16x8xf32>
    %66 = arith.mulf %65, %62 : vector<16x16x8xf32>
    %67 = arith.select %64, %62, %66 : vector<16x16x8xi1>, vector<16x16x8xf32>
    %68 = vector.shape_cast %50 : vector<1x8xf32> to vector<1x1x8xf32>
    %69 = vector.broadcast %68 : vector<1x1x8xf32> to vector<16x16x8xf32>
    %70 = arith.mulf %67, %69 : vector<16x16x8xf32>
    %cst_21 = arith.constant dense<0.000000e+00> : vector<16x16xf32>
    %71 = vector.multi_reduction <add>, %70, %cst_21 [2] : vector<16x16x8xf32> to vector<16x16xf32>
    %72 = arith.addf %71, %9 : vector<16x16xf32>
    %cst_22 = arith.constant dense<0xFF800000> : vector<16xf32>
    %73 = vector.multi_reduction <maximumf>, %72, %cst_22 [1] : vector<16x16xf32> to vector<16xf32>
    %74 = vector.shape_cast %73 : vector<16xf32> to vector<16x1xf32>
    %75 = vector.broadcast %74 : vector<16x1xf32> to vector<16x16xf32>
    %76 = arith.subf %72, %75 : vector<16x16xf32>
    %77 = math.exp %76 : vector<16x16xf32>
    %cst_23 = arith.constant dense<0.000000e+00> : vector<16xf32>
    %78 = vector.multi_reduction <add>, %77, %cst_23 [1] : vector<16x16xf32> to vector<16xf32>
    %79 = vector.shape_cast %78 : vector<16xf32> to vector<16x1xf32>
    %cst_24 = arith.constant dense<0.000000e+00> : vector<16x8xf32>
    %80 = tpu.matmul %77, %48, %cst_24 {dimension_numbers = #tpu.dot_dimension_numbers<[1], [0], [0], [1], [0, 0, 1, 1], [], []>} : vector<16x16xf32>, vector<16x8xf32>, vector<16x8xf32> -> vector<16x8xf32>
    %81 = tpu.reciprocal %79 {approx = true} : vector<16x1xf32> -> vector<16x1xf32>
    %82 = vector.broadcast %81 : vector<16x1xf32> to vector<16x8xf32>
    %83 = arith.mulf %80, %82 : vector<16x8xf32>
    %84 = vector.extract_strided_slice %6 {offsets = [0, 16], sizes = [16, 8], strides = [1, 1]} : vector<16x32xf32> to vector<16x8xf32>
    %85 = vector.extract_strided_slice %7 {offsets = [0, 16], sizes = [16, 8], strides = [1, 1]} : vector<16x32xf32> to vector<16x8xf32>
    %86 = vector.extract_strided_slice %10 {offsets = [0, 16], sizes = [1, 8], strides = [1, 1]} : vector<1x32xf32> to vector<1x8xf32>
    %87 = vector.extract_strided_slice %11 {offsets = [0, 16], sizes = [1, 8], strides = [1, 1]} : vector<1x32xf32> to vector<1x8xf32>
    %88 = vector.shape_cast %85 : vector<16x8xf32> to vector<16x1x8xf32>
    %89 = vector.shape_cast %84 : vector<16x8xf32> to vector<1x16x8xf32>
    %90 = vector.broadcast %88 : vector<16x1x8xf32> to vector<16x16x8xf32>
    %91 = vector.broadcast %89 : vector<1x16x8xf32> to vector<16x16x8xf32>
    %92 = arith.addf %90, %91 : vector<16x16x8xf32>
    %93 = vector.shape_cast %8 : vector<16x16xf32> to vector<16x16x1xf32>
    %94 = vector.shape_cast %87 : vector<1x8xf32> to vector<1x1x8xf32>
    %95 = vector.broadcast %93 : vector<16x16x1xf32> to vector<16x16x8xf32>
    %96 = vector.broadcast %94 : vector<1x1x8xf32> to vector<16x16x8xf32>
    %97 = arith.mulf %95, %96 : vector<16x16x8xf32>
    %98 = arith.addf %92, %97 : vector<16x16x8xf32>
    %cst_25 = arith.constant 0.000000e+00 : f32
    %99 = vector.broadcast %cst_25 : f32 to vector<16x16x8xf32>
    %100 = arith.cmpf ogt, %98, %99 : vector<16x16x8xf32>
    %cst_26 = arith.constant 2.000000e-01 : f32
    %101 = vector.broadcast %cst_26 : f32 to vector<16x16x8xf32>
    %102 = arith.mulf %101, %98 : vector<16x16x8xf32>
    %103 = arith.select %100, %98, %102 : vector<16x16x8xi1>, vector<16x16x8xf32>
    %104 = vector.shape_cast %86 : vector<1x8xf32> to vector<1x1x8xf32>
    %105 = vector.broadcast %104 : vector<1x1x8xf32> to vector<16x16x8xf32>
    %106 = arith.mulf %103, %105 : vector<16x16x8xf32>
    %cst_27 = arith.constant dense<0.000000e+00> : vector<16x16xf32>
    %107 = vector.multi_reduction <add>, %106, %cst_27 [2] : vector<16x16x8xf32> to vector<16x16xf32>
    %108 = arith.addf %107, %9 : vector<16x16xf32>
    %cst_28 = arith.constant dense<0xFF800000> : vector<16xf32>
    %109 = vector.multi_reduction <maximumf>, %108, %cst_28 [1] : vector<16x16xf32> to vector<16xf32>
    %110 = vector.shape_cast %109 : vector<16xf32> to vector<16x1xf32>
    %111 = vector.broadcast %110 : vector<16x1xf32> to vector<16x16xf32>
    %112 = arith.subf %108, %111 : vector<16x16xf32>
    %113 = math.exp %112 : vector<16x16xf32>
    %cst_29 = arith.constant dense<0.000000e+00> : vector<16xf32>
    %114 = vector.multi_reduction <add>, %113, %cst_29 [1] : vector<16x16xf32> to vector<16xf32>
    %115 = vector.shape_cast %114 : vector<16xf32> to vector<16x1xf32>
    %cst_30 = arith.constant dense<0.000000e+00> : vector<16x8xf32>
    %116 = tpu.matmul %113, %84, %cst_30 {dimension_numbers = #tpu.dot_dimension_numbers<[1], [0], [0], [1], [0, 0, 1, 1], [], []>} : vector<16x16xf32>, vector<16x8xf32>, vector<16x8xf32> -> vector<16x8xf32>
    %117 = tpu.reciprocal %115 {approx = true} : vector<16x1xf32> -> vector<16x1xf32>
    %118 = vector.broadcast %117 : vector<16x1xf32> to vector<16x8xf32>
    %119 = arith.mulf %116, %118 : vector<16x8xf32>
    %120 = vector.extract_strided_slice %6 {offsets = [0, 24], sizes = [16, 8], strides = [1, 1]} : vector<16x32xf32> to vector<16x8xf32>
    %121 = vector.extract_strided_slice %7 {offsets = [0, 24], sizes = [16, 8], strides = [1, 1]} : vector<16x32xf32> to vector<16x8xf32>
    %122 = vector.extract_strided_slice %10 {offsets = [0, 24], sizes = [1, 8], strides = [1, 1]} : vector<1x32xf32> to vector<1x8xf32>
    %123 = vector.extract_strided_slice %11 {offsets = [0, 24], sizes = [1, 8], strides = [1, 1]} : vector<1x32xf32> to vector<1x8xf32>
    %124 = vector.shape_cast %121 : vector<16x8xf32> to vector<16x1x8xf32>
    %125 = vector.shape_cast %120 : vector<16x8xf32> to vector<1x16x8xf32>
    %126 = vector.broadcast %124 : vector<16x1x8xf32> to vector<16x16x8xf32>
    %127 = vector.broadcast %125 : vector<1x16x8xf32> to vector<16x16x8xf32>
    %128 = arith.addf %126, %127 : vector<16x16x8xf32>
    %129 = vector.shape_cast %8 : vector<16x16xf32> to vector<16x16x1xf32>
    %130 = vector.shape_cast %123 : vector<1x8xf32> to vector<1x1x8xf32>
    %131 = vector.broadcast %129 : vector<16x16x1xf32> to vector<16x16x8xf32>
    %132 = vector.broadcast %130 : vector<1x1x8xf32> to vector<16x16x8xf32>
    %133 = arith.mulf %131, %132 : vector<16x16x8xf32>
    %134 = arith.addf %128, %133 : vector<16x16x8xf32>
    %cst_31 = arith.constant 0.000000e+00 : f32
    %135 = vector.broadcast %cst_31 : f32 to vector<16x16x8xf32>
    %136 = arith.cmpf ogt, %134, %135 : vector<16x16x8xf32>
    %cst_32 = arith.constant 2.000000e-01 : f32
    %137 = vector.broadcast %cst_32 : f32 to vector<16x16x8xf32>
    %138 = arith.mulf %137, %134 : vector<16x16x8xf32>
    %139 = arith.select %136, %134, %138 : vector<16x16x8xi1>, vector<16x16x8xf32>
    %140 = vector.shape_cast %122 : vector<1x8xf32> to vector<1x1x8xf32>
    %141 = vector.broadcast %140 : vector<1x1x8xf32> to vector<16x16x8xf32>
    %142 = arith.mulf %139, %141 : vector<16x16x8xf32>
    %cst_33 = arith.constant dense<0.000000e+00> : vector<16x16xf32>
    %143 = vector.multi_reduction <add>, %142, %cst_33 [2] : vector<16x16x8xf32> to vector<16x16xf32>
    %144 = arith.addf %143, %9 : vector<16x16xf32>
    %cst_34 = arith.constant dense<0xFF800000> : vector<16xf32>
    %145 = vector.multi_reduction <maximumf>, %144, %cst_34 [1] : vector<16x16xf32> to vector<16xf32>
    %146 = vector.shape_cast %145 : vector<16xf32> to vector<16x1xf32>
    %147 = vector.broadcast %146 : vector<16x1xf32> to vector<16x16xf32>
    %148 = arith.subf %144, %147 : vector<16x16xf32>
    %149 = math.exp %148 : vector<16x16xf32>
    %cst_35 = arith.constant dense<0.000000e+00> : vector<16xf32>
    %150 = vector.multi_reduction <add>, %149, %cst_35 [1] : vector<16x16xf32> to vector<16xf32>
    %151 = vector.shape_cast %150 : vector<16xf32> to vector<16x1xf32>
    %cst_36 = arith.constant dense<0.000000e+00> : vector<16x8xf32>
    %152 = tpu.matmul %149, %120, %cst_36 {dimension_numbers = #tpu.dot_dimension_numbers<[1], [0], [0], [1], [0, 0, 1, 1], [], []>} : vector<16x16xf32>, vector<16x8xf32>, vector<16x8xf32> -> vector<16x8xf32>
    %153 = tpu.reciprocal %151 {approx = true} : vector<16x1xf32> -> vector<16x1xf32>
    %154 = vector.broadcast %153 : vector<16x1xf32> to vector<16x8xf32>
    %155 = arith.mulf %152, %154 : vector<16x8xf32>
    %156 = tpu.concatenate %47, %83, %119, %155 in 1 : vector<16x8xf32>, vector<16x8xf32>, vector<16x8xf32>, vector<16x8xf32> -> vector<16x32xf32>
    %c0_37 = arith.constant 0 : index
    %c0_38 = arith.constant 0 : index
    %157 = vector.load %arg6[%c0_37, %c0_38] : memref<1x32xf32, #tpu.memory_space<vmem>>, vector<1x32xf32>
    %158 = vector.broadcast %157 : vector<1x32xf32> to vector<16x32xf32>
    %159 = arith.addf %156, %158 : vector<16x32xf32>
    %cst_39 = arith.constant 0.000000e+00 : f32
    %160 = vector.broadcast %cst_39 : f32 to vector<16x32xf32>
    %161 = arith.maximumf %159, %160 : vector<16x32xf32>
    %c0_40 = arith.constant 0 : index
    %c0_41 = arith.constant 0 : index
    %162 = vector.load %arg9[%c0_40, %c0_41] : memref<16x32xf32, #tpu.memory_space<vmem>>, vector<16x32xf32>
    tpu.vector_store %arg9[%c0_40, %c0_41], %161 {strides = array<i32>} : memref<16x32xf32, #tpu.memory_space<vmem>>, vector<16x32xf32>,
    return
  }
  func.func @transform_0(%arg0: i32) -> (i32, i32) {
    %c0_i32 = arith.constant 0 : i32
    %c0_i32_0 = arith.constant 0 : i32
    %c0_i32_1 = arith.constant 0 : i32
    return %c0_i32, %c0_i32_0 : i32, i32
  }
  func.func @transform_1(%arg0: i32) -> (i32, i32) {
    %c0_i32 = arith.constant 0 : i32
    %c0_i32_0 = arith.constant 0 : i32
    %c0_i32_1 = arith.constant 0 : i32
    return %c0_i32, %c0_i32_0 : i32, i32
  }
  func.func @transform_2(%arg0: i32) -> (i32, i32) {
    %c0_i32 = arith.constant 0 : i32
    %c0_i32_0 = arith.constant 0 : i32
    %c0_i32_1 = arith.constant 0 : i32
    return %c0_i32, %c0_i32_0 : i32, i32
  }
  func.func @transform_3(%arg0: i32) -> (i32, i32) {
    %c0_i32 = arith.constant 0 : i32
    %c0_i32_0 = arith.constant 0 : i32
    %c0_i32_1 = arith.constant 0 : i32
    return %c0_i32, %c0_i32_0 : i32, i32
  }
  func.func @transform_4(%arg0: i32) -> (i32, i32) {
    %c0_i32 = arith.constant 0 : i32
    %c0_i32_0 = arith.constant 0 : i32
    %c0_i32_1 = arith.constant 0 : i32
    return %c0_i32, %c0_i32_0 : i32, i32
  }
  func.func @transform_5(%arg0: i32) -> (i32, i32) {
    %c0_i32 = arith.constant 0 : i32
    %c0_i32_0 = arith.constant 0 : i32
    %c0_i32_1 = arith.constant 0 : i32
    return %c0_i32, %c0_i32_0 : i32, i32
  }
  func.func @transform_6(%arg0: i32) -> (i32, i32) {
    %c0_i32 = arith.constant 0 : i32
    %c0_i32_0 = arith.constant 0 : i32
    %c0_i32_1 = arith.constant 0 : i32
    return %c0_i32, %c0_i32_0 : i32, i32
  }
  func.func @transform_7(%arg0: i32) -> (i32, i32) {
    %c0_i32 = arith.constant 0 : i32
    %c0_i32_0 = arith.constant 0 : i32
    %c0_i32_1 = arith.constant 0 : i32
    return %c0_i32, %c0_i32_0 : i32, i32
  }
  func.func @transform_8(%arg0: i32) -> (i32, i32) {
    %c0_i32 = arith.constant 0 : i32
    %c0_i32_0 = arith.constant 0 : i32
    %c0_i32_1 = arith.constant 0 : i32
    return %c0_i32, %c0_i32_0 : i32, i32
  }
}

</mosaic_0001>

<bundles_post_ra>
// kernel: tpu_custom_call.1
= control target key start
LH: loop header
LB: loop body
LE: loop exit
PB: predicated region body
PF: predicated region fallthrough
CT: control target
= control target key end

     0   :  { %13 = vsyncpa [#allocation3], 0  ;;  %s8730_s0 = inlined_call_operand.vmem [shape: f32[16,8], index: 0, kind: input, shape index: {}]   ;;  %s8731_s1 = inlined_call_operand.hbm [shape: f32[8,64], index: 1, kind: input, shape index: {}]   ;;  %s8732_s2 = inlined_call_operand.vmem [shape: f32[1,64], index: 2, kind: input, shape index: {}]   ;;  %s8733_s3 = inlined_call_operand.hbm [shape: f32[1,32], index: 3, kind: input, shape index: {}]   ;;  %s8734_s4 = inlined_call_operand.hbm [shape: f32[1,32], index: 4, kind: input, shape index: {}]   ;;  %s8735_s5 = inlined_call_operand.hbm [shape: f32[1,32], index: 5, kind: input, shape index: {}]   ;;  %s8736_s6 = inlined_call_operand.vmem [shape: f32[16,16], index: 6, kind: input, shape index: {}]   ;;  %s8737_s7 = inlined_call_operand.vmem [shape: f32[16,16], index: 7, kind: input, shape index: {}]   ;;  %s8738_s8 = inlined_call_operand.hbm [shape: f32[16,32], index: 8, kind: output, shape index: {}]  }
   0x1   :  { %14 = vsyncpa [#allocation6], 0 }
   0x2   :  { %15 = vsyncpa [#allocation9], 0 }
   0x3   :  { %16 = vsyncpa [#allocation4], 0  ;;  %s5998_s27 = smov [#allocation5]   ;;  %s5999_s29 = smov [#allocation2]  }
   0x4   :  { %s37_s28 = sshll.u32 %s5998_s27, 4  ;;  %s25_s30 = sshll.u32 %s5999_s29, 4  ;;  %s38_s28 = int_to_ptr.vmem [resolvable:$true] %s37_s28  ;;  %s26_s30 = int_to_ptr.vmem [resolvable:$true] %s25_s30 }
   0x5   :  { %s5898_s9 = scalar_lea.vmem %s38_s28, 16  ;;  %s5902_s10 = scalar_lea.vmem %s38_s28, 32 }
   0x6   :  { %p5899_p0 = scmp.ne.s32.totalorder %s38_s28, %s5898_s9  ;;  %p5903_p1 = scmp.lt.s32.totalorder %s38_s28, %s38_s28 }
   0x7   :  { %p5904_p2 = scmp.lt.s32.totalorder %s5902_s10, %s5898_s9 }
   0x9   :  { %p5905_p3 = por %p5904_p2, %p5903_p1 }
   0xb   :  { %p5906_p4 = pnand %p5905_p3, %p5899_p0 }
   0xd   :  { %5909 = shalt.err (!%p5906_p4)
}
   0xe   :  { %40 = dma.hbm_to_vmem [thread:$0]  %s8733_s3, 16, %s38_s28, [#allocation6]  }
   0xf   :  { %s5918_s13 = scalar_lea.vmem %s26_s30, 128  ;;  %p5923_p6 = scmp.lt.s32.totalorder %s26_s30, %s26_s30 }
  0x10   :  { %p5919_p5 = scmp.ne.s32.totalorder %s26_s30, %s5918_s13  ;;  %p5924_p7 = scmp.lt.s32.totalorder %s5918_s13, %s5918_s13 }
  0x12   :  { %p5925_p8 = por %p5924_p7, %p5923_p6 }
  0x14   :  { %p5926_p9 = pnand %p5925_p8, %p5919_p5 }
  0x16   :  { %5929 = shalt.err (!%p5926_p9)
}
  0x17   :  { %28 = dma.hbm_to_vmem [thread:$0]  %s8731_s1, 128, %s26_s30, [#allocation3]  }
  0x18   :  { %s6000_s16 = smov [#allocation7]   ;;  %s6001_s18 = smov [#allocation8]  }
  0x19   :  { %s47_s17 = sshll.u32 %s6000_s16, 4  ;;  %s57_s19 = sshll.u32 %s6001_s18, 4  ;;  %s48_s17 = int_to_ptr.vmem [resolvable:$true] %s47_s17  ;;  %s58_s19 = int_to_ptr.vmem [resolvable:$true] %s57_s19 }
  0x1a   :  { %s5938_s20 = scalar_lea.vmem %s48_s17, 16  ;;  %s5942_s3 = scalar_lea.vmem %s48_s17, 32 }
  0x1b   :  { %p5939_p10 = scmp.ne.s32.totalorder %s48_s17, %s5938_s20  ;;  %p5943_p11 = scmp.lt.s32.totalorder %s48_s17, %s48_s17 }
  0x1c   :  { %p5944_p12 = scmp.lt.s32.totalorder %s5942_s3, %s5938_s20 }
  0x1e   :  { %p5945_p13 = por %p5944_p12, %p5943_p11 }
  0x20   :  { %p5946_p0 = pnand %p5945_p13, %p5939_p10 }
  0x22   :  { %5949 = shalt.err (!%p5946_p0)
}
  0x23   :  { %50 = dma.hbm_to_vmem [thread:$0]  %s8734_s4, 16, %s48_s17, [#allocation6]  }
  0x24   :  { %s5958_s23 = scalar_lea.vmem %s58_s19, 16  ;;  %s5962_s1 = scalar_lea.vmem %s58_s19, 32 }
  0x25   :  { %p5959_p1 = scmp.ne.s32.totalorder %s58_s19, %s5958_s23  ;;  %p5963_p2 = scmp.lt.s32.totalorder %s58_s19, %s58_s19 }
  0x26   :  { %p5964_p3 = scmp.lt.s32.totalorder %s5962_s1, %s5958_s23 }
  0x28   :  { %p5965_p4 = por %p5964_p3, %p5963_p2 }
  0x2a   :  { %p5966_p5 = pnand %p5965_p4, %p5959_p1 }
  0x2c   :  { %5969 = shalt.err (!%p5966_p5)
}
  0x2d   :  { %60 = dma.hbm_to_vmem [thread:$0]  %s8735_s5, 16, %s58_s19, [#allocation9]  }
  0x2e   :  { %5990 = dma.done.wait [#allocation3], 128  }
  0x2f   :  { %5991 = vsyncadd [#allocation3], 4294967168 }
  0x30   :  { %5992 = dma.done.wait [#allocation6], 32  }
  0x31   :  { %5993 = vsyncadd [#allocation6], 4294967264 }
  0x32   :  { %5994 = dma.done.wait [#allocation9], 16  }
  0x33   :  { %5995 = vsyncadd [#allocation9], 4294967280  ;;  %v8739_v0 = vlaneseq  ;;  %v169_v5 = vld [vmem:[%s8736_s6] sm:$0xff]  ;;  %vm87_vm0 = vcmask 64512   ;;  %v78_v10 = vld [vmem:[%s8730_s0 + $0x8] sm:$0xff]  ;;  %s6005_s14 = smov 96  }
  0x34   :  { %v79_v6 = vld [vmem:[#allocation2] sm:$0xff]  ;;  %v170_v22 = vld [vmem:[%s8736_s6 + $0x8] sm:$0xff]  ;;  %s6002_s6 = smov 32   ;;  %s6007_s15 = smov 120  }
  0x35   :  { %v6075_v1 = vshrl.u32 %v8739_v0, 7  ;;  %5564 = vmatprep.subr.mxu0 %v79_v6  ;;  %v77_v9 = vld [vmem:[%s8730_s0] sm:$0xff]  ;;  %v6131_v31 = vld [vmem:[#allocation7] ss:$0 sm:$0xff]  ;;  %s6008_s16 = smov 80   ;;  %s6009_s17 = smov 72  }
  0x36   :  { %5565 = vmatpush3.msra.mxu0 %v79_v6  ;;  %5566 = vmatprep.mubr.msk.f32.mxu0 %vm87_vm0, %v77_v9  ;;  %s6010_s18 = smov 112   ;;  %s6011_s19 = smov 104  }
  0x37   :  { %8985 = vst [vmem:[#allocation15_spill] sm:$0xff] %v6075_v1  ;;  %v6078_v2 = vsub.s32 0, %v6075_v1  ;;  %v6081_v3 = vsub.s32 1, %v6075_v1  ;;  %v6084_v4 = vsub.s32 2, %v6075_v1  ;;  %v6099_v12 = vsub.s32 3, %v6075_v1  ;;  %5567 = vmatmul.mubr.msk.f32.vlgmr.msra.gmra.mxu0 %vm87_vm0, %v78_v10  ;;  %s6012_s20 = smov 8  }
  0x38   :  { %v6105_v14 = vsub.s32 4, %v6075_v1  ;;  %v6109_v16 = vsub.s32 5, %v6075_v1  ;;  %v6113_v18 = vsub.s32 6, %v6075_v1  ;;  %v6117_v20 = vsub.s32 7, %v6075_v1  ;;  %s6013_s3 = smov 16   ;;  %s6014_s21 = smov 24  }
  0x39   :  { %8986 = vst [vmem:[#allocation16_spill] sm:$0xff] %v6078_v2  ;;  %8987 = vst [vmem:[#allocation17_spill] sm:$0xff] %v6081_v3  ;;  %v396_v7 = vrot.slane %v169_v5, %v6078_v2  ;;  %v407_v8 = vrot.slane %v169_v5, %v6081_v3  ;;  %v418_v11 = vrot.slane %v169_v5, %v6084_v4  ;;  %s6015_s22 = smov [#allocation10]  }
  0x3a   :  { %8988 = vst [vmem:[#allocation18_spill] sm:$0xff] %v6084_v4  ;;  %8989 = vst [vmem:[#allocation19_spill] sm:$0xff] %v6099_v12  ;;  %v429_v13 = vrot.slane %v169_v5, %v6099_v12  ;;  %v440_v15 = vrot.slane %v169_v5, %v6105_v14  ;;  %v451_v17 = vrot.slane %v169_v5, %v6109_v16  ;;  %s5517_s23 = sshll.u32 %s6015_s22, 4  ;;  %s5518_s23 = int_to_ptr.vmem [resolvable:$true] %s5517_s23 }
  0x3b   :  { %398 = vbcast.lane.b32.xlu1 %v396_v7, 256  ;;  %409 = vbcast.lane.b32.xlu0 %v407_v8, 256  ;;  %8990 = vst [vmem:[#allocation20_spill] sm:$0xff] %v6105_v14  ;;  %8991 = vst [vmem:[#allocation21_spill] sm:$0xff] %v6109_v16  ;;  %v462_v19 = vrot.slane %v169_v5, %v6113_v18  ;;  %v473_v21 = vrot.slane %v169_v5, %v6117_v20  ;;  %s5970_s1 = scalar_lea.vmem %s5518_s23, 256  ;;  %p5975_p7 = scmp.lt.s32.totalorder %s5518_s23, %s5518_s23 }
  0x3c   :  { %8992 = vst [vmem:[#allocation22_spill] sm:$0xff] %v6113_v18  ;;  %8993 = vst [vmem:[#allocation23_spill] sm:$0xff] %v6117_v20  ;;  %v484_v23 = vrot.slane %v170_v22, %v6078_v2  ;;  %v495_v24 = vrot.slane %v170_v22, %v6081_v3  ;;  %v506_v25 = vrot.slane %v170_v22, %v6084_v4  ;;  %p5971_p6 = scmp.ne.s32.totalorder %s5518_s23, %s5970_s1  ;;  %p5976_p8 = scmp.lt.s32.totalorder %s5970_s1, %s5970_s1 }
  0x3d   :  { %v517_v26 = vrot.slane %v170_v22, %v6099_v12  ;;  %v528_v27 = vrot.slane %v170_v22, %v6105_v14  ;;  %v539_v28 = vrot.slane %v170_v22, %v6109_v16  ;;  %v550_v29 = vrot.slane %v170_v22, %v6113_v18 }
  0x3e   :  { %v561_v30 = vrot.slane %v170_v22, %v6117_v20  ;;  %p5977_p9 = por %p5976_p8, %p5975_p7 }
  0x3f   :  { %420 = vbcast.lane.b32.xlu0 %v418_v11, 256  ;;  %402 = vbcast.lane.b32.xlu1 %v396_v7, 264 }
  0x40   :  { %p5978_p10 = pnand %p5977_p9, %p5971_p6 }
  0x43   :  { %431 = vbcast.lane.b32.xlu0 %v429_v13, 256  ;;  %413 = vbcast.lane.b32.xlu1 %v407_v8, 264 }
  0x47   :  { %442 = vbcast.lane.b32.xlu0 %v440_v15, 256  ;;  %424 = vbcast.lane.b32.xlu1 %v418_v11, 264 }
  0x4b   :  { %453 = vbcast.lane.b32.xlu0 %v451_v17, 256  ;;  %435 = vbcast.lane.b32.xlu1 %v429_v13, 264 }
  0x4f   :  { %464 = vbcast.lane.b32.xlu0 %v462_v19, 256  ;;  %446 = vbcast.lane.b32.xlu1 %v440_v15, 264 }
  0x53   :  { %475 = vbcast.lane.b32.xlu0 %v473_v21, 256  ;;  %457 = vbcast.lane.b32.xlu1 %v451_v17, 264 }
  0x57   :  { %486 = vbcast.lane.b32.xlu0 %v484_v23, 256  ;;  %468 = vbcast.lane.b32.xlu1 %v462_v19, 264 }
  0x5b   :  { %497 = vbcast.lane.b32.xlu0 %v495_v24, 256  ;;  %479 = vbcast.lane.b32.xlu1 %v473_v21, 264 }
  0x5f   :  { %508 = vbcast.lane.b32.xlu0 %v506_v25, 256  ;;  %490 = vbcast.lane.b32.xlu1 %v484_v23, 264 }
  0x63   :  { %519 = vbcast.lane.b32.xlu0 %v517_v26, 256  ;;  %501 = vbcast.lane.b32.xlu1 %v495_v24, 264 }
  0x67   :  { %530 = vbcast.lane.b32.xlu0 %v528_v27, 256  ;;  %512 = vbcast.lane.b32.xlu1 %v506_v25, 264 }
  0x6b   :  { %541 = vbcast.lane.b32.xlu0 %v539_v28, 256  ;;  %523 = vbcast.lane.b32.xlu1 %v517_v26, 264 }
  0x6f   :  { %552 = vbcast.lane.b32.xlu0 %v550_v29, 256  ;;  %534 = vbcast.lane.b32.xlu1 %v528_v27, 264 }
  0x73   :  { %563 = vbcast.lane.b32.xlu0 %v561_v30, 256  ;;  %545 = vbcast.lane.b32.xlu1 %v539_v28, 264 }
  0x77   :  { %556 = vbcast.lane.b32.xlu1 %v550_v29, 264 }
  0x7b   :  { %567 = vbcast.lane.b32.xlu1 %v561_v30, 264 }
  0xad   :  { %v399_v32 = vpop.permute.xlu1 %398  ;;  %v410_v33 = vpop.permute.xlu0 %409 }
  0xae   :  { %v575_v34 = vmul.f32 %v6131_v31, %v399_v32  ;;  %v577_v35 = vmul.f32 %v6131_v31, %v410_v33 }
  0xb0   :  { %639 = vrot.lane.b32.xlu0 %v575_v34, %s6002_s6 }
  0xb1   :  { %v421_v36 = vpop.permute.xlu0 %420  ;;  %v403_v37 = vpop.permute.xlu1 %402 }
  0xb2   :  { %v576_v38 = vmul.f32 %v6131_v31, %v403_v37  ;;  %v579_v39 = vmul.f32 %v6131_v31, %v421_v36 }
  0xb4   :  { %643 = vrot.lane.b32.xlu0 %v577_v35, %s6002_s6  ;;  %641 = vrot.lane.b32.xlu1 %v576_v38, %s6002_s6 }
  0xb5   :  { %v432_v40 = vpop.permute.xlu0 %431  ;;  %v414_v41 = vpop.permute.xlu1 %413 }
  0xb6   :  { %v578_v42 = vmul.f32 %v6131_v31, %v414_v41  ;;  %v581_v43 = vmul.f32 %v6131_v31, %v432_v40  ;;  %v5535_v41 = vld [vmem:[#allocation5] ss:$0 sm:$0xff] }
  0xb8   :  { %647 = vrot.lane.b32.xlu0 %v579_v39, %s6002_s6  ;;  %645 = vrot.lane.b32.xlu1 %v578_v42, %s6002_s6  ;;  %v171_v42 = vld [vmem:[%s8737_s7] sm:$0xff] }
  0xb9   :  { %v443_v44 = vpop.permute.xlu0 %442  ;;  %v425_v45 = vpop.permute.xlu1 %424 }
  0xba   :  { %v580_v46 = vmul.f32 %v6131_v31, %v425_v45  ;;  %v583_v47 = vmul.f32 %v6131_v31, %v443_v44  ;;  %v1132_v45 = vrot.slane %v171_v42, %v6078_v2 }
  0xbc   :  { %651 = vrot.lane.b32.xlu0 %v581_v43, %s6002_s6  ;;  %649 = vrot.lane.b32.xlu1 %v580_v46, %s6002_s6  ;;  %v1143_v46 = vrot.slane %v171_v42, %v6081_v3 }
  0xbd   :  { %v454_v48 = vpop.permute.xlu0 %453  ;;  %v436_v49 = vpop.permute.xlu1 %435 }
  0xbe   :  { %v582_v50 = vmul.f32 %v6131_v31, %v436_v49  ;;  %v585_v51 = vmul.f32 %v6131_v31, %v454_v48  ;;  %v5531_v48 = vld [vmem:[%s8732_s2] ss:$0 sm:$0xff] }
  0xc0   :  { %655 = vrot.lane.b32.xlu0 %v583_v47, %s6002_s6  ;;  %653 = vrot.lane.b32.xlu1 %v582_v50, %s6002_s6  ;;  %v1154_v47 = vrot.slane %v171_v42, %v6084_v4 }
  0xc1   :  { %v465_v52 = vpop.permute.xlu0 %464  ;;  %v447_v53 = vpop.permute.xlu1 %446 }
  0xc2   :  { %v584_v54 = vmul.f32 %v6131_v31, %v447_v53  ;;  %v587_v55 = vmul.f32 %v6131_v31, %v465_v52  ;;  %v1176_v52 = vrot.slane %v171_v42, %v6105_v14 }
  0xc4   :  { %659 = vrot.lane.b32.xlu0 %v585_v51, %s6002_s6  ;;  %657 = vrot.lane.b32.xlu1 %v584_v54, %s6002_s6  ;;  %v1187_v54 = vrot.slane %v171_v42, %v6109_v16 }
  0xc5   :  { %v476_v56 = vpop.permute.xlu0 %475  ;;  %v458_v57 = vpop.permute.xlu1 %457 }
  0xc6   :  { %v586_v58 = vmul.f32 %v6131_v31, %v458_v57  ;;  %v589_v59 = vmul.f32 %v6131_v31, %v476_v56  ;;  %v1209_v56 = vrot.slane %v171_v42, %v6117_v20  ;;  %v172_v57 = vld [vmem:[%s8737_s7 + $0x8] sm:$0xff]  ;;  %s6004_s7 = smov 88  }
  0xc8   :  { %663 = vrot.lane.b32.xlu0 %v587_v55, %s6002_s6  ;;  %661 = vrot.lane.b32.xlu1 %v586_v58, %s6002_s6  ;;  %v1198_v55 = vrot.slane %v171_v42, %v6113_v18  ;;  %v1220_v58 = vrot.slane %v172_v57, %v6078_v2 }
  0xc9   :  { %v487_v60 = vpop.permute.xlu0 %486  ;;  %v469_v61 = vpop.permute.xlu1 %468 }
  0xca   :  { %v588_v62 = vmul.f32 %v6131_v31, %v469_v61  ;;  %v591_v63 = vmul.f32 %v6131_v31, %v487_v60  ;;  %v1242_v60 = vrot.slane %v172_v57, %v6084_v4  ;;  %v1253_v61 = vrot.slane %v172_v57, %v6099_v12 }
  0xcc   :  { %667 = vrot.lane.b32.xlu0 %v589_v59, %s6002_s6  ;;  %665 = vrot.lane.b32.xlu1 %v588_v62, %s6002_s6  ;;  %v1231_v59 = vrot.slane %v172_v57, %v6081_v3  ;;  %v1264_v62 = vrot.slane %v172_v57, %v6105_v14 }
  0xcd   :  { %v498_v5 = vpop.permute.xlu0 %497  ;;  %v480_v6 = vpop.permute.xlu1 %479 }
  0xce   :  { %v590_v7 = vmul.f32 %v6131_v31, %v480_v6  ;;  %v593_v8 = vmul.f32 %v6131_v31, %v498_v5  ;;  %v1275_v6 = vrot.slane %v172_v57, %v6109_v16 }
  0xd0   :  { %671 = vrot.lane.b32.xlu0 %v591_v63, %s6002_s6  ;;  %669 = vrot.lane.b32.xlu1 %v590_v7, %s6002_s6  ;;  %v1286_v7 = vrot.slane %v172_v57, %v6113_v18 }
  0xd1   :  { %v509_v9 = vpop.permute.xlu0 %508  ;;  %v491_v10 = vpop.permute.xlu1 %490 }
  0xd2   :  { %v592_v11 = vmul.f32 %v6131_v31, %v491_v10  ;;  %v595_v13 = vmul.f32 %v6131_v31, %v509_v9  ;;  %v1297_v9 = vrot.slane %v172_v57, %v6117_v20 }
  0xd4   :  { %675 = vrot.lane.b32.xlu0 %v593_v8, %s6002_s6  ;;  %673 = vrot.lane.b32.xlu1 %v592_v11, %s6002_s6 }
  0xd5   :  { %v520_v15 = vpop.permute.xlu0 %519  ;;  %v502_v17 = vpop.permute.xlu1 %501 }
  0xd6   :  { %v594_v19 = vmul.f32 %v6131_v31, %v502_v17  ;;  %v597_v21 = vmul.f32 %v6131_v31, %v520_v15 }
  0xd8   :  { %679 = vrot.lane.b32.xlu0 %v595_v13, %s6002_s6  ;;  %677 = vrot.lane.b32.xlu1 %v594_v19, %s6002_s6 }
  0xd9   :  { %v531_v22 = vpop.permute.xlu0 %530  ;;  %v513_v23 = vpop.permute.xlu1 %512 }
  0xda   :  { %v596_v24 = vmul.f32 %v6131_v31, %v513_v23  ;;  %v599_v25 = vmul.f32 %v6131_v31, %v531_v22 }
  0xdc   :  { %683 = vrot.lane.b32.xlu0 %v597_v21, %s6002_s6  ;;  %681 = vrot.lane.b32.xlu1 %v596_v24, %s6002_s6 }
  0xdd   :  { %v542_v26 = vpop.permute.xlu0 %541  ;;  %v524_v27 = vpop.permute.xlu1 %523 }
  0xde   :  { %v598_v28 = vmul.f32 %v6131_v31, %v524_v27  ;;  %v601_v29 = vmul.f32 %v6131_v31, %v542_v26 }
  0xe0   :  { %687 = vrot.lane.b32.xlu0 %v599_v25, %s6002_s6  ;;  %685 = vrot.lane.b32.xlu1 %v598_v28, %s6002_s6 }
  0xe1   :  { %v553_v30 = vpop.permute.xlu0 %552  ;;  %v535_v32 = vpop.permute.xlu1 %534 }
  0xe2   :  { %v600_v33 = vmul.f32 %v6131_v31, %v535_v32  ;;  %v603_v34 = vmul.f32 %v6131_v31, %v553_v30 }
  0xe4   :  { %691 = vrot.lane.b32.xlu0 %v601_v29, %s6002_s6  ;;  %689 = vrot.lane.b32.xlu1 %v600_v33, %s6002_s6 }
  0xe5   :  { %v564_v35 = vpop.permute.xlu0 %563  ;;  %v546_v36 = vpop.permute.xlu1 %545 }
  0xe6   :  { %v602_v37 = vmul.f32 %v6131_v31, %v546_v36  ;;  %v605_v38 = vmul.f32 %v6131_v31, %v564_v35 }
  0xe8   :  { %695 = vrot.lane.b32.xlu0 %v603_v34, %s6002_s6  ;;  %693 = vrot.lane.b32.xlu1 %v602_v37, %s6002_s6 }
  0xe9   :  { %v557_v39 = vpop.permute.xlu1 %556 }
  0xea   :  { %v604_v40 = vmul.f32 %v6131_v31, %v557_v39 }
  0xec   :  { %699 = vrot.lane.b32.xlu0 %v605_v38, %s6002_s6  ;;  %697 = vrot.lane.b32.xlu1 %v604_v40, %s6002_s6 }
  0xed   :  { %v568_v43 = vpop.permute.xlu1 %567 }
  0xee   :  { %v606_v44 = vmul.f32 %v6131_v31, %v568_v43  ;;  %v1165_v31 = vrot.slane %v171_v42, %v6099_v12 }
  0xf0   :  { %868 = vrot.lane.b32.xlu0 %v5535_v41, %s6002_s6  ;;  %701 = vrot.lane.b32.xlu1 %v606_v44, %s6002_s6  ;;  %v6003_v44 = vmov 1966171168  }
  0xf4   :  { %1134 = vbcast.lane.b32.xlu0 %v1132_v45, 256  ;;  %1138 = vbcast.lane.b32.xlu1 %v1132_v45, 264  ;;  %v179_v45 = vunpack.c.l.s4 %v6003_v44 }
  0xf7   :  { %v5568_v49 = vpop.f32.mrf.mxu0 }
  0xf8   :  { %1149 = vbcast.lane.b32.xlu0 %v1143_v46, 264  ;;  %1145 = vbcast.lane.b32.xlu1 %v1143_v46, 256  ;;  %v6208_v50 = vadd.f32 %v5568_v49, %v5531_v48 }
  0xf9   :  { %v160_v51 = vpop.f32.mrf.mxu0 }
  0xfa   :  { %8994 = vst [vmem:[#allocation24_spill] sm:$0xff] %v6208_v50  ;;  %v6211_v53 = vadd.f32 %v5531_v48, %v160_v51  ;;  %5569 = vmatprep.subr.mxu1 %v6208_v50  ;;  %v180_v48 = vunpack.c.0.s8 %v179_v45 }
  0xfb   :  { %5570 = vmatpush3.msra.mxu1 %v6208_v50 }
  0xfc   :  { %1160 = vbcast.lane.b32.xlu0 %v1154_v47, 264  ;;  %1156 = vbcast.lane.b32.xlu1 %v1154_v47, 256  ;;  %8995 = vst [vmem:[#allocation25_spill] sm:$0xff] %v6211_v53  ;;  %v6298_v51 = vsub.s32 %v180_v48, %v6075_v1 }
  0xfd   :  { %5571 = vmatprep.subr.mxu1 %v6211_v53 }
  0xfe   :  { %5572 = vmatpush3.msra.mxu1 %v6211_v53 }
 0x100   :  { %1171 = vbcast.lane.b32.xlu0 %v1165_v31, 264  ;;  %1167 = vbcast.lane.b32.xlu1 %v1165_v31, 256 }
 0x104   :  { %1182 = vbcast.lane.b32.xlu0 %v1176_v52, 264  ;;  %1178 = vbcast.lane.b32.xlu1 %v1176_v52, 256 }
 0x108   :  { %1193 = vbcast.lane.b32.xlu0 %v1187_v54, 264  ;;  %1189 = vbcast.lane.b32.xlu1 %v1187_v54, 256  ;;  %v184_v54 = vrot.slane %v6211_v53, %v6298_v51 }
 0x10a   :  { %v192_v57 = vcombine.high %v184_v54, %v184_v54 }
 0x10c   :  { %1204 = vbcast.lane.b32.xlu0 %v1198_v55, 264  ;;  %1200 = vbcast.lane.b32.xlu1 %v1198_v55, 256 }
 0x110   :  { %1215 = vbcast.lane.b32.xlu0 %v1209_v56, 264  ;;  %1211 = vbcast.lane.b32.xlu1 %v1209_v56, 256 }
 0x114   :  { %1226 = vbcast.lane.b32.xlu0 %v1220_v58, 264  ;;  %1222 = vbcast.lane.b32.xlu1 %v1220_v58, 256 }
 0x118   :  { %1237 = vbcast.lane.b32.xlu0 %v1231_v59, 264  ;;  %1233 = vbcast.lane.b32.xlu1 %v1231_v59, 256  ;;  %v200_v59 = vrot.slane %v184_v54, %v6298_v51 }
 0x11a   :  { %v6320_v44 = vrot.slane %v200_v59, %v6078_v2 }
 0x11c   :  { %1248 = vbcast.lane.b32.xlu0 %v1242_v60, 264  ;;  %1244 = vbcast.lane.b32.xlu1 %v1242_v60, 256 }
 0x120   :  { %1259 = vbcast.lane.b32.xlu0 %v1253_v61, 264  ;;  %1255 = vbcast.lane.b32.xlu1 %v1253_v61, 256  ;;  %v177_v61 = vcombine.high %v6211_v53, %v6211_v53 }
 0x122   :  { %v6228_v63 = vpop.permute.xlu0 %639 }
 0x124   :  { %1270 = vbcast.lane.b32.xlu0 %v1264_v62, 264  ;;  %1266 = vbcast.lane.b32.xlu1 %v1264_v62, 256  ;;  %v214_v62 = vrot.slane %v192_v57, %v6298_v51 }
 0x126   :  { %v6230_v5 = vpop.permute.xlu0 %643  ;;  %v642_v26 = vpop.permute.xlu1 %641  ;;  %v6323_v45 = vrot.slane %v214_v62, %v6078_v2  ;;  %v224_v48 = vcombine.high %v214_v62, %v214_v62 }
 0x128   :  { %357 = vrot.lane.b32.xlu0 %v6208_v50, %s6002_s6  ;;  %1277 = vbcast.lane.b32.xlu1 %v1275_v6, 256  ;;  %v6340_v16 = vrot.slane %v224_v48, %v6078_v2 }
 0x12a   :  { %v6236_v8 = vpop.permute.xlu0 %647  ;;  %v646_v29 = vpop.permute.xlu1 %645 }
 0x12c   :  { %1281 = vbcast.lane.b32.xlu0 %v1275_v6, 264  ;;  %1288 = vbcast.lane.b32.xlu1 %v1286_v7, 256 }
 0x12e   :  { %v6239_v10 = vpop.permute.xlu0 %651  ;;  %v650_v32 = vpop.permute.xlu1 %649 }
 0x130   :  { %355 = vrot.lane.b32.xlu0 %v6211_v53, %s6002_s6  ;;  %1299 = vbcast.lane.b32.xlu1 %v1297_v9, 256 }
 0x132   :  { %v6243_v11 = vpop.permute.xlu0 %655  ;;  %v654_v35 = vpop.permute.xlu1 %653 }
 0x134   :  { %1292 = vbcast.lane.b32.xlu0 %v1286_v7, 264  ;;  %v222_v7 = vcombine.high %v200_v59, %v200_v59 }
 0x136   :  { %v6245_v13 = vpop.permute.xlu0 %659  ;;  %v6275_v37 = vpop.permute.xlu1 %657  ;;  %v6330_v53 = vrot.slane %v222_v7, %v6078_v2 }
 0x138   :  { %1303 = vbcast.lane.b32.xlu0 %v1297_v9, 264  ;;  %v191_v9 = vrot.slane %v177_v61, %v6298_v51 }
 0x13a   :  { %v6247_v15 = vpop.permute.xlu0 %663  ;;  %v6279_v39 = vpop.permute.xlu1 %661  ;;  %v207_v20 = vrot.slane %v191_v9, %v6298_v51  ;;  %v193_v14 = vcombine.high %v191_v9, %v191_v9 }
 0x13e   :  { %v6249_v17 = vpop.permute.xlu0 %667  ;;  %v6285_v42 = vpop.permute.xlu1 %665 }
 0x142   :  { %v6251_v19 = vpop.permute.xlu0 %671  ;;  %v6289_v46 = vpop.permute.xlu1 %669 }
 0x146   :  { %v6253_v21 = vpop.permute.xlu0 %675  ;;  %v6295_v49 = vpop.permute.xlu1 %673 }
 0x14a   :  { %v6255_v22 = vpop.permute.xlu0 %679  ;;  %v6304_v55 = vpop.permute.xlu1 %677 }
 0x14e   :  { %v6257_v23 = vpop.permute.xlu0 %683  ;;  %v6311_v60 = vpop.permute.xlu1 %681 }
 0x152   :  { %v6259_v24 = vpop.permute.xlu0 %687  ;;  %v6325_v54 = vpop.permute.xlu1 %685 }
 0x156   :  { %v6261_v25 = vpop.permute.xlu0 %691  ;;  %v6344_v3 = vpop.permute.xlu1 %689 }
 0x15a   :  { %v6263_v27 = vpop.permute.xlu0 %695 }
 0x15e   :  { %v6265_v28 = vpop.permute.xlu0 %699 }
 0x162   :  { %v6267_v30 = vpop.permute.xlu0 %868 }
 0x166   :  { %v6269_v33 = vpop.permute.xlu0 %1134 }
 0x167   :  { %8996 = vst [vmem:[#allocation26_spill] sm:$0xff] %v6269_v33  ;;  %v6347_v33 = vrot.slane %v207_v20, %v6078_v2 }
 0x16a   :  { %v6271_v34 = vpop.permute.xlu0 %1149 }
 0x16b   :  { %8997 = vst [vmem:[#allocation27_spill] sm:$0xff] %v6271_v34 }
 0x16e   :  { %v6273_v36 = vpop.permute.xlu0 %1160 }
 0x16f   :  { %8998 = vst [vmem:[#allocation28_spill] sm:$0xff] %v6273_v36 }
 0x172   :  { %v6277_v38 = vpop.permute.xlu0 %1171 }
 0x173   :  { %8999 = vst [vmem:[#allocation29_spill] sm:$0xff] %v6277_v38 }
 0x176   :  { %v6281_v40 = vpop.permute.xlu0 %1182 }
 0x177   :  { %9000 = vst [vmem:[#allocation30_spill] sm:$0xff] %v6281_v40 }
 0x17a   :  { %v6283_v41 = vpop.permute.xlu0 %1193 }
 0x17b   :  { %9001 = vst [vmem:[#allocation31_spill] sm:$0xff] %v6283_v41 }
 0x17e   :  { %v6287_v43 = vpop.permute.xlu0 %1204 }
 0x17f   :  { %9002 = vst [vmem:[#allocation32_spill] sm:$0xff] %v6287_v43 }
 0x182   :  { %v6291_v47 = vpop.permute.xlu0 %1215 }
 0x183   :  { %9003 = vst [vmem:[#allocation33_spill] sm:$0xff] %v6291_v47 }
 0x186   :  { %v6293_v31 = vpop.permute.xlu0 %1226 }
 0x187   :  { %9004 = vst [vmem:[#allocation34_spill] sm:$0xff] %v6293_v31 }
 0x18a   :  { %v6300_v52 = vpop.permute.xlu0 %1237 }
 0x18b   :  { %9005 = vst [vmem:[#allocation35_spill] sm:$0xff] %v6300_v52 }
 0x18e   :  { %v6306_v56 = vpop.permute.xlu0 %1248 }
 0x18f   :  { %9006 = vst [vmem:[#allocation36_spill] sm:$0xff] %v6306_v56 }
 0x192   :  { %v6308_v58 = vpop.permute.xlu0 %1259 }
 0x193   :  { %9007 = vst [vmem:[#allocation37_spill] sm:$0xff] %v6308_v58 }
 0x196   :  { %v6316_v6 = vpop.permute.xlu0 %1270 }
 0x197   :  { %9008 = vst [vmem:[#allocation38_spill] sm:$0xff] %v6316_v6 }
 0x19a   :  { %v6327_v0 = vpop.permute.xlu0 %357 }
 0x19b   :  { %v362_v57 = vadd.f32 %v6327_v0, %v6320_v44  ;;  %v364_v61 = vadd.f32 %v6327_v0, %v6323_v45  ;;  %v366_v59 = vadd.f32 %v6327_v0, %v6330_v53  ;;  %v368_v4 = vadd.f32 %v6327_v0, %v6340_v16 }
 0x19d   :  { %v736_v18 = vadd.f32 %v642_v26, %v362_v57  ;;  %v738_v62 = vadd.f32 %v646_v29, %v364_v61  ;;  %v740_v12 = vadd.f32 %v650_v32, %v366_v59  ;;  %v221_v26 = vrot.slane %v193_v14, %v6298_v51 }
 0x19e   :  { %v742_v57 = vadd.f32 %v654_v35, %v368_v4  ;;  %v370_v32 = vadd.f32 %v6327_v0, %v6347_v33 }
 0x19f   :  { %vm768_vm1 = vcmp.gt.f32.partialorder %v736_v18, 0.0  ;;  %v800_v7 = vmul.f32 0.2, %v736_v18  ;;  %vm770_vm2 = vcmp.gt.f32.partialorder %v738_v62, 0.0  ;;  %v802_v1 = vmul.f32 0.2, %v738_v62 }
 0x1a0   :  { %v804_v48 = vmul.f32 0.2, %v740_v12  ;;  %vm772_vm3 = vcmp.gt.f32.partialorder %v740_v12, 0.0  ;;  %v6360_v14 = vrot.slane %v221_v26, %v6078_v2  ;;  %v806_v35 = vmul.f32 0.2, %v742_v57 }
 0x1a1   :  { %v832_v6 = vsel %vm768_vm1, %v736_v18, %v800_v7  ;;  %v834_v9 = vsel %vm770_vm2, %v738_v62, %v802_v1  ;;  %v223_v18 = vcombine.high %v207_v20, %v207_v20  ;;  %v744_v61 = vadd.f32 %v6275_v37, %v370_v32  ;;  %v6376_v7 = vpop.permute.xlu0 %1281 }
 0x1a2   :  { %v6351_v29 = vmul.f32 %v6267_v30, %v832_v6  ;;  %v6362_v6 = vpop.permute.xlu1 %693  ;;  %v6365_v1 = vmul.f32 %v6267_v30, %v834_v9  ;;  %v836_v4 = vsel %vm772_vm3, %v740_v12, %v804_v48  ;;  %v372_v59 = vadd.f32 %v6327_v0, %v6360_v14  ;;  %9011 = vst [vmem:[#allocation41_spill] sm:$0xff] %v6376_v7 }
 0x1a3   :  { %vm774_vm4 = vcmp.gt.f32.partialorder %v742_v57, 0.0  ;;  %v225_v20 = vcombine.high %v221_v26, %v221_v26  ;;  %v233_v62 = vrot.slane %v6208_v50, %v6298_v51  ;;  %v6379_v12 = vrot.slane %v223_v18, %v6078_v2 }
 0x1a4   :  { %9009 = vst [vmem:[#allocation39_spill] sm:$0xff] %v6351_v29  ;;  %2232 = vrot.lane.b32.xlu1 %v6351_v29, %s6004_s7  ;;  %937 = vrot.lane.b32.xlu0 %v6351_v29, %s6005_s14  ;;  %9010 = vst [vmem:[#allocation40_spill] sm:$0xff] %v6365_v1  ;;  %v6382_v37 = vmul.f32 %v6267_v30, %v836_v4  ;;  %v838_v9 = vsel %vm774_vm4, %v742_v57, %v806_v35  ;;  %v808_v48 = vmul.f32 0.2, %v744_v61 }
 0x1a5   :  { %v746_v32 = vadd.f32 %v6279_v39, %v372_v59  ;;  %vm776_vm5 = vcmp.gt.f32.partialorder %v744_v61, 0.0  ;;  %v6394_v26 = vrot.slane %v225_v20, %v6078_v2  ;;  %v249_v57 = vrot.slane %v233_v62, %v6298_v51  ;;  %v6402_v35 = vpop.permute.xlu0 %355 }
 0x1a6   :  { %9012 = vst [vmem:[#allocation42_spill] sm:$0xff] %v6382_v37  ;;  %v6387_v29 = vpop.permute.xlu1 %697  ;;  %v241_v18 = vcombine.high %v233_v62, %v233_v62  ;;  %v6398_v39 = vmul.f32 %v6267_v30, %v838_v9  ;;  %v840_v59 = vsel %vm776_vm5, %v744_v61, %v808_v48 }
 0x1a7   :  { %v376_v4 = vadd.f32 %v6327_v0, %v6394_v26  ;;  %v810_v7 = vmul.f32 0.2, %v746_v32  ;;  %vm778_vm6 = vcmp.gt.f32.partialorder %v746_v32, 0.0  ;;  %v6412_v20 = vrot.slane %v249_v57, %v6078_v2 }
 0x1a8   :  { %2236 = vrot.lane.b32.xlu1 %v6365_v1, %s6004_s7  ;;  %941 = vrot.lane.b32.xlu0 %v6365_v1, %s6005_s14  ;;  %v374_v1 = vadd.f32 %v6327_v0, %v6379_v12  ;;  %9013 = vst [vmem:[#allocation43_spill] sm:$0xff] %v6398_v39  ;;  %v263_v62 = vrot.slane %v241_v18, %v6298_v51 }
 0x1a9   :  { %v6418_v61 = vmul.f32 %v6267_v30, %v840_v59  ;;  %v378_v48 = vadd.f32 %v6327_v0, %v6412_v20 }
 0x1aa   :  { %v748_v58 = vadd.f32 %v6285_v42, %v374_v1  ;;  %v6415_v9 = vpop.permute.xlu1 %701  ;;  %v750_v42 = vadd.f32 %v6289_v46, %v376_v4  ;;  %v361_v1 = vadd.f32 %v6402_v35, %v6320_v44  ;;  %v363_v46 = vadd.f32 %v6402_v35, %v6323_v45 }
 0x1ab   :  { %9014 = vst [vmem:[#allocation44_spill] sm:$0xff] %v6418_v61  ;;  %v6433_v18 = vrot.slane %v263_v62, %v6078_v2  ;;  %v271_v44 = vcombine.high %v249_v57, %v249_v57 }
 0x1ac   :  { %2240 = vrot.lane.b32.xlu1 %v6382_v37, %s6004_s7  ;;  %945 = vrot.lane.b32.xlu0 %v6382_v37, %s6005_s14  ;;  %v226_v37 = vcombine.high %v6208_v50, %v6208_v50  ;;  %v812_v50 = vmul.f32 0.2, %v748_v58  ;;  %vm780_vm7 = vcmp.gt.f32.partialorder %v748_v58, 0.0  ;;  %vm782_vm8 = vcmp.gt.f32.partialorder %v750_v42, 0.0 }
 0x1ad   :  { %v737_v57 = vadd.f32 %v6230_v5, %v363_v46 }
 0x1ae   :  { %v240_v56 = vrot.slane %v226_v37, %v6298_v51  ;;  %v735_v37 = vadd.f32 %v6228_v63, %v361_v1  ;;  %v6440_v59 = vpop.permute.xlu1 %1138  ;;  %v844_v52 = vsel %vm780_vm7, %v748_v58, %v812_v50  ;;  %v365_v63 = vadd.f32 %v6402_v35, %v6330_v53 }
 0x1af   :  { %9016 = vst [vmem:[#allocation46_spill] sm:$0xff] %v6440_v59  ;;  %v273_v50 = vcombine.high %v263_v62, %v263_v62  ;;  %v6455_v58 = vmul.f32 %v6267_v30, %v844_v52  ;;  %vm769_vm11 = vcmp.gt.f32.partialorder %v737_v57, 0.0 }
 0x1b0   :  { %2244 = vrot.lane.b32.xlu1 %v6398_v39, %s6004_s7  ;;  %949 = vrot.lane.b32.xlu0 %v6398_v39, %s6005_s14  ;;  %v842_v39 = vsel %vm778_vm6, %v746_v32, %v810_v7  ;;  %v814_v7 = vmul.f32 0.2, %v750_v42  ;;  %v752_v32 = vadd.f32 %v6295_v49, %v378_v48  ;;  %v242_v45 = vcombine.high %v240_v56, %v240_v56 }
 0x1b1   :  { %v6436_v4 = vmul.f32 %v6267_v30, %v842_v39  ;;  %v6452_v49 = vrot.slane %v271_v44, %v6078_v2  ;;  %9017 = vst [vmem:[#allocation47_spill] sm:$0xff] %v6455_v58  ;;  %v799_v1 = vmul.f32 0.2, %v735_v37  ;;  %vm767_vm9 = vcmp.gt.f32.partialorder %v735_v37, 0.0 }
 0x1b2   :  { %v846_v39 = vsel %vm782_vm8, %v750_v42, %v814_v7  ;;  %v816_v48 = vmul.f32 0.2, %v752_v32  ;;  %vm784_vm10 = vcmp.gt.f32.partialorder %v752_v32, 0.0  ;;  %v256_v46 = vrot.slane %v240_v56, %v6298_v51  ;;  %v6465_v53 = vpop.permute.xlu1 %1145 }
 0x1b3   :  { %9015 = vst [vmem:[#allocation45_spill] sm:$0xff] %v6436_v4  ;;  %v382_v5 = vadd.f32 %v6327_v0, %v6452_v49  ;;  %9018 = vst [vmem:[#allocation48_spill] sm:$0xff] %v6465_v53  ;;  %v270_v52 = vrot.slane %v242_v45, %v6298_v51  ;;  %v6469_v62 = vmul.f32 %v6267_v30, %v846_v39  ;;  %v801_v42 = vmul.f32 0.2, %v737_v57 }
 0x1b4   :  { %2248 = vrot.lane.b32.xlu1 %v6418_v61, %s6004_s7  ;;  %953 = vrot.lane.b32.xlu0 %v6418_v61, %s6005_s14  ;;  %v380_v61 = vadd.f32 %v6327_v0, %v6433_v18  ;;  %v848_v44 = vsel %vm784_vm10, %v752_v32, %v816_v48  ;;  %v739_v56 = vadd.f32 %v6236_v8, %v365_v63 }
 0x1b5   :  { %9019 = vst [vmem:[#allocation49_spill] sm:$0xff] %v6469_v62  ;;  %v367_v7 = vadd.f32 %v6402_v35, %v6340_v16  ;;  %v6488_v8 = vrot.slane %v270_v52, %v6078_v2  ;;  %v369_v32 = vadd.f32 %v6402_v35, %v6347_v33  ;;  %v833_v45 = vsel %vm769_vm11, %v737_v57, %v801_v42 }
 0x1b6   :  { %v754_v31 = vadd.f32 %v6304_v55, %v380_v61  ;;  %v6472_v55 = vrot.slane %v273_v50, %v6078_v2  ;;  %v831_v61 = vsel %vm767_vm9, %v735_v37, %v799_v1  ;;  %v6485_v37 = vrot.slane %v256_v46, %v6078_v2  ;;  %v6501_v1 = vpop.permute.xlu1 %1156 }
 0x1b7   :  { %v6491_v16 = vmul.f32 %v6267_v30, %v831_v61  ;;  %v803_v63 = vmul.f32 0.2, %v739_v56  ;;  %v741_v50 = vadd.f32 %v6239_v10, %v367_v7  ;;  %9022 = vst [vmem:[#allocation52_spill] sm:$0xff] %v6501_v1  ;;  %vm771_vm13 = vcmp.gt.f32.partialorder %v739_v56, 0.0 }
 0x1b8   :  { %2252 = vrot.lane.b32.xlu1 %v6436_v4, %s6004_s7  ;;  %957 = vrot.lane.b32.xlu0 %v6436_v4, %s6005_s14  ;;  %v756_v4 = vadd.f32 %v6311_v60, %v382_v5  ;;  %v384_v51 = vadd.f32 %v6327_v0, %v6472_v55  ;;  %vm786_vm12 = vcmp.gt.f32.partialorder %v754_v31, 0.0  ;;  %v6494_v60 = vmul.f32 %v6267_v30, %v848_v44 }
 0x1b9   :  { %9020 = vst [vmem:[#allocation50_spill] sm:$0xff] %v6491_v16  ;;  %v386_v39 = vadd.f32 %v6327_v0, %v6485_v37  ;;  %v274_v44 = vcombine.high %v270_v52, %v270_v52  ;;  %v388_v10 = vadd.f32 %v6327_v0, %v6488_v8  ;;  %v6511_v33 = vmul.f32 %v6267_v30, %v833_v45 }
 0x1ba   :  { %9021 = vst [vmem:[#allocation51_spill] sm:$0xff] %v6494_v60  ;;  %v820_v5 = vmul.f32 0.2, %v756_v4  ;;  %v758_v61 = vadd.f32 %v6325_v54, %v384_v51  ;;  %vm788_vm14 = vcmp.gt.f32.partialorder %v756_v4, 0.0  ;;  %v371_v54 = vadd.f32 %v6402_v35, %v6360_v14  ;;  %v6530_v14 = vpop.permute.xlu1 %1167 }
 0x1bb   :  { %9023 = vst [vmem:[#allocation53_spill] sm:$0xff] %v6511_v33  ;;  %v760_v52 = vadd.f32 %v6344_v3, %v386_v39  ;;  %vm773_vm15 = vcmp.gt.f32.partialorder %v741_v50, 0.0  ;;  %v6521_v51 = vrot.slane %v274_v44, %v6078_v2  ;;  %9025 = vst [vmem:[#allocation55_spill] sm:$0xff] %v6530_v14 }
 0x1bc   :  { %2256 = vrot.lane.b32.xlu1 %v6455_v58, %s6004_s7  ;;  %961 = vrot.lane.b32.xlu0 %v6455_v58, %s6005_s14  ;;  %v818_v58 = vmul.f32 0.2, %v754_v31  ;;  %v852_v42 = vsel %vm788_vm14, %v756_v4, %v820_v5  ;;  %v822_v7 = vmul.f32 0.2, %v758_v61  ;;  %vm790_vm1 = vcmp.gt.f32.partialorder %v758_v61, 0.0 }
 0x1bd   :  { %v6538_v45 = vmul.f32 %v6267_v30, %v852_v42  ;;  %v824_v39 = vmul.f32 0.2, %v760_v52  ;;  %vm792_vm3 = vcmp.gt.f32.partialorder %v760_v52, 0.0 }
 0x1be   :  { %v850_v48 = vsel %vm786_vm12, %v754_v31, %v818_v58  ;;  %v743_v31 = vadd.f32 %v6243_v11, %v369_v32  ;;  %v835_v58 = vsel %vm771_vm13, %v739_v56, %v803_v63  ;;  %v745_v56 = vadd.f32 %v6245_v13, %v371_v54 }
 0x1bf   :  { %v6517_v57 = vmul.f32 %v6267_v30, %v850_v48  ;;  %v6533_v3 = vmul.f32 %v6267_v30, %v835_v58  ;;  %v762_v32 = vadd.f32 %v6362_v6, %v388_v10  ;;  %9027 = vst [vmem:[#allocation57_spill] sm:$0xff] %v6538_v45  ;;  %v854_v48 = vsel %vm790_vm1, %v758_v61, %v822_v7  ;;  %v6556_v10 = vpop.permute.xlu1 %1178 }
 0x1c0   :  { %2260 = vrot.lane.b32.xlu1 %v6469_v62, %s6004_s7  ;;  %965 = vrot.lane.b32.xlu0 %v6469_v62, %s6005_s14  ;;  %v272_v62 = vcombine.high %v256_v46, %v256_v46  ;;  %v805_v46 = vmul.f32 0.2, %v741_v50  ;;  %v807_v4 = vmul.f32 0.2, %v743_v31  ;;  %vm775_vm2 = vcmp.gt.f32.partialorder %v743_v31, 0.0  ;;  %9030 = vst [vmem:[#allocation60_spill] sm:$0xff] %v6556_v10 }
 0x1c1   :  { %9024 = vst [vmem:[#allocation54_spill] sm:$0xff] %v6517_v57  ;;  %9026 = vst [vmem:[#allocation56_spill] sm:$0xff] %v6533_v3  ;;  %v392_v13 = vadd.f32 %v6327_v0, %v6521_v51  ;;  %v6554_v61 = vmul.f32 %v6267_v30, %v854_v48  ;;  %vm777_vm4 = vcmp.gt.f32.partialorder %v745_v56, 0.0  ;;  %v809_v44 = vmul.f32 0.2, %v745_v56 }
 0x1c2   :  { %v6528_v11 = vrot.slane %v272_v62, %v6078_v2  ;;  %v837_v63 = vsel %vm773_vm15, %v741_v50, %v805_v46  ;;  %v373_v62 = vadd.f32 %v6402_v35, %v6379_v12  ;;  %v839_v50 = vsel %vm775_vm2, %v743_v31, %v807_v4 }
 0x1c3   :  { %v6551_v6 = vmul.f32 %v6267_v30, %v837_v63  ;;  %9029 = vst [vmem:[#allocation59_spill] sm:$0xff] %v6554_v61  ;;  %v856_v12 = vsel %vm792_vm3, %v760_v52, %v824_v39  ;;  %v826_v54 = vmul.f32 0.2, %v762_v32  ;;  %vm794_vm5 = vcmp.gt.f32.partialorder %v762_v32, 0.0 }
 0x1c4   :  { %935 = vrot.lane.b32.xlu1 %v6491_v16, %s6005_s14  ;;  %969 = vrot.lane.b32.xlu0 %v6494_v60, %s6005_s14  ;;  %v390_v5 = vadd.f32 %v6327_v0, %v6528_v11  ;;  %v747_v58 = vadd.f32 %v6247_v15, %v373_v62  ;;  %v375_v0 = vadd.f32 %v6402_v35, %v6394_v26  ;;  %vm1508_vm3 = vcmask 130112  }
 0x1c5   :  { %9028 = vst [vmem:[#allocation58_spill] sm:$0xff] %v6551_v6  ;;  %v766_v31 = vadd.f32 %v6415_v9, %v392_v13  ;;  %v6568_v52 = vmul.f32 %v6267_v30, %v839_v50  ;;  %v6571_v42 = vmul.f32 %v6267_v30, %v856_v12  ;;  %v841_v15 = vsel %vm777_vm4, %v745_v56, %v809_v44  ;;  %v6580_v9 = vpop.permute.xlu1 %1189 }
 0x1c6   :  { %v764_v46 = vadd.f32 %v6387_v29, %v390_v5  ;;  %v377_v29 = vadd.f32 %v6402_v35, %v6412_v20  ;;  %v858_v26 = vsel %vm794_vm5, %v762_v32, %v826_v54  ;;  %v811_v7 = vmul.f32 0.2, %v747_v58  ;;  %9033 = vst [vmem:[#allocation63_spill] sm:$0xff] %v6580_v9 }
 0x1c7   :  { %9031 = vst [vmem:[#allocation61_spill] sm:$0xff] %v6568_v52  ;;  %9032 = vst [vmem:[#allocation62_spill] sm:$0xff] %v6571_v42  ;;  %v749_v63 = vadd.f32 %v6249_v17, %v375_v0  ;;  %vm779_vm6 = vcmp.gt.f32.partialorder %v747_v58, 0.0  ;;  %vm798_vm8 = vcmp.gt.f32.partialorder %v766_v31, 0.0  ;;  %v830_v56 = vmul.f32 0.2, %v766_v31 }
 0x1c8   :  { %939 = vrot.lane.b32.xlu1 %v6511_v33, %s6005_s14  ;;  %973 = vrot.lane.b32.xlu0 %v6517_v57, %s6005_s14  ;;  %v828_v4 = vmul.f32 0.2, %v764_v46  ;;  %vm796_vm7 = vcmp.gt.f32.partialorder %v764_v46, 0.0  ;;  %v6583_v39 = vmul.f32 %v6267_v30, %v841_v15  ;;  %v6586_v20 = vmul.f32 %v6267_v30, %v858_v26 }
 0x1c9   :  { %v379_v17 = vadd.f32 %v6402_v35, %v6433_v18  ;;  %v843_v32 = vsel %vm779_vm6, %v747_v58, %v811_v7  ;;  %v813_v62 = vmul.f32 0.2, %v749_v63  ;;  %v751_v5 = vadd.f32 %v6251_v19, %v377_v29  ;;  %v6601_v18 = vpop.permute.xlu1 %1200 }
 0x1ca   :  { %9034 = vst [vmem:[#allocation64_spill] sm:$0xff] %v6583_v39  ;;  %9035 = vst [vmem:[#allocation65_spill] sm:$0xff] %v6586_v20  ;;  %v860_v48 = vsel %vm796_vm7, %v764_v46, %v828_v4  ;;  %vm781_vm9 = vcmp.gt.f32.partialorder %v749_v63, 0.0  ;;  %v862_v13 = vsel %vm798_vm8, %v766_v31, %v830_v56  ;;  %v6596_v50 = vmul.f32 %v6267_v30, %v843_v32 }
 0x1cb   :  { %v6599_v12 = vmul.f32 %v6267_v30, %v860_v48  ;;  %9038 = vst [vmem:[#allocation68_spill] sm:$0xff] %v6601_v18  ;;  %v845_v44 = vsel %vm781_vm9, %v749_v63, %v813_v62  ;;  %v815_v54 = vmul.f32 0.2, %v751_v5  ;;  %v753_v19 = vadd.f32 %v6253_v21, %v379_v17 }
 0x1cc   :  { %943 = vrot.lane.b32.xlu1 %v6533_v3, %s6005_s14  ;;  %977 = vrot.lane.b32.xlu0 %v6538_v45, %s6005_s14  ;;  %9036 = vst [vmem:[#allocation66_spill] sm:$0xff] %v6596_v50  ;;  %v381_v58 = vadd.f32 %v6402_v35, %v6452_v49  ;;  %vm783_vm10 = vcmp.gt.f32.partialorder %v751_v5, 0.0  ;;  %v6611_v46 = vmul.f32 %v6267_v30, %v862_v13  ;;  %vm1645_vm4 = vcmask 1041409  }
 0x1cd   :  { %9037 = vst [vmem:[#allocation67_spill] sm:$0xff] %v6599_v12  ;;  %v6614_v0 = vmul.f32 %v6267_v30, %v845_v44  ;;  %v847_v31 = vsel %vm783_vm10, %v751_v5, %v815_v54  ;;  %v817_v15 = vmul.f32 0.2, %v753_v19  ;;  %v383_v49 = vadd.f32 %v6402_v35, %v6472_v55  ;;  %v6623_v29 = vpop.permute.xlu1 %1211 }
 0x1ce   :  { %9039 = vst [vmem:[#allocation69_spill] sm:$0xff] %v6611_v46  ;;  %v755_v21 = vadd.f32 %v6255_v22, %v381_v58  ;;  %vm785_vm11 = vcmp.gt.f32.partialorder %v753_v19, 0.0  ;;  %9041 = vst [vmem:[#allocation71_spill] sm:$0xff] %v6623_v29  ;;  %v6626_v26 = vmul.f32 %v6267_v30, %v847_v31  ;;  %v385_v22 = vadd.f32 %v6402_v35, %v6485_v37 }
 0x1cf   :  { %9040 = vst [vmem:[#allocation70_spill] sm:$0xff] %v6614_v0  ;;  %v849_v7 = vsel %vm785_vm11, %v753_v19, %v817_v15  ;;  %v757_v63 = vadd.f32 %v6257_v23, %v383_v49  ;;  %v387_v23 = vadd.f32 %v6402_v35, %v6488_v8  ;;  %vm1647_vm5 = vcmask 1042434  }
 0x1d0   :  { %947 = vrot.lane.b32.xlu1 %v6551_v6, %s6005_s14  ;;  %981 = vrot.lane.b32.xlu0 %v6554_v61, %s6005_s14  ;;  %9042 = vst [vmem:[#allocation72_spill] sm:$0xff] %v6626_v26  ;;  %v819_v4 = vmul.f32 0.2, %v755_v21  ;;  %vm787_vm12 = vcmp.gt.f32.partialorder %v755_v21, 0.0  ;;  %v6636_v55 = vmul.f32 %v6267_v30, %v849_v7  ;;  %v759_v48 = vadd.f32 %v6259_v24, %v385_v22 }
 0x1d1   :  { %v6638_v56 = vpop.permute.xlu1 %1222  ;;  %v821_v32 = vmul.f32 0.2, %v757_v63  ;;  %vm789_vm13 = vcmp.gt.f32.partialorder %v757_v63, 0.0  ;;  %v761_v13 = vadd.f32 %v6261_v25, %v387_v23  ;;  %v389_v24 = vadd.f32 %v6402_v35, %v6528_v11 }
 0x1d2   :  { %9043 = vst [vmem:[#allocation73_spill] sm:$0xff] %v6636_v55  ;;  %9044 = vst [vmem:[#allocation74_spill] sm:$0xff] %v6638_v56  ;;  %v851_v17 = vsel %vm787_vm12, %v755_v21, %v819_v4  ;;  %v823_v5 = vmul.f32 0.2, %v759_v48  ;;  %vm791_vm14 = vcmp.gt.f32.partialorder %v759_v48, 0.0  ;;  %v391_v25 = vadd.f32 %v6402_v35, %v6521_v51 }
 0x1d3   :  { %v6648_v37 = vmul.f32 %v6267_v30, %v851_v17  ;;  %v853_v62 = vsel %vm789_vm13, %v757_v63, %v821_v32  ;;  %v825_v19 = vmul.f32 0.2, %v761_v13  ;;  %v763_v58 = vadd.f32 %v6263_v27, %v389_v24  ;;  %v6716_v32 = vpop.permute.xlu0 %1292 }
 0x1d4   :  { %951 = vrot.lane.b32.xlu1 %v6568_v52, %s6005_s14  ;;  %985 = vrot.lane.b32.xlu0 %v6571_v42, %s6005_s14  ;;  %v6660_v44 = vmul.f32 %v6267_v30, %v853_v62  ;;  %v855_v54 = vsel %vm791_vm14, %v759_v48, %v823_v5  ;;  %vm793_vm15 = vcmp.gt.f32.partialorder %v761_v13, 0.0  ;;  %v765_v49 = vadd.f32 %v6265_v28, %v391_v25 }
 0x1d5   :  { %9045 = vst [vmem:[#allocation75_spill] sm:$0xff] %v6648_v37  ;;  %v6657_v8 = vpop.permute.xlu1 %1233  ;;  %v6670_v11 = vmul.f32 %v6267_v30, %v855_v54  ;;  %v857_v15 = vsel %vm793_vm15, %v761_v13, %v825_v19  ;;  %v827_v21 = vmul.f32 0.2, %v763_v58  ;;  %vm795_vm1 = vcmp.gt.f32.partialorder %v763_v58, 0.0  ;;  %9057 = vst [vmem:[#allocation87_spill] sm:$0xff] %v6716_v32 }
 0x1d6   :  { %9046 = vst [vmem:[#allocation76_spill] sm:$0xff] %v6657_v8  ;;  %9047 = vst [vmem:[#allocation77_spill] sm:$0xff] %v6660_v44  ;;  %v6680_v27 = vmul.f32 %v6267_v30, %v857_v15  ;;  %v829_v51 = vmul.f32 0.2, %v765_v49  ;;  %vm797_vm2 = vcmp.gt.f32.partialorder %v765_v49, 0.0  ;;  %vm1649_vm6 = vcmask 1043459  }
 0x1d7   :  { %9048 = vst [vmem:[#allocation78_spill] sm:$0xff] %v6670_v11  ;;  %v859_v35 = vsel %vm795_vm1, %v763_v58, %v827_v21  ;;  %v6728_v23 = vpop.permute.xlu0 %1303  ;;  %vm1651_vm7 = vcmask 1044484   ;;  %vm1653_vm8 = vcmask 1045509   ;;  %vm1655_vm9 = vcmask 1046534  }
 0x1d8   :  { %955 = vrot.lane.b32.xlu1 %v6583_v39, %s6005_s14  ;;  %989 = vrot.lane.b32.xlu0 %v6586_v20, %s6005_s14  ;;  %9050 = vst [vmem:[#allocation80_spill] sm:$0xff] %v6680_v27  ;;  %v6689_v7 = vmul.f32 %v6267_v30, %v859_v35  ;;  %v861_v4 = vsel %vm797_vm2, %v765_v49, %v829_v51  ;;  %9059 = vst [vmem:[#allocation89_spill] sm:$0xff] %v6728_v23  ;;  %vm1657_vm10 = vcmask 1047559   ;;  %vm1668_vm11 = vcmask 130048  }
 0x1d9   :  { %v6672_v31 = vpop.permute.xlu1 %1244  ;;  %v6696_v63 = vmul.f32 %v6267_v30, %v861_v4  ;;  %vm5495_vm12 = vcmask 195584   ;;  %vm5509_vm13 = vcmask 261120  }
 0x1da   :  { %9049 = vst [vmem:[#allocation79_spill] sm:$0xff] %v6672_v31  ;;  %9052 = vst [vmem:[#allocation82_spill] sm:$0xff] %v6689_v7 }
 0x1db   :  { %9053 = vst [vmem:[#allocation83_spill] sm:$0xff] %v6696_v63 }
 0x1dc   :  { %959 = vrot.lane.b32.xlu1 %v6596_v50, %s6005_s14  ;;  %993 = vrot.lane.b32.xlu0 %v6599_v12, %s6005_s14 }
 0x1dd   :  { %v6686_v28 = vpop.permute.xlu1 %1255 }
 0x1de   :  { %9051 = vst [vmem:[#allocation81_spill] sm:$0xff] %v6686_v28 }
 0x1e0   :  { %997 = vrot.lane.b32.xlu0 %v6611_v46, %s6005_s14  ;;  %963 = vrot.lane.b32.xlu1 %v6614_v0, %s6005_s14 }
 0x1e1   :  { %v6698_v22 = vpop.permute.xlu1 %1266 }
 0x1e2   :  { %9054 = vst [vmem:[#allocation84_spill] sm:$0xff] %v6698_v22 }
 0x1e4   :  { %2230 = vrot.lane.b32.xlu0 %v6491_v16, %s6004_s7  ;;  %967 = vrot.lane.b32.xlu1 %v6626_v26, %s6005_s14 }
 0x1e5   :  { %v6708_v17 = vpop.permute.xlu1 %1277 }
 0x1e6   :  { %9055 = vst [vmem:[#allocation85_spill] sm:$0xff] %v6708_v17 }
 0x1e8   :  { %2234 = vrot.lane.b32.xlu0 %v6511_v33, %s6004_s7  ;;  %971 = vrot.lane.b32.xlu1 %v6636_v55, %s6005_s14 }
 0x1e9   :  { %v6714_v30 = vpop.permute.xlu1 %1288 }
 0x1ea   :  { %9056 = vst [vmem:[#allocation86_spill] sm:$0xff] %v6714_v30 }
 0x1ec   :  { %2238 = vrot.lane.b32.xlu0 %v6533_v3, %s6004_s7  ;;  %975 = vrot.lane.b32.xlu1 %v6648_v37, %s6005_s14 }
 0x1ed   :  { %v6726_v48 = vpop.permute.xlu1 %1299 }
 0x1ee   :  { %9058 = vst [vmem:[#allocation88_spill] sm:$0xff] %v6726_v48 }
 0x1f0   :  { %2242 = vrot.lane.b32.xlu0 %v6551_v6, %s6004_s7  ;;  %979 = vrot.lane.b32.xlu1 %v6660_v44, %s6005_s14 }
 0x1f4   :  { %2246 = vrot.lane.b32.xlu0 %v6568_v52, %s6004_s7  ;;  %983 = vrot.lane.b32.xlu1 %v6670_v11, %s6005_s14 }
 0x1f8   :  { %2250 = vrot.lane.b32.xlu0 %v6583_v39, %s6004_s7  ;;  %987 = vrot.lane.b32.xlu1 %v6680_v27, %s6005_s14 }
 0x1fc   :  { %2254 = vrot.lane.b32.xlu0 %v6596_v50, %s6004_s7  ;;  %991 = vrot.lane.b32.xlu1 %v6689_v7, %s6005_s14 }
 0x200   :  { %2258 = vrot.lane.b32.xlu0 %v6614_v0, %s6004_s7  ;;  %995 = vrot.lane.b32.xlu1 %v6696_v63, %s6005_s14 }
 0x204   :  { %2262 = vrot.lane.b32.xlu0 %v6626_v26, %s6004_s7  ;;  %2264 = vrot.lane.b32.xlu1 %v6494_v60, %s6004_s7 }
 0x208   :  { %2266 = vrot.lane.b32.xlu0 %v6636_v55, %s6004_s7  ;;  %2268 = vrot.lane.b32.xlu1 %v6517_v57, %s6004_s7 }
 0x20c   :  { %2270 = vrot.lane.b32.xlu0 %v6648_v37, %s6004_s7  ;;  %2272 = vrot.lane.b32.xlu1 %v6538_v45, %s6004_s7 }
 0x210   :  { %2274 = vrot.lane.b32.xlu0 %v6660_v44, %s6004_s7  ;;  %2276 = vrot.lane.b32.xlu1 %v6554_v61, %s6004_s7 }
 0x214   :  { %2278 = vrot.lane.b32.xlu0 %v6670_v11, %s6004_s7  ;;  %2280 = vrot.lane.b32.xlu1 %v6571_v42, %s6004_s7 }
 0x216   :  { %v6734_v62 = vpop.permute.xlu1 %2232  ;;  %v938_v5 = vpop.permute.xlu0 %937 }
 0x217   :  { %v1034_v45 = vsel %vm87_vm0, %v938_v5, 0.0 }
 0x218   :  { %2282 = vrot.lane.b32.xlu0 %v6680_v27, %s6004_s7  ;;  %2284 = vrot.lane.b32.xlu1 %v6586_v20, %s6004_s7 }
 0x21a   :  { %v6740_v13 = vpop.permute.xlu1 %2236  ;;  %v942_v24 = vpop.permute.xlu0 %941 }
 0x21b   :  { %v1040_v27 = vsel %vm87_vm0, %v942_v24, 0.0 }
 0x21c   :  { %2286 = vrot.lane.b32.xlu0 %v6689_v7, %s6004_s7  ;;  %2288 = vrot.lane.b32.xlu1 %v6599_v12, %s6004_s7 }
 0x21e   :  { %v6746_v54 = vpop.permute.xlu1 %2240  ;;  %v946_v19 = vpop.permute.xlu0 %945 }
 0x21f   :  { %v1046_v55 = vsel %vm87_vm0, %v946_v19, 0.0 }
 0x222   :  { %v6748_v58 = vpop.permute.xlu1 %2244  ;;  %v950_v25 = vpop.permute.xlu0 %949 }
 0x226   :  { %v6750_v15 = vpop.permute.xlu1 %2248  ;;  %v954_v21 = vpop.permute.xlu0 %953 }
 0x22a   :  { %v6752_v49 = vpop.permute.xlu1 %2252  ;;  %v958_v35 = vpop.permute.xlu0 %957 }
 0x22e   :  { %v6754_v51 = vpop.permute.xlu1 %2256  ;;  %v962_v4 = vpop.permute.xlu0 %961 }
 0x232   :  { %v6756_v20 = vpop.permute.xlu1 %2260  ;;  %v966_v42 = vpop.permute.xlu0 %965 }
 0x236   :  { %v6758_v61 = vpop.permute.xlu1 %935  ;;  %v970_v57 = vpop.permute.xlu0 %969 }
 0x23a   :  { %v940_v12 = vpop.permute.xlu1 %939  ;;  %v974_v11 = vpop.permute.xlu0 %973 }
 0x23b   :  { %1035 = vadd.xlane.f32.xlu0 %v1034_v45  ;;  %v1037_v7 = vsel %vm87_vm0, %v940_v12, 0.0  ;;  %v1052_v45 = vsel %vm87_vm0, %v950_v25, 0.0  ;;  %v1070_v25 = vsel %vm87_vm0, %v962_v4, 0.0 }
 0x23e   :  { %v944_v60 = vpop.permute.xlu1 %943  ;;  %v978_v0 = vpop.permute.xlu0 %977 }
 0x23f   :  { %1038 = vadd.xlane.f32.xlu0 %v1037_v7  ;;  %v1043_v37 = vsel %vm87_vm0, %v944_v60, 0.0 }
 0x240   :  { %1041 = vadd.xlane.f32.xlu1 %v1040_v27  ;;  %v1058_v27 = vsel %vm87_vm0, %v954_v21, 0.0 }
 0x242   :  { %v948_v44 = vpop.permute.xlu1 %947  ;;  %v982_v60 = vpop.permute.xlu0 %981 }
 0x243   :  { %1044 = vadd.xlane.f32.xlu0 %v1043_v37  ;;  %v1049_v5 = vsel %vm87_vm0, %v948_v44, 0.0 }
 0x244   :  { %1047 = vadd.xlane.f32.xlu1 %v1046_v55  ;;  %v1064_v55 = vsel %vm87_vm0, %v958_v35, 0.0 }
 0x246   :  { %v952_v26 = vpop.permute.xlu1 %951 }
 0x247   :  { %1050 = vadd.xlane.f32.xlu0 %v1049_v5  ;;  %v1055_v7 = vsel %vm87_vm0, %v952_v26, 0.0  ;;  %v986_v5 = vpop.permute.xlu0 %985 }
 0x248   :  { %1053 = vadd.xlane.f32.xlu1 %v1052_v45  ;;  %v1076_v45 = vsel %vm87_vm0, %v966_v42, 0.0 }
 0x24a   :  { %v956_v12 = vpop.permute.xlu1 %955 }
 0x24b   :  { %1056 = vadd.xlane.f32.xlu0 %v1055_v7  ;;  %v1061_v24 = vsel %vm87_vm0, %v956_v12, 0.0  ;;  %v990_v12 = vpop.permute.xlu0 %989 }
 0x24c   :  { %1059 = vadd.xlane.f32.xlu1 %v1058_v27  ;;  %v1082_v27 = vsel %vm87_vm0, %v970_v57, 0.0 }
 0x24e   :  { %v960_v37 = vpop.permute.xlu1 %959 }
 0x24f   :  { %1062 = vadd.xlane.f32.xlu0 %v1061_v24  ;;  %v1067_v19 = vsel %vm87_vm0, %v960_v37, 0.0  ;;  %v1088_v24 = vsel %vm87_vm0, %v974_v11, 0.0 }
 0x250   :  { %1065 = vadd.xlane.f32.xlu1 %v1064_v55  ;;  %v994_v55 = vpop.permute.xlu0 %993 }
 0x252   :  { %v964_v44 = vpop.permute.xlu1 %963 }
 0x253   :  { %1068 = vadd.xlane.f32.xlu0 %v1067_v19  ;;  %v1073_v21 = vsel %vm87_vm0, %v964_v44, 0.0  ;;  %v1094_v19 = vsel %vm87_vm0, %v978_v0, 0.0 }
 0x254   :  { %1071 = vadd.xlane.f32.xlu1 %v1070_v25  ;;  %v998_v25 = vpop.permute.xlu0 %997 }
 0x256   :  { %v968_v26 = vpop.permute.xlu1 %967 }
 0x257   :  { %1074 = vadd.xlane.f32.xlu0 %v1073_v21  ;;  %v1079_v35 = vsel %vm87_vm0, %v968_v26, 0.0  ;;  %v1100_v21 = vsel %vm87_vm0, %v982_v60, 0.0 }
 0x258   :  { %1077 = vadd.xlane.f32.xlu1 %v1076_v45 }
 0x25a   :  { %v972_v7 = vpop.permute.xlu1 %971 }
 0x25b   :  { %1080 = vadd.xlane.f32.xlu0 %v1079_v35  ;;  %v1085_v4 = vsel %vm87_vm0, %v972_v7, 0.0  ;;  %v1106_v7 = vsel %vm87_vm0, %v986_v5, 0.0  ;;  %v2231_v35 = vpop.permute.xlu0 %2230  ;;  %v1124_v5 = vsel %vm87_vm0, %v998_v25, 0.0 }
 0x25c   :  { %1083 = vadd.xlane.f32.xlu1 %v1082_v27 }
 0x25e   :  { %v976_v37 = vpop.permute.xlu1 %975 }
 0x25f   :  { %1086 = vadd.xlane.f32.xlu0 %v1085_v4  ;;  %v1091_v42 = vsel %vm87_vm0, %v976_v37, 0.0  ;;  %v1112_v37 = vsel %vm87_vm0, %v990_v12, 0.0  ;;  %v2235_v4 = vpop.permute.xlu0 %2234 }
 0x260   :  { %1089 = vadd.xlane.f32.xlu1 %v1088_v24 }
 0x262   :  { %v980_v44 = vpop.permute.xlu1 %979 }
 0x263   :  { %1092 = vadd.xlane.f32.xlu0 %v1091_v42  ;;  %v1097_v57 = vsel %vm87_vm0, %v980_v44, 0.0  ;;  %v1118_v44 = vsel %vm87_vm0, %v994_v55, 0.0 }
 0x264   :  { %1095 = vadd.xlane.f32.xlu1 %v1094_v19  ;;  %v2239_v19 = vpop.permute.xlu0 %2238 }
 0x266   :  { %v984_v26 = vpop.permute.xlu1 %983 }
 0x267   :  { %1098 = vadd.xlane.f32.xlu0 %v1097_v57  ;;  %v1103_v11 = vsel %vm87_vm0, %v984_v26, 0.0  ;;  %v1031_v26 = vsel %vm87_vm0, %v6758_v61, 0.0 }
 0x268   :  { %1101 = vadd.xlane.f32.xlu1 %v1100_v21  ;;  %v2243_v12 = vpop.permute.xlu0 %2242 }
 0x26a   :  { %v988_v45 = vpop.permute.xlu1 %987 }
 0x26b   :  { %1104 = vadd.xlane.f32.xlu0 %v1103_v11  ;;  %v1109_v0 = vsel %vm87_vm0, %v988_v45, 0.0  ;;  %v6006_v45 = vmov 0  }
 0x26c   :  { %1107 = vadd.xlane.f32.xlu1 %v1106_v7  ;;  %v2247_v57 = vpop.permute.xlu0 %2246  ;;  %5617 = vset.pattern.permute.xlu0 %v6006_v45 }
 0x26d   :  { %5616 = vset.pattern.permute.xlu1 %v6006_v45 }
 0x26e   :  { %v992_v27 = vpop.permute.xlu1 %991 }
 0x26f   :  { %1110 = vadd.xlane.f32.xlu0 %v1109_v0  ;;  %v1115_v24 = vsel %vm87_vm0, %v992_v27, 0.0 }
 0x270   :  { %1113 = vadd.xlane.f32.xlu1 %v1112_v37  ;;  %v2251_v21 = vpop.permute.xlu0 %2250  ;;  %v2326_v37 = vsel %vm87_vm0, %v2231_v35, 0.0  ;;  %v2341_v35 = vsel %vm87_vm0, %v6746_v54, 0.0 }
 0x271   :  { %v2356_v54 = vsel %vm87_vm0, %v2251_v21, 0.0 }
 0x272   :  { %v996_v60 = vpop.permute.xlu1 %995 }
 0x273   :  { %1116 = vadd.xlane.f32.xlu0 %v1115_v24  ;;  %v1121_v42 = vsel %vm87_vm0, %v996_v60, 0.0 }
 0x274   :  { %1119 = vadd.xlane.f32.xlu1 %v1118_v44  ;;  %v2255_v55 = vpop.permute.xlu0 %2254  ;;  %v2332_v44 = vsel %vm87_vm0, %v2235_v4, 0.0  ;;  %v2344_v4 = vsel %vm87_vm0, %v2243_v12, 0.0  ;;  %v2359_v12 = vsel %vm87_vm0, %v6752_v49, 0.0  ;;  %v2371_v49 = vsel %vm87_vm0, %v6756_v20, 0.0 }
 0x276   :  { %v2265_v7 = vpop.permute.xlu1 %2264 }
 0x277   :  { %1122 = vadd.xlane.f32.xlu0 %v1121_v42  ;;  %v2329_v42 = vsel %vm87_vm0, %v6734_v62, 0.0  ;;  %v2347_v62 = vsel %vm87_vm0, %v6748_v58, 0.0  ;;  %v2362_v58 = vsel %vm87_vm0, %v2255_v55, 0.0 }
 0x278   :  { %1125 = vadd.xlane.f32.xlu1 %v1124_v5  ;;  %v2259_v25 = vpop.permute.xlu0 %2258 }
 0x27a   :  { %v2269_v0 = vpop.permute.xlu1 %2268 }
 0x27c   :  { %1032 = vadd.xlane.f32.xlu1 %v1031_v26  ;;  %v2263_v11 = vpop.permute.xlu0 %2262  ;;  %v2335_v26 = vsel %vm87_vm0, %v6740_v13, 0.0  ;;  %v2350_v13 = vsel %vm87_vm0, %v2247_v57, 0.0  ;;  %v2365_v57 = vsel %vm87_vm0, %v6754_v51, 0.0  ;;  %v2377_v51 = vsel %vm87_vm0, %v2265_v7, 0.0 }
 0x27d   :  { %v2374_v55 = vsel %vm87_vm0, %v2263_v11, 0.0 }
 0x27e   :  { %v2273_v24 = vpop.permute.xlu1 %2272 }
 0x280   :  { %v2267_v27 = vpop.permute.xlu0 %2266 }
 0x282   :  { %v2277_v5 = vpop.permute.xlu1 %2276 }
 0x284   :  { %v2271_v61 = vpop.permute.xlu0 %2270 }
 0x285   :  { %v2386_v20 = vsel %vm87_vm0, %v2271_v61, 0.0 }
 0x288   :  { %v2275_v60 = vpop.permute.xlu0 %2274 }
 0x289   :  { %v2392_v7 = vsel %vm87_vm0, %v2275_v60, 0.0 }
 0x28c   :  { %v2279_v45 = vpop.permute.xlu0 %2278 }
 0x28d   :  { %2292 = vrot.lane.b32.xlu1 %v6611_v46, %s6004_s7  ;;  %2290 = vrot.lane.b32.xlu0 %v6696_v63, %s6004_s7  ;;  %v2338_v46 = vsel %vm87_vm0, %v2239_v19, 0.0 }
 0x2ac   :  { %2327 = vadd.xlane.f32.xlu0 %v2326_v37  ;;  %v2281_v37 = vpop.permute.xlu1 %2280 }
 0x2b0   :  { %2333 = vadd.xlane.f32.xlu0 %v2332_v44  ;;  %v2283_v44 = vpop.permute.xlu0 %2282 }
 0x2b1   :  { %2330 = vadd.xlane.f32.xlu1 %v2329_v42  ;;  %v2285_v42 = vpop.permute.xlu1 %2284 }
 0x2b4   :  { %2336 = vadd.xlane.f32.xlu0 %v2335_v26  ;;  %v2287_v19 = vpop.permute.xlu0 %2286 }
 0x2b5   :  { %2339 = vadd.xlane.f32.xlu1 %v2338_v46  ;;  %v2353_v46 = vsel %vm87_vm0, %v6750_v15, 0.0  ;;  %v2368_v15 = vsel %vm87_vm0, %v2259_v25, 0.0  ;;  %v2380_v25 = vsel %vm87_vm0, %v2267_v27, 0.0 }
 0x2b8   :  { %2342 = vadd.xlane.f32.xlu0 %v2341_v35  ;;  %v2289_v35 = vpop.permute.xlu1 %2288 }
 0x2b9   :  { %2345 = vadd.xlane.f32.xlu1 %v2344_v4 }
 0x2bc   :  { %2348 = vadd.xlane.f32.xlu0 %v2347_v62 }
 0x2bd   :  { %2351 = vadd.xlane.f32.xlu1 %v2350_v13 }
 0x2c0   :  { %2354 = vadd.xlane.f32.xlu0 %v2353_v46 }
 0x2c1   :  { %2357 = vadd.xlane.f32.xlu1 %v2356_v54 }
 0x2c4   :  { %v6815_v26 = vpop.xlane.xlu0 %1035  ;;  %2360 = vadd.xlane.f32.xlu0 %v2359_v12  ;;  %v2383_v12 = vsel %vm87_vm0, %v2269_v0, 0.0  ;;  %v2398_v0 = vsel %vm87_vm0, %v2279_v45, 0.0  ;;  %v2413_v45 = vsel %vm87_vm0, %v2289_v35, 0.0 }
 0x2c5   :  { %2363 = vadd.xlane.f32.xlu1 %v2362_v58 }
 0x2c8   :  { %v6820_v4 = vpop.xlane.xlu0 %1038  ;;  %2366 = vadd.xlane.f32.xlu0 %v2365_v57  ;;  %v2389_v57 = vsel %vm87_vm0, %v2273_v24, 0.0  ;;  %v2404_v24 = vsel %vm87_vm0, %v2283_v44, 0.0 }
 0x2c9   :  { %2369 = vadd.xlane.f32.xlu1 %v2368_v15  ;;  %v6823_v21 = vpop.xlane.xlu1 %1041 }
 0x2ca   :  { %v6877_v33 = vadd.f32 %v6271_v34, %v6823_v21 }
 0x2cc   :  { %v6827_v62 = vpop.xlane.xlu0 %1044  ;;  %2372 = vadd.xlane.f32.xlu0 %v2371_v49  ;;  %v2395_v49 = vsel %vm87_vm0, %v2277_v5, 0.0  ;;  %v2410_v5 = vsel %vm87_vm0, %v2287_v19, 0.0  ;;  %9060 = vst [vmem:[#allocation90_spill] sm:$0xff] %v6877_v33 }
 0x2cd   :  { %2375 = vadd.xlane.f32.xlu1 %v2374_v55  ;;  %v1048_v13 = vpop.xlane.xlu1 %1047 }
 0x2ce   :  { %v6881_v16 = vadd.f32 %v6273_v36, %v1048_v13 }
 0x2d0   :  { %v6831_v46 = vpop.xlane.xlu0 %1050  ;;  %2378 = vadd.xlane.f32.xlu0 %v2377_v51  ;;  %v2401_v51 = vsel %vm87_vm0, %v2281_v37, 0.0  ;;  %9061 = vst [vmem:[#allocation91_spill] sm:$0xff] %v6881_v16 }
 0x2d1   :  { %2381 = vadd.xlane.f32.xlu1 %v2380_v25  ;;  %v1054_v54 = vpop.xlane.xlu1 %1053 }
 0x2d2   :  { %v6885_v2 = vadd.f32 %v6277_v38, %v1054_v54  ;;  %v9068_v54 = vld [vmem:[#allocation34_spill] sm:$0xff] }
 0x2d4   :  { %v6835_v58 = vpop.xlane.xlu0 %1056  ;;  %2384 = vadd.xlane.f32.xlu0 %v2383_v12  ;;  %v2407_v12 = vsel %vm87_vm0, %v2285_v42, 0.0  ;;  %9062 = vst [vmem:[#allocation92_spill] sm:$0xff] %v6885_v2 }
 0x2d5   :  { %2387 = vadd.xlane.f32.xlu1 %v2386_v20  ;;  %v1060_v11 = vpop.xlane.xlu1 %1059 }
 0x2d8   :  { %v6839_v15 = vpop.xlane.xlu0 %1062  ;;  %2390 = vadd.xlane.f32.xlu0 %v2389_v57 }
 0x2d9   :  { %2393 = vadd.xlane.f32.xlu1 %v2392_v7  ;;  %v1066_v27 = vpop.xlane.xlu1 %1065 }
 0x2dc   :  { %v6843_v55 = vpop.xlane.xlu0 %1068  ;;  %2396 = vadd.xlane.f32.xlu0 %v2395_v49 }
 0x2dd   :  { %2399 = vadd.xlane.f32.xlu1 %v2398_v0  ;;  %v1072_v61 = vpop.xlane.xlu1 %1071 }
 0x2de   :  { %v6911_v21 = vadd.f32 %v6287_v43, %v1072_v61 }
 0x2e0   :  { %v6847_v25 = vpop.xlane.xlu0 %1074  ;;  %2402 = vadd.xlane.f32.xlu0 %v2401_v51  ;;  %9066 = vst [vmem:[#allocation96_spill] sm:$0xff] %v6911_v21 }
 0x2e1   :  { %2405 = vadd.xlane.f32.xlu1 %v2404_v24  ;;  %v1078_v60 = vpop.xlane.xlu1 %1077 }
 0x2e2   :  { %v6920_v13 = vadd.f32 %v6291_v47, %v1078_v60 }
 0x2e4   :  { %v1081_v20 = vpop.xlane.xlu0 %1080  ;;  %2408 = vadd.xlane.f32.xlu0 %v2407_v12  ;;  %9067 = vst [vmem:[#allocation97_spill] sm:$0xff] %v6920_v13 }
 0x2e5   :  { %2411 = vadd.xlane.f32.xlu1 %v2410_v5  ;;  %v1084_v57 = vpop.xlane.xlu1 %1083 }
 0x2e8   :  { %v1087_v7 = vpop.xlane.xlu0 %1086  ;;  %2414 = vadd.xlane.f32.xlu0 %v2413_v45 }
 0x2e9   :  { %v1090_v37 = vpop.xlane.xlu1 %1089 }
 0x2ec   :  { %v6853_v49 = vpop.xlane.xlu0 %1092 }
 0x2ed   :  { %v1096_v0 = vpop.xlane.xlu1 %1095 }
 0x2f0   :  { %v6855_v51 = vpop.xlane.xlu0 %1098 }
 0x2f1   :  { %v1102_v44 = vpop.xlane.xlu1 %1101 }
 0x2f4   :  { %v6857_v24 = vpop.xlane.xlu0 %1104 }
 0x2f5   :  { %v6859_v42 = vpop.xlane.xlu1 %1107 }
 0x2f8   :  { %v6861_v12 = vpop.xlane.xlu0 %1110 }
 0x2f9   :  { %v6863_v19 = vpop.xlane.xlu1 %1113 }
 0x2fc   :  { %v6865_v5 = vpop.xlane.xlu0 %1116 }
 0x2fd   :  { %v6867_v35 = vpop.xlane.xlu1 %1119 }
 0x300   :  { %v6869_v45 = vpop.xlane.xlu0 %1122 }
 0x301   :  { %v6871_v63 = vpop.xlane.xlu1 %1125 }
 0x304   :  { %v2291_v50 = vpop.permute.xlu0 %2290 }
 0x305   :  { %v1033_v39 = vpop.xlane.xlu1 %1032  ;;  %v2416_v52 = vsel %vm87_vm0, %v2291_v50, 0.0  ;;  %v6902_v50 = vadd.f32 %v6283_v41, %v1066_v27  ;;  %v9070_v27 = vld [vmem:[#allocation35_spill] sm:$0xff] }
 0x306   :  { %2417 = vadd.xlane.f32.xlu1 %v2416_v52  ;;  %v6889_v52 = vadd.f32 %v6440_v59, %v6815_v26  ;;  %v6907_v26 = vadd.f32 %v6530_v14, %v6831_v46  ;;  %v6925_v46 = vadd.f32 %v6580_v9, %v6839_v15  ;;  %v6938_v61 = vadd.f32 %v9070_v27, %v1090_v37  ;;  %v9074_v37 = vld [vmem:[#allocation37_spill] sm:$0xff] }
 0x307   :  { %9065 = vst [vmem:[#allocation95_spill] sm:$0xff] %v6902_v50  ;;  %v6943_v15 = vadd.f32 %v6623_v29, %v6847_v25 }
 0x308   :  { %9063 = vst [vmem:[#allocation93_spill] sm:$0xff] %v6889_v52  ;;  %9071 = vst [vmem:[#allocation99_spill] sm:$0xff] %v6938_v61 }
 0x309   :  { %v2293_v6 = vpop.permute.xlu1 %2292 }
 0x30a   :  { %v2419_v3 = vsel %vm87_vm0, %v2293_v6, 0.0  ;;  %v6898_v6 = vadd.f32 %v6501_v1, %v6827_v62  ;;  %v6916_v62 = vadd.f32 %v6556_v10, %v6835_v58  ;;  %v6934_v58 = vadd.f32 %v6601_v18, %v6843_v55 }
 0x30b   :  { %2420 = vadd.xlane.f32.xlu0 %v2419_v3  ;;  %v6893_v3 = vadd.f32 %v6281_v40, %v1060_v11  ;;  %v6929_v11 = vadd.f32 %v9068_v54, %v1084_v57  ;;  %v9072_v57 = vld [vmem:[#allocation36_spill] sm:$0xff]  ;;  %v6951_v55 = vadd.f32 %v6638_v56, %v1081_v20  ;;  %v6968_v20 = vadd.f32 %v6672_v31, %v6853_v49 }
 0x30d   :  { %9064 = vst [vmem:[#allocation94_spill] sm:$0xff] %v6893_v3  ;;  %9069 = vst [vmem:[#allocation98_spill] sm:$0xff] %v6929_v11 }
 0x317   :  { %1411 = vperm.xlu1 %5616, %v6877_v33  }
 0x31b   :  { %1417 = vperm.xlu1 %5616, %v6881_v16   ;;  %v9079_v16 = vld [vmem:[#allocation41_spill] sm:$0xff] }
 0x31f   :  { %1423 = vperm.xlu1 %5616, %v6885_v2  }
 0x321   :  { %1405 = vperm.xlu0 %5617, %v6889_v52  }
 0x323   :  { %1429 = vperm.xlu1 %5616, %v6893_v3   ;;  %v6973_v3 = vadd.f32 %v6465_v53, %v6820_v4  ;;  %v6988_v4 = vadd.f32 %v6698_v22, %v6857_v24  ;;  %v7003_v24 = vadd.f32 %v6716_v32, %v6867_v35  ;;  %v7018_v35 = vadd.f32 %v6726_v48, %v6869_v45 }
 0x325   :  { %1414 = vperm.xlu0 %5617, %v6898_v6   ;;  %9082 = vst [vmem:[#allocation105_spill] sm:$0xff] %v7003_v24  ;;  %9085 = vst [vmem:[#allocation108_spill] sm:$0xff] %v7018_v35 }
 0x327   :  { %1435 = vperm.xlu1 %5616, %v6902_v50  }
 0x329   :  { %1420 = vperm.xlu0 %5617, %v6907_v26  }
 0x32b   :  { %1441 = vperm.xlu1 %5616, %v6911_v21  }
 0x32d   :  { %1426 = vperm.xlu0 %5617, %v6916_v62  }
 0x32f   :  { %1447 = vperm.xlu1 %5616, %v6920_v13   ;;  %v6947_v13 = vadd.f32 %v9072_v57, %v1096_v0  ;;  %v9076_v0 = vld [vmem:[#allocation26_spill] sm:$0xff] }
 0x330   :  { %v6963_v50 = vadd.f32 %v9076_v0, %v1033_v39  ;;  %v6978_v39 = vadd.f32 %v6686_v28, %v6855_v51  ;;  %v6993_v51 = vadd.f32 %v9079_v16, %v6863_v19  ;;  %v7008_v19 = vadd.f32 %v6714_v30, %v6865_v5 }
 0x331   :  { %1432 = vperm.xlu0 %5617, %v6925_v46   ;;  %9073 = vst [vmem:[#allocation100_spill] sm:$0xff] %v6947_v13 }
 0x332   :  { %9080 = vst [vmem:[#allocation103_spill] sm:$0xff] %v6993_v51  ;;  %9083 = vst [vmem:[#allocation106_spill] sm:$0xff] %v7008_v19 }
 0x333   :  { %1453 = vperm.xlu1 %5616, %v6929_v11   ;;  %v6955_v11 = vadd.f32 %v9074_v37, %v1102_v44 }
 0x335   :  { %1438 = vperm.xlu0 %5617, %v6934_v58   ;;  %v2328_v60 = vpop.xlane.xlu0 %2327  ;;  %9075 = vst [vmem:[#allocation101_spill] sm:$0xff] %v6955_v11 }
 0x337   :  { %1459 = vperm.xlu1 %5616, %v6938_v61   ;;  %v6959_v61 = vadd.f32 %v6657_v8, %v1087_v7  ;;  %v9077_v7 = vld [vmem:[#allocation38_spill] sm:$0xff] }
 0x338   :  { %v6983_v49 = vadd.f32 %v9077_v7, %v6859_v42  ;;  %v6998_v42 = vadd.f32 %v6708_v17, %v6861_v12  ;;  %v7013_v12 = vadd.f32 %v6728_v23, %v6871_v63 }
 0x339   :  { %1444 = vperm.xlu0 %5617, %v6943_v15   ;;  %v2334_v25 = vpop.xlane.xlu0 %2333 }
 0x33a   :  { %v2331_v21 = vpop.xlane.xlu1 %2330  ;;  %9078 = vst [vmem:[#allocation102_spill] sm:$0xff] %v6983_v49  ;;  %9081 = vst [vmem:[#allocation104_spill] sm:$0xff] %v6998_v42 }
 0x33b   :  { %1465 = vperm.xlu1 %5616, %v6947_v13   ;;  %9084 = vst [vmem:[#allocation107_spill] sm:$0xff] %v7013_v12  ;;  %v7026_v5 = vadd.f32 %v2331_v21, %v6440_v59 }
 0x33d   :  { %1450 = vperm.xlu0 %5617, %v6951_v55   ;;  %v2337_v13 = vpop.xlane.xlu0 %2336  ;;  %9087 = vst [vmem:[#allocation110_spill] sm:$0xff] %v7026_v5 }
 0x33e   :  { %v2340_v44 = vpop.xlane.xlu1 %2339 }
 0x33f   :  { %1471 = vperm.xlu1 %5616, %v6955_v11   ;;  %v7034_v45 = vadd.f32 %v2340_v44, %v6501_v1 }
 0x341   :  { %1456 = vperm.xlu0 %5617, %v6959_v61   ;;  %v2343_v2 = vpop.xlane.xlu0 %2342  ;;  %9089 = vst [vmem:[#allocation112_spill] sm:$0xff] %v7034_v45 }
 0x342   :  { %v2346_v11 = vpop.xlane.xlu1 %2345 }
 0x343   :  { %1402 = vperm.xlu1 %5616, %v6963_v50   ;;  %v7042_v59 = vadd.f32 %v2346_v11, %v6530_v14 }
 0x345   :  { %1462 = vperm.xlu0 %5617, %v6968_v20   ;;  %v2349_v52 = vpop.xlane.xlu0 %2348  ;;  %9091 = vst [vmem:[#allocation114_spill] sm:$0xff] %v7042_v59 }
 0x346   :  { %v2352_v33 = vpop.xlane.xlu1 %2351 }
 0x347   :  { %1408 = vperm.xlu1 %5616, %v6973_v3   ;;  %v7050_v44 = vadd.f32 %v2352_v33, %v6556_v10 }
 0x349   :  { %1468 = vperm.xlu0 %5617, %v6978_v39   ;;  %9093 = vst [vmem:[#allocation116_spill] sm:$0xff] %v7050_v44 }
 0x34b   :  { %1477 = vperm.xlu1 %5616, %v6983_v49   ;;  %v2358_v49 = vpop.xlane.xlu1 %2357 }
 0x34c   :  { %v7058_v11 = vadd.f32 %v2358_v49, %v6580_v9 }
 0x34d   :  { %1474 = vperm.xlu0 %5617, %v6988_v4  }
 0x34e   :  { %9095 = vst [vmem:[#allocation118_spill] sm:$0xff] %v7058_v11 }
 0x34f   :  { %1483 = vperm.xlu1 %5616, %v6993_v51   ;;  %v2355_v51 = vpop.xlane.xlu0 %2354  ;;  %v2364_v63 = vpop.xlane.xlu1 %2363 }
 0x350   :  { %v7068_v10 = vadd.f32 %v2364_v63, %v6601_v18 }
 0x351   :  { %1480 = vperm.xlu0 %5617, %v6998_v42   ;;  %v7022_v42 = vadd.f32 %v2328_v60, %v9076_v0  ;;  %v7038_v60 = vadd.f32 %v2337_v13, %v6271_v34  ;;  %v7054_v34 = vadd.f32 %v2349_v52, %v6277_v38 }
 0x352   :  { %9097 = vst [vmem:[#allocation120_spill] sm:$0xff] %v7068_v10 }
 0x353   :  { %1489 = vperm.xlu1 %5616, %v7003_v24   ;;  %9086 = vst [vmem:[#allocation109_spill] sm:$0xff] %v7022_v42  ;;  %v2361_v24 = vpop.xlane.xlu0 %2360  ;;  %9090 = vst [vmem:[#allocation113_spill] sm:$0xff] %v7038_v60  ;;  %v2370_v0 = vpop.xlane.xlu1 %2369 }
 0x354   :  { %9094 = vst [vmem:[#allocation117_spill] sm:$0xff] %v7054_v34  ;;  %v7072_v52 = vadd.f32 %v2361_v24, %v6283_v41  ;;  %v7076_v49 = vadd.f32 %v2370_v0, %v6623_v29 }
 0x355   :  { %1486 = vperm.xlu0 %5617, %v7008_v19   ;;  %v7030_v19 = vadd.f32 %v2334_v25, %v6465_v53  ;;  %v7046_v25 = vadd.f32 %v2343_v2, %v6273_v36  ;;  %v7062_v2 = vadd.f32 %v2355_v51, %v6281_v40 }
 0x356   :  { %9098 = vst [vmem:[#allocation121_spill] sm:$0xff] %v7072_v52  ;;  %9099 = vst [vmem:[#allocation122_spill] sm:$0xff] %v7076_v49 }
 0x357   :  { %1495 = vperm.xlu1 %5616, %v7013_v12   ;;  %9088 = vst [vmem:[#allocation111_spill] sm:$0xff] %v7030_v19  ;;  %v2367_v21 = vpop.xlane.xlu0 %2366  ;;  %9092 = vst [vmem:[#allocation115_spill] sm:$0xff] %v7046_v25  ;;  %v2376_v1 = vpop.xlane.xlu1 %2375 }
 0x358   :  { %9096 = vst [vmem:[#allocation119_spill] sm:$0xff] %v7062_v2  ;;  %v7082_v9 = vadd.f32 %v2367_v21, %v6287_v43  ;;  %v7086_v63 = vadd.f32 %v2376_v1, %v6638_v56 }
 0x359   :  { %1492 = vperm.xlu0 %5617, %v7018_v35  }
 0x35a   :  { %9100 = vst [vmem:[#allocation123_spill] sm:$0xff] %v7082_v9  ;;  %9101 = vst [vmem:[#allocation124_spill] sm:$0xff] %v7086_v63 }
 0x35b   :  { %2487 = vperm.xlu1 %5616, %v7022_v42   ;;  %v2373_v13 = vpop.xlane.xlu0 %2372  ;;  %v7064_v14 = vpop.xlane.xlu1 %2381 }
 0x35c   :  { %v7090_v24 = vadd.f32 %v2373_v13, %v6291_v47 }
 0x35d   :  { %2490 = vperm.xlu0 %5617, %v7026_v5  }
 0x35e   :  { %9102 = vst [vmem:[#allocation125_spill] sm:$0xff] %v7090_v24 }
 0x35f   :  { %2493 = vperm.xlu1 %5616, %v7030_v19   ;;  %v2379_v33 = vpop.xlane.xlu0 %2378  ;;  %v7078_v51 = vpop.xlane.xlu1 %2387 }
 0x360   :  { %v7097_v21 = vadd.f32 %v2379_v33, %v9068_v54 }
 0x361   :  { %2499 = vperm.xlu0 %5617, %v7034_v45  }
 0x362   :  { %9103 = vst [vmem:[#allocation126_spill] sm:$0xff] %v7097_v21 }
 0x363   :  { %2496 = vperm.xlu1 %5616, %v7038_v60   ;;  %v2385_v40 = vpop.xlane.xlu0 %2384  ;;  %v7092_v0 = vpop.xlane.xlu1 %2393 }
 0x364   :  { %v7103_v56 = vadd.f32 %v2385_v40, %v9070_v27 }
 0x365   :  { %2505 = vperm.xlu0 %5617, %v7042_v59  }
 0x366   :  { %9104 = vst [vmem:[#allocation127_spill] sm:$0xff] %v7103_v56 }
 0x367   :  { %2502 = vperm.xlu1 %5616, %v7046_v25   ;;  %v2391_v41 = vpop.xlane.xlu0 %2390  ;;  %v7099_v43 = vpop.xlane.xlu1 %2399 }
 0x368   :  { %v7107_v13 = vadd.f32 %v2391_v41, %v9072_v57 }
 0x369   :  { %2511 = vperm.xlu0 %5617, %v7050_v44  }
 0x36a   :  { %9105 = vst [vmem:[#allocation128_spill] sm:$0xff] %v7107_v13 }
 0x36b   :  { %2508 = vperm.xlu1 %5616, %v7054_v34   ;;  %v2397_v1 = vpop.xlane.xlu0 %2396  ;;  %v7109_v47 = vpop.xlane.xlu1 %2405  ;;  %v9112_v34 = vld [vmem:[#allocation15_spill] sm:$0xff] }
 0x36c   :  { %v7113_v33 = vadd.f32 %v2397_v1, %v9074_v37 }
 0x36d   :  { %2517 = vperm.xlu0 %5617, %v7058_v11  }
 0x36e   :  { %9106 = vst [vmem:[#allocation129_spill] sm:$0xff] %v7113_v33 }
 0x36f   :  { %2514 = vperm.xlu1 %5616, %v7062_v2   ;;  %v2403_v29 = vpop.xlane.xlu0 %2402  ;;  %v7115_v54 = vpop.xlane.xlu1 %2411 }
 0x370   :  { %v7119_v40 = vadd.f32 %v2403_v29, %v9077_v7 }
 0x371   :  { %2523 = vperm.xlu0 %5617, %v7068_v10  }
 0x372   :  { %9107 = vst [vmem:[#allocation130_spill] sm:$0xff] %v7119_v40 }
 0x373   :  { %2520 = vperm.xlu1 %5616, %v7072_v52   ;;  %v2409_v18 = vpop.xlane.xlu0 %2408 }
 0x374   :  { %v7125_v57 = vadd.f32 %v2409_v18, %v9079_v16 }
 0x375   :  { %2529 = vperm.xlu0 %5617, %v7076_v49  }
 0x376   :  { %9108 = vst [vmem:[#allocation131_spill] sm:$0xff] %v7125_v57 }
 0x377   :  { %2526 = vperm.xlu1 %5616, %v7082_v9   ;;  %v2415_v27 = vpop.xlane.xlu0 %2414 }
 0x378   :  { %v7129_v37 = vadd.f32 %v2415_v27, %v6716_v32 }
 0x379   :  { %2535 = vperm.xlu0 %5617, %v7086_v63  }
 0x37a   :  { %9109 = vst [vmem:[#allocation132_spill] sm:$0xff] %v7129_v37 }
 0x37b   :  { %2532 = vperm.xlu1 %5616, %v7090_v24  }
 0x37f   :  { %2538 = vperm.xlu1 %5616, %v7097_v21  }
 0x383   :  { %2544 = vperm.xlu1 %5616, %v7103_v56  }
 0x387   :  { %2550 = vperm.xlu1 %5616, %v7107_v13  }
 0x38b   :  { %2556 = vperm.xlu1 %5616, %v7113_v33  }
 0x38f   :  { %2562 = vperm.xlu1 %5616, %v7119_v40   ;;  %v7122_v41 = vpop.xlane.xlu1 %2417 }
 0x393   :  { %2568 = vperm.xlu1 %5616, %v7125_v57   ;;  %v1412_v1 = vpop.permute.xlu1 %1411 }
 0x394   :  { %v2421_v38 = vpop.xlane.xlu0 %2420 }
 0x395   :  { %v7133_v29 = vadd.f32 %v2421_v38, %v6728_v23 }
 0x397   :  { %2574 = vperm.xlu1 %5616, %v7129_v37   ;;  %v1418_v36 = vpop.permute.xlu1 %1417  ;;  %9110 = vst [vmem:[#allocation133_spill] sm:$0xff] %v7133_v29 }
 0x39b   :  { %2580 = vperm.xlu1 %5616, %v7133_v29   ;;  %v1424_v7 = vpop.permute.xlu1 %1423  ;;  %v9111_v29 = vlaneseq }
 0x39c   :  { %v1406_v53 = vpop.permute.xlu0 %1405 }
 0x39d   :  { %v1498_v63 = vand.u32 127, %v9111_v29 }
 0x39f   :  { %v1430_v18 = vpop.permute.xlu1 %1429  ;;  %v1503_v52 = vadd.s32 4294967288, %v1498_v63  ;;  %v7152_v25 = vsub.s32 %v1498_v63, %v9112_v34 }
 0x3a0   :  { %v1415_v16 = vpop.permute.xlu0 %1414 }
 0x3a1   :  { %v7155_v5 = vsub.s32 %v1503_v52, %v9112_v34  ;;  %v1522_v29 = vrot.slane %v1415_v16, %v7152_v25 }
 0x3a3   :  { %v1436_v40 = vpop.permute.xlu1 %1435  ;;  %v1517_v11 = vrot.slane %v1412_v1, %v7155_v5  ;;  %v1507_v63 = vrot.slane %v1406_v53, %v7155_v5  ;;  %v1526_v59 = vrot.slane %v1418_v36, %v7155_v5  ;;  %v1535_v16 = vrot.slane %v1424_v7, %v7155_v5 }
 0x3a4   :  { %v1421_v33 = vpop.permute.xlu0 %1420  ;;  %v1544_v53 = vrot.slane %v1430_v18, %v7155_v5 }
 0x3a5   :  { %v1531_v44 = vrot.slane %v1421_v33, %v7152_v25  ;;  %v1527_v33 = vsel %vm1508_vm3, %v1526_v59, %v1522_v29 }
 0x3a7   :  { %v1442_v57 = vpop.permute.xlu1 %1441  ;;  %v1536_v35 = vsel %vm1508_vm3, %v1535_v16, %v1531_v44 }
 0x3a8   :  { %v1427_v13 = vpop.permute.xlu0 %1426 }
 0x3a9   :  { %v1540_v45 = vrot.slane %v1427_v13, %v7152_v25  ;;  %v1553_v13 = vrot.slane %v1436_v40, %v7155_v5 }
 0x3ab   :  { %v7136_v56 = vpop.permute.xlu1 %1447  ;;  %v1545_v18 = vsel %vm1508_vm3, %v1544_v53, %v1540_v45 }
 0x3ac   :  { %v1433_v27 = vpop.permute.xlu0 %1432 }
 0x3af   :  { %v7138_v32 = vpop.permute.xlu1 %1453 }
 0x3b0   :  { %v1439_v37 = vpop.permute.xlu0 %1438 }
 0x3b3   :  { %v7140_v21 = vpop.permute.xlu1 %1459 }
 0x3b4   :  { %v1445_v38 = vpop.permute.xlu0 %1444  ;;  %v1589_v16 = vrot.slane %v7140_v21, %v7155_v5 }
 0x3b5   :  { %v1567_v7 = vrot.slane %v1445_v38, %v7152_v25 }
 0x3b7   :  { %v7142_v23 = vpop.permute.xlu1 %1465 }
 0x3b8   :  { %v7145_v24 = vpop.permute.xlu0 %1450 }
 0x3bb   :  { %v7147_v9 = vpop.permute.xlu1 %1471 }
 0x3bc   :  { %v7149_v2 = vpop.permute.xlu0 %1456 }
 0x3bd   :  { %v1585_v38 = vrot.slane %v7149_v2, %v7152_v25  ;;  %v1576_v2 = vrot.slane %v7145_v24, %v7152_v25 }
 0x3bf   :  { %v1403_v60 = vpop.permute.xlu1 %1402  ;;  %v1590_v21 = vsel %vm1508_vm3, %v1589_v16, %v1585_v38 }
 0x3c0   :  { %v7157_v12 = vpop.permute.xlu0 %1462  ;;  %v1502_v49 = vrot.slane %v1403_v60, %v7152_v25  ;;  %v1549_v60 = vrot.slane %v1433_v27, %v7152_v25 }
 0x3c2   :  { %v1509_v19 = vsel %vm1508_vm3, %v1507_v63, %v1502_v49 }
 0x3c3   :  { %v1409_v10 = vpop.permute.xlu1 %1408 }
 0x3c4   :  { %v1513_v34 = vrot.slane %v1409_v10, %v7152_v25  ;;  %v1469_v52 = vpop.permute.xlu0 %1468  ;;  %v1558_v10 = vrot.slane %v1439_v37, %v7152_v25  ;;  %v1571_v37 = vrot.slane %v7136_v56, %v7155_v5  ;;  %v1594_v56 = vrot.slane %v7157_v12, %v7152_v25 }
 0x3c6   :  { %v1518_v1 = vsel %vm1508_vm3, %v1517_v11, %v1513_v34  ;;  %v1562_v11 = vrot.slane %v1442_v57, %v7155_v5  ;;  %v1572_v63 = vsel %vm1508_vm3, %v1571_v37, %v1567_v7 }
 0x3c7   :  { %v1646_v36 = vsel %vm1645_vm4, %v1518_v1, %v1509_v19  ;;  %v1478_v42 = vpop.permute.xlu1 %1477  ;;  %v1554_v19 = vsel %vm1508_vm3, %v1553_v13, %v1549_v60  ;;  %v1603_v60 = vrot.slane %v1469_v52, %v7152_v25 }
 0x3c8   :  { %v1648_v27 = vsel %vm1647_vm5, %v1527_v33, %v1646_v36  ;;  %v1475_v49 = vpop.permute.xlu0 %1474  ;;  %v1563_v44 = vsel %vm1508_vm3, %v1562_v11, %v1558_v10  ;;  %v1616_v12 = vrot.slane %v1478_v42, %v7155_v5  ;;  %v1607_v10 = vrot.slane %v7147_v9, %v7155_v5 }
 0x3c9   :  { %v1650_v59 = vsel %vm1649_vm6, %v1536_v35, %v1648_v27  ;;  %v1580_v35 = vrot.slane %v7138_v32, %v7155_v5  ;;  %v1598_v32 = vrot.slane %v7142_v23, %v7155_v5  ;;  %v1612_v53 = vrot.slane %v1475_v49, %v7152_v25 }
 0x3ca   :  { %v1652_v40 = vsel %vm1651_vm7, %v1545_v18, %v1650_v59  ;;  %v1608_v27 = vsel %vm1508_vm3, %v1607_v10, %v1603_v60 }
 0x3cb   :  { %v1484_v29 = vpop.permute.xlu1 %1483  ;;  %v1654_v57 = vsel %vm1653_vm8, %v1554_v19, %v1652_v40  ;;  %v1599_v13 = vsel %vm1508_vm3, %v1598_v32, %v1594_v56  ;;  %v1581_v7 = vsel %vm1508_vm3, %v1580_v35, %v1576_v2  ;;  %v1617_v11 = vsel %vm1508_vm3, %v1616_v12, %v1612_v53 }
 0x3cc   :  { %v1481_v45 = vpop.permute.xlu0 %1480  ;;  %v1656_v34 = vsel %vm1655_vm9, %v1563_v44, %v1654_v57  ;;  %v1625_v24 = vrot.slane %v1484_v29, %v7155_v5  ;;  %v1659_v9 = vsel %vm1645_vm4, %v1590_v21, %v1581_v7 }
 0x3cd   :  { %v1658_v1 = vsel %vm1657_vm10, %v1572_v63, %v1656_v34  ;;  %v1621_v52 = vrot.slane %v1481_v45, %v7152_v25  ;;  %v1660_v18 = vsel %vm1647_vm5, %v1599_v13, %v1659_v9 }
 0x3ce   :  { %v1669_v33 = vsel %vm1668_vm11, %v1658_v1, -inf  ;;  %v1661_v19 = vsel %vm1649_vm6, %v1608_v27, %v1660_v18 }
 0x3cf   :  { %1670 = vmax.xlane.f32.xlu0 %v1669_v33  ;;  %v1490_v36 = vpop.permute.xlu1 %1489  ;;  %v1626_v59 = vsel %vm1508_vm3, %v1625_v24, %v1621_v52  ;;  %v1662_v29 = vsel %vm1651_vm7, %v1617_v11, %v1661_v19 }
 0x3d0   :  { %v1634_v23 = vrot.slane %v1490_v36, %v7155_v5  ;;  %v1487_v42 = vpop.permute.xlu0 %1486  ;;  %v1663_v35 = vsel %vm1653_vm8, %v1626_v59, %v1662_v29 }
 0x3d1   :  { %v1630_v49 = vrot.slane %v1487_v42, %v7152_v25 }
 0x3d3   :  { %v1496_v37 = vpop.permute.xlu1 %1495  ;;  %v1635_v40 = vsel %vm1508_vm3, %v1634_v23, %v1630_v49 }
 0x3d4   :  { %v1643_v44 = vrot.slane %v1496_v37, %v7155_v5  ;;  %v1493_v38 = vpop.permute.xlu0 %1492  ;;  %v1664_v63 = vsel %vm1655_vm9, %v1635_v40, %v1663_v35 }
 0x3d5   :  { %v1639_v57 = vrot.slane %v1493_v38, %v7152_v25 }
 0x3d7   :  { %v2488_v56 = vpop.permute.xlu1 %2487  ;;  %v1644_v45 = vsel %vm1508_vm3, %v1643_v44, %v1639_v57 }
 0x3d8   :  { %v2491_v34 = vpop.permute.xlu0 %2490  ;;  %v1665_v16 = vsel %vm1657_vm10, %v1644_v45, %v1664_v63  ;;  %v2585_v42 = vrot.slane %v2488_v56, %v7152_v25 }
 0x3d9   :  { %v1672_v2 = vsel %vm1668_vm11, %v1665_v16, -inf  ;;  %v2589_v7 = vrot.slane %v2491_v34, %v7155_v5 }
 0x3da   :  { %1673 = vmax.xlane.f32.xlu1 %v1672_v2 }
 0x3db   :  { %v2494_v60 = vpop.permute.xlu1 %2493  ;;  %v2590_v38 = vsel %vm1508_vm3, %v2589_v7, %v2585_v42  ;;  %v7275_v42 = vadd.f32 %v7092_v0, %v6686_v28  ;;  %v7280_v7 = vadd.f32 %v7099_v43, %v6698_v22  ;;  %v7295_v0 = vadd.f32 %v7122_v41, %v6726_v48 }
 0x3dc   :  { %v2500_v1 = vpop.permute.xlu0 %2499  ;;  %v2594_v27 = vrot.slane %v2494_v60, %v7152_v25 }
 0x3dd   :  { %v2603_v9 = vrot.slane %v2500_v1, %v7152_v25  ;;  %9113 = vst [vmem:[#allocation15_spill] sm:$0xff] %v7295_v0 }
 0x3df   :  { %v2497_v32 = vpop.permute.xlu1 %2496 }
 0x3e0   :  { %v2506_v12 = vpop.permute.xlu0 %2505  ;;  %v2598_v52 = vrot.slane %v2497_v32, %v7155_v5 }
 0x3e1   :  { %v2612_v59 = vrot.slane %v2506_v12, %v7152_v25 }
 0x3e2   :  { %v2599_v18 = vsel %vm1508_vm3, %v2598_v52, %v2594_v27 }
 0x3e3   :  { %v2503_v53 = vpop.permute.xlu1 %2502  ;;  %v2726_v56 = vsel %vm1645_vm4, %v2599_v18, %v2590_v38 }
 0x3e4   :  { %v2512_v33 = vpop.permute.xlu0 %2511  ;;  %v2607_v36 = vrot.slane %v2503_v53, %v7155_v5 }
 0x3e5   :  { %v2621_v40 = vrot.slane %v2512_v33, %v7152_v25 }
 0x3e6   :  { %v2608_v19 = vsel %vm1508_vm3, %v2607_v36, %v2603_v9 }
 0x3e7   :  { %v2509_v10 = vpop.permute.xlu1 %2508  ;;  %v2727_v16 = vsel %vm1647_vm5, %v2608_v19, %v2726_v56 }
 0x3e8   :  { %v2518_v21 = vpop.permute.xlu0 %2517  ;;  %v2616_v49 = vrot.slane %v2509_v10, %v7155_v5 }
 0x3e9   :  { %v2630_v57 = vrot.slane %v2518_v21, %v7152_v25 }
 0x3ea   :  { %v2617_v29 = vsel %vm1508_vm3, %v2616_v49, %v2612_v59  ;;  %v9115_v59 = vld [vmem:[#allocation17_spill] sm:$0xff] }
 0x3eb   :  { %v2515_v24 = vpop.permute.xlu1 %2514  ;;  %v2728_v60 = vsel %vm1649_vm6, %v2617_v29, %v2727_v16 }
 0x3ec   :  { %v2524_v13 = vpop.permute.xlu0 %2523  ;;  %v2625_v11 = vrot.slane %v2515_v24, %v7155_v5 }
 0x3ed   :  { %v2639_v63 = vrot.slane %v2524_v13, %v7152_v25  ;;  %v7265_v13 = vadd.f32 %v7064_v14, %v6657_v8  ;;  %v7285_v14 = vadd.f32 %v7109_v47, %v6708_v17 }
 0x3ee   :  { %v2626_v45 = vsel %vm1508_vm3, %v2625_v11, %v2621_v40  ;;  %v9114_v11 = vld [vmem:[#allocation16_spill] sm:$0xff]  ;;  %v9116_v40 = vld [vmem:[#allocation18_spill] sm:$0xff] }
 0x3ef   :  { %v2521_v23 = vpop.permute.xlu1 %2520  ;;  %v2729_v12 = vsel %vm1651_vm7, %v2626_v45, %v2728_v60  ;;  %v9119_v60 = vld [vmem:[#allocation21_spill] sm:$0xff] }
 0x3f0   :  { %v2634_v37 = vrot.slane %v2521_v23, %v7155_v5  ;;  %v2530_v34 = vpop.permute.xlu0 %2529  ;;  %v7270_v23 = vadd.f32 %v7078_v51, %v6672_v31  ;;  %v7290_v51 = vadd.f32 %v7115_v54, %v6714_v30 }
 0x3f1   :  { %v2648_v53 = vrot.slane %v2530_v34, %v7152_v25 }
 0x3f2   :  { %v2635_v2 = vsel %vm1508_vm3, %v2634_v37, %v2630_v57  ;;  %v9117_v57 = vld [vmem:[#allocation19_spill] sm:$0xff] }
 0x3f3   :  { %v2527_v44 = vpop.permute.xlu1 %2526  ;;  %v2730_v10 = vsel %vm1653_vm8, %v2635_v2, %v2729_v12  ;;  %v9120_v12 = vld [vmem:[#allocation22_spill] sm:$0xff] }
 0x3f4   :  { %v2643_v35 = vrot.slane %v2527_v44, %v7155_v5  ;;  %v7304_v49 = vpop.permute.xlu0 %2535 }
 0x3f6   :  { %v2644_v1 = vsel %vm1508_vm3, %v2643_v35, %v2639_v63 }
 0x3f7   :  { %v2533_v32 = vpop.permute.xlu1 %2532  ;;  %v2731_v24 = vsel %vm1655_vm9, %v2644_v1, %v2730_v10 }
 0x3f8   :  { %v2652_v33 = vrot.slane %v2533_v32, %v7155_v5 }
 0x3fa   :  { %v2653_v21 = vsel %vm1508_vm3, %v2652_v33, %v2648_v53 }
 0x3fb   :  { %v2732_v52 = vsel %vm1657_vm10, %v2653_v21, %v2731_v24  ;;  %v7298_v43 = vpop.permute.xlu1 %2538  ;;  %v9121_v24 = vld [vmem:[#allocation23_spill] sm:$0xff] }
 0x3fc   :  { %v2742_v36 = vsel %vm1668_vm11, %v2732_v52, -inf  ;;  %v2661_v17 = vrot.slane %v7298_v43, %v7155_v5 }
 0x3fd   :  { %2743 = vmax.xlane.f32.xlu0 %v2742_v36 }
 0x3ff   :  { %v7300_v27 = vpop.permute.xlu1 %2544 }
 0x400   :  { %v2670_v28 = vrot.slane %v7300_v27, %v7155_v5 }
 0x403   :  { %v7302_v47 = vpop.permute.xlu1 %2550 }
 0x407   :  { %v7306_v9 = vpop.permute.xlu1 %2556 }
 0x40b   :  { %v7316_v19 = vpop.permute.xlu1 %2562 }
 0x40f   :  { %v7328_v63 = vpop.permute.xlu1 %2568 }
 0x413   :  { %2541 = vperm.xlu0 %5617, %v7265_v13  }
 0x417   :  { %2547 = vperm.xlu0 %5617, %v7270_v23  }
 0x41b   :  { %2553 = vperm.xlu0 %5617, %v7275_v42  }
 0x41f   :  { %2559 = vperm.xlu0 %5617, %v7280_v7  }
 0x423   :  { %2565 = vperm.xlu0 %5617, %v7285_v14  }
 0x427   :  { %2571 = vperm.xlu0 %5617, %v7290_v51  }
 0x42b   :  { %2577 = vperm.xlu0 %5617, %v7295_v0  }
 0x458   :  { %v1671_v54 = vpop.xlane.xlu0 %1670 }
 0x459   :  { %v7309_v18 = vrot.slane %v1671_v54, %v9114_v11  ;;  %v7312_v37 = vrot.slane %v1671_v54, %v9115_v59  ;;  %v7319_v44 = vrot.slane %v1671_v54, %v9116_v40  ;;  %v7324_v35 = vrot.slane %v1671_v54, %v9117_v57 }
 0x45a   :  { %v7338_v1 = vrot.slane %v1671_v54, %v9119_v60  ;;  %v7343_v53 = vrot.slane %v1671_v54, %v9120_v12  ;;  %v7350_v52 = vrot.slane %v1671_v54, %v9121_v24 }
 0x45b   :  { %v1757_v41 = vsub.f32 %v6963_v50, %v7309_v18  ;;  %v1759_v38 = vsub.f32 %v6973_v3, %v7312_v37  ;;  %v1761_v56 = vsub.f32 %v6898_v6, %v7319_v44  ;;  %v9118_v50 = vld [vmem:[#allocation20_spill] sm:$0xff]  ;;  %v1763_v16 = vsub.f32 %v6907_v26, %v7324_v35  ;;  %v7335_v3 = vpop.permute.xlu1 %2574 }
 0x45c   :  { %v7331_v34 = vrot.slane %v1671_v54, %v9118_v50  ;;  %v1767_v33 = vsub.f32 %v6925_v46, %v7338_v1  ;;  %v1771_v46 = vsub.f32 %v6943_v15, %v7350_v52 }
 0x45d   :  { %v1789_v29 = vmul.f32 1.442695, %v1757_v41  ;;  %v1793_v45 = vmul.f32 1.442695, %v1759_v38  ;;  %v1797_v2 = vmul.f32 1.442695, %v1761_v56 }
 0x45e   :  { %v1765_v6 = vsub.f32 %v6916_v62, %v7331_v34  ;;  %v1801_v32 = vmul.f32 1.442695, %v1763_v16  ;;  %v1769_v62 = vsub.f32 %v6934_v58, %v7343_v53  ;;  %v1809_v36 = vmul.f32 1.442695, %v1767_v33 }
 0x45f   :  { %5618 = vpow2.f32 %v1789_v29  ;;  %v7347_v21 = vpop.permute.xlu1 %2580  ;;  %v1817_v54 = vmul.f32 1.442695, %v1771_v46 }
 0x460   :  { %5620 = vpow2.f32 %v1793_v45  ;;  %v1805_v26 = vmul.f32 1.442695, %v1765_v6  ;;  %v1813_v29 = vmul.f32 1.442695, %v1769_v62 }
 0x461   :  { %5622 = vpow2.f32 %v1797_v2 }
 0x462   :  { %5624 = vpow2.f32 %v1801_v32 }
 0x463   :  { %5626 = vpow2.f32 %v1805_v26  ;;  %v1674_v38 = vpop.xlane.xlu1 %1673 }
 0x464   :  { %5628 = vpow2.f32 %v1809_v36  ;;  %v7357_v56 = vrot.slane %v1674_v38, %v9114_v11  ;;  %v7360_v16 = vrot.slane %v1674_v38, %v9115_v59  ;;  %v7365_v15 = vrot.slane %v1674_v38, %v9116_v40 }
 0x465   :  { %5630 = vpow2.f32 %v1813_v29  ;;  %v7370_v26 = vrot.slane %v1674_v38, %v9117_v57  ;;  %v7375_v36 = vrot.slane %v1674_v38, %v9118_v50  ;;  %v7380_v29 = vrot.slane %v1674_v38, %v9119_v60 }
 0x466   :  { %v1773_v58 = vsub.f32 %v6951_v55, %v7357_v56  ;;  %5632 = vpow2.f32 %v1817_v54  ;;  %v1775_v6 = vsub.f32 %v6959_v61, %v7360_v16 }
 0x468   :  { %v1821_v32 = vmul.f32 1.442695, %v1773_v58  ;;  %v1825_v55 = vmul.f32 1.442695, %v1775_v6 }
 0x46a   :  { %5634 = vpow2.f32 %v1821_v32 }
 0x46b   :  { %5636 = vpow2.f32 %v1825_v55  ;;  %v7392_v55 = vrot.slane %v1674_v38, %v9121_v24 }
 0x46c   :  { %v5619_v10 = vpop.eup %5618 }
 0x46d   :  { %1886 = vperm.xlu0 %5617, %v5619_v10   ;;  %v5621_v41 = vpop.eup %5620  ;;  %v1777_v10 = vsub.f32 %v6968_v20, %v7365_v15  ;;  %v1781_v20 = vsub.f32 %v6988_v4, %v7375_v36  ;;  %v9123_v4 = vld [vmem:[#allocation106_spill] sm:$0xff] }
 0x46e   :  { %v5623_v45 = vpop.eup %5622 }
 0x46f   :  { %v5625_v2 = vpop.eup %5624  ;;  %v1829_v61 = vmul.f32 1.442695, %v1777_v10  ;;  %v1837_v32 = vmul.f32 1.442695, %v1781_v20 }
 0x470   :  { %v5627_v33 = vpop.eup %5626 }
 0x471   :  { %1892 = vperm.xlu0 %5617, %v5621_v41   ;;  %v5629_v62 = vpop.eup %5628  ;;  %v1779_v41 = vsub.f32 %v6978_v39, %v7370_v26  ;;  %5638 = vpow2.f32 %v1829_v61  ;;  %v9122_v39 = vld [vmem:[#allocation104_spill] sm:$0xff] }
 0x472   :  { %v5631_v46 = vpop.eup %5630  ;;  %v1783_v6 = vsub.f32 %v9122_v39, %v7380_v29 }
 0x473   :  { %v5633_v54 = vpop.eup %5632 }
 0x475   :  { %1898 = vperm.xlu0 %5617, %v5623_v45   ;;  %v1833_v45 = vmul.f32 1.442695, %v1779_v41  ;;  %v1841_v41 = vmul.f32 1.442695, %v1783_v6 }
 0x477   :  { %5640 = vpow2.f32 %v1833_v45 }
 0x478   :  { %5642 = vpow2.f32 %v1837_v32  ;;  %v9125_v32 = vld [vmem:[#allocation109_spill] sm:$0xff] }
 0x479   :  { %1904 = vperm.xlu0 %5617, %v5625_v2   ;;  %v7387_v2 = vrot.slane %v1674_v38, %v9120_v12  ;;  %5644 = vpow2.f32 %v1841_v41  ;;  %v9126_v41 = vld [vmem:[#allocation111_spill] sm:$0xff] }
 0x47d   :  { %1910 = vperm.xlu0 %5617, %v5627_v33   ;;  %v5635_v33 = vpop.eup %5634 }
 0x47e   :  { %v5637_v61 = vpop.eup %5636 }
 0x47f   :  { %v5639_v39 = vpop.eup %5638 }
 0x481   :  { %1916 = vperm.xlu0 %5617, %v5629_v62   ;;  %v1785_v62 = vsub.f32 %v9123_v4, %v7387_v2 }
 0x483   :  { %v1845_v45 = vmul.f32 1.442695, %v1785_v62 }
 0x485   :  { %1922 = vperm.xlu0 %5617, %v5631_v46   ;;  %5646 = vpow2.f32 %v1845_v45 }
 0x486   :  { %v7384_v58 = vpop.xlane.xlu0 %2743 }
 0x487   :  { %v7400_v20 = vrot.slane %v7384_v58, %v9114_v11  ;;  %v7404_v6 = vrot.slane %v7384_v58, %v9115_v59  ;;  %v7410_v62 = vrot.slane %v7384_v58, %v9116_v40  ;;  %v7429_v43 = vrot.slane %v7384_v58, %v9117_v57 }
 0x489   :  { %1928 = vperm.xlu0 %5617, %v5633_v54   ;;  %v9124_v54 = vld [vmem:[#allocation108_spill] sm:$0xff]  ;;  %v2830_v4 = vsub.f32 %v9125_v32, %v7400_v20 }
 0x48a   :  { %v1787_v48 = vsub.f32 %v9124_v54, %v7392_v55 }
 0x48b   :  { %v2862_v45 = vmul.f32 1.442695, %v2830_v4 }
 0x48d   :  { %1934 = vperm.xlu0 %5617, %v5635_v33   ;;  %v1849_v33 = vmul.f32 1.442695, %v1787_v48 }
 0x48e   :  { %v2542_v10 = vpop.permute.xlu0 %2541 }
 0x48f   :  { %5648 = vpow2.f32 %v1849_v33  ;;  %v2666_v48 = vrot.slane %v2542_v10, %v7152_v25  ;;  %v2679_v33 = vrot.slane %v7302_v47, %v7155_v5  ;;  %v2688_v10 = vrot.slane %v7306_v9, %v7155_v5 }
 0x490   :  { %5650 = vpow2.f32 %v2862_v45  ;;  %v2697_v9 = vrot.slane %v7316_v19, %v7155_v5 }
 0x491   :  { %1940 = vperm.xlu0 %5617, %v5637_v61   ;;  %v5641_v61 = vpop.eup %5640  ;;  %v2671_v31 = vsel %vm1508_vm3, %v2670_v28, %v2666_v48 }
 0x492   :  { %v2548_v46 = vpop.permute.xlu0 %2547  ;;  %v5643_v30 = vpop.eup %5642 }
 0x493   :  { %v2675_v32 = vrot.slane %v2548_v46, %v7152_v25  ;;  %v9127_v46 = vld [vmem:[#allocation112_spill] sm:$0xff] }
 0x495   :  { %1946 = vperm.xlu0 %5617, %v5639_v39   ;;  %v2832_v39 = vsub.f32 %v9126_v41, %v7404_v6  ;;  %v2834_v41 = vsub.f32 %v9127_v46, %v7410_v62  ;;  %v2680_v8 = vsel %vm1508_vm3, %v2679_v33, %v2675_v32  ;;  %v2706_v46 = vrot.slane %v7328_v63, %v7155_v5 }
 0x496   :  { %v2554_v38 = vpop.permute.xlu0 %2553 }
 0x497   :  { %v2684_v4 = vrot.slane %v2554_v38, %v7152_v25  ;;  %v2866_v27 = vmul.f32 1.442695, %v2832_v39  ;;  %v5645_v38 = vpop.eup %5644  ;;  %v2870_v63 = vmul.f32 1.442695, %v2834_v41 }
 0x499   :  { %1952 = vperm.xlu0 %5617, %v5641_v61   ;;  %v2657_v61 = vrot.slane %v7304_v49, %v7152_v25  ;;  %v2689_v39 = vsel %vm1508_vm3, %v2688_v10, %v2684_v4  ;;  %5652 = vpow2.f32 %v2866_v27  ;;  %v2724_v10 = vrot.slane %v7347_v21, %v7155_v5  ;;  %v9130_v27 = vld [vmem:[#allocation116_spill] sm:$0xff] }
 0x49a   :  { %v2560_v54 = vpop.permute.xlu0 %2559  ;;  %5654 = vpow2.f32 %v2870_v63 }
 0x49b   :  { %v2693_v49 = vrot.slane %v2560_v54, %v7152_v25  ;;  %v2715_v54 = vrot.slane %v7335_v3, %v7155_v5 }
 0x49d   :  { %1958 = vperm.xlu0 %5617, %v5643_v30   ;;  %v2662_v30 = vsel %vm1508_vm3, %v2661_v17, %v2657_v61  ;;  %v9128_v17 = vld [vmem:[#allocation114_spill] sm:$0xff]  ;;  %v2698_v48 = vsel %vm1508_vm3, %v2697_v9, %v2693_v49  ;;  %v5647_v61 = vpop.eup %5646 }
 0x49e   :  { %v2566_v22 = vpop.permute.xlu0 %2565  ;;  %v2836_v19 = vsub.f32 %v9128_v17, %v7429_v43  ;;  %v2733_v45 = vsel %vm1645_vm4, %v2671_v31, %v2662_v30 }
 0x49f   :  { %v2702_v47 = vrot.slane %v2566_v22, %v7152_v25  ;;  %v7448_v22 = vrot.slane %v7384_v58, %v9118_v50  ;;  %v2734_v3 = vsel %vm1647_vm5, %v2680_v8, %v2733_v45  ;;  %v7466_v8 = vrot.slane %v7384_v58, %v9119_v60 }
 0x4a0   :  { %v2874_v9 = vmul.f32 1.442695, %v2836_v19  ;;  %v9132_v19 = vld [vmem:[#allocation118_spill] sm:$0xff] }
 0x4a1   :  { %1964 = vperm.xlu0 %5617, %v5645_v38   ;;  %v2707_v32 = vsel %vm1508_vm3, %v2706_v46, %v2702_v47  ;;  %v9129_v38 = vld [vmem:[#allocation93_spill] sm:$0xff]  ;;  %v2838_v47 = vsub.f32 %v9130_v27, %v7448_v22  ;;  %v5649_v46 = vpop.eup %5648  ;;  %v2840_v63 = vsub.f32 %v9132_v19, %v7466_v8  ;;  %v9139_v19 = vld [vmem:[#allocation96_spill] sm:$0xff] }
 0x4a2   :  { %v2572_v0 = vpop.permute.xlu0 %2571  ;;  %v1758_v31 = vsub.f32 %v9129_v38, %v7309_v18  ;;  %5656 = vpow2.f32 %v2874_v9 }
 0x4a3   :  { %v2711_v28 = vrot.slane %v2572_v0, %v7152_v25  ;;  %v2735_v0 = vsel %vm1649_vm6, %v2689_v39, %v2734_v3  ;;  %v9131_v39 = vld [vmem:[#allocation90_spill] sm:$0xff]  ;;  %v2878_v3 = vmul.f32 1.442695, %v2838_v47  ;;  %v2882_v38 = vmul.f32 1.442695, %v2840_v63 }
 0x4a4   :  { %v2736_v49 = vsel %vm1651_vm7, %v2698_v48, %v2735_v0  ;;  %v1791_v17 = vmul.f32 1.442695, %v1758_v31  ;;  %v7479_v48 = vrot.slane %v7384_v58, %v9120_v12  ;;  %v1770_v63 = vsub.f32 %v9139_v19, %v7343_v53 }
 0x4a5   :  { %v2716_v33 = vsel %vm1508_vm3, %v2715_v54, %v2711_v28  ;;  %1970 = vperm.xlu0 %5617, %v5647_v61   ;;  %v2737_v30 = vsel %vm1653_vm8, %v2707_v32, %v2736_v49  ;;  %v1760_v28 = vsub.f32 %v9131_v39, %v7312_v37  ;;  %v5651_v32 = vpop.eup %5650  ;;  %v9133_v61 = vld [vmem:[#allocation91_spill] sm:$0xff]  ;;  %v9135_v49 = vld [vmem:[#allocation92_spill] sm:$0xff] }
 0x4a6   :  { %v2578_v4 = vpop.permute.xlu0 %2577  ;;  %v2738_v18 = vsel %vm1655_vm9, %v2716_v33, %v2737_v30  ;;  %v1762_v0 = vsub.f32 %v9133_v61, %v7319_v44  ;;  %5658 = vpow2.f32 %v1791_v17  ;;  %v7487_v33 = vrot.slane %v7384_v58, %v9121_v24  ;;  %v5653_v31 = vpop.eup %5652  ;;  %v9136_v44 = vld [vmem:[#allocation122_spill] sm:$0xff]  ;;  %v9140_v61 = vld [vmem:[#allocation97_spill] sm:$0xff] }
 0x4a7   :  { %v2720_v41 = vrot.slane %v2578_v4, %v7152_v25  ;;  %v1795_v37 = vmul.f32 1.442695, %v1760_v28  ;;  %v9134_v4 = vld [vmem:[#allocation120_spill] sm:$0xff]  ;;  %5660 = vpow2.f32 %v2878_v3  ;;  %v5655_v9 = vpop.eup %5654  ;;  %v9137_v58 = vld [vmem:[#allocation94_spill] sm:$0xff] }
 0x4a8   :  { %v1799_v27 = vmul.f32 1.442695, %v1762_v0  ;;  %v2844_v47 = vsub.f32 %v9136_v44, %v7487_v33  ;;  %v1772_v0 = vsub.f32 %v9140_v61, %v7350_v52 }
 0x4a9   :  { %v2725_v21 = vsel %vm1508_vm3, %v2724_v10, %v2720_v41  ;;  %1976 = vperm.xlu0 %5617, %v5649_v46   ;;  %v2842_v10 = vsub.f32 %v9134_v4, %v7479_v48  ;;  %v1764_v41 = vsub.f32 %v9135_v49, %v7324_v35  ;;  %5662 = vpow2.f32 %v1795_v37  ;;  %v9138_v35 = vld [vmem:[#allocation95_spill] sm:$0xff] }
 0x4aa   :  { %v2739_v54 = vsel %vm1657_vm10, %v2725_v21, %v2738_v18  ;;  %5664 = vpow2.f32 %v2882_v38  ;;  %v1766_v21 = vsub.f32 %v9137_v58, %v7331_v34  ;;  %v2890_v46 = vmul.f32 1.442695, %v2844_v47  ;;  %v9141_v38 = vld [vmem:[#allocation98_spill] sm:$0xff]  ;;  %v9143_v47 = vld [vmem:[#allocation100_spill] sm:$0xff] }
 0x4ab   :  { %v2745_v45 = vsel %vm1668_vm11, %v2739_v54, -inf  ;;  %v2886_v30 = vmul.f32 1.442695, %v2842_v10  ;;  %5666 = vpow2.f32 %v1799_v27  ;;  %v1803_v18 = vmul.f32 1.442695, %v1764_v41  ;;  %v9142_v41 = vld [vmem:[#allocation99_spill] sm:$0xff] }
 0x4ac   :  { %2746 = vmax.xlane.f32.xlu1 %v2745_v45  ;;  %v1768_v39 = vsub.f32 %v9138_v35, %v7338_v1  ;;  %v1807_v28 = vmul.f32 1.442695, %v1766_v21  ;;  %v1815_v1 = vmul.f32 1.442695, %v1770_v63  ;;  %v1819_v10 = vmul.f32 1.442695, %v1772_v0 }
 0x4ad   :  { %2959 = vperm.xlu0 %5617, %v5651_v32   ;;  %5668 = vpow2.f32 %v2886_v30  ;;  %v1774_v53 = vsub.f32 %v9141_v38, %v7357_v56  ;;  %v1776_v27 = vsub.f32 %v9142_v41, %v7360_v16  ;;  %v1778_v30 = vsub.f32 %v9143_v47, %v7365_v15  ;;  %v9144_v56 = vld [vmem:[#allocation101_spill] sm:$0xff]  ;;  %v9145_v16 = vld [vmem:[#allocation102_spill] sm:$0xff]  ;;  %v9146_v15 = vld [vmem:[#allocation103_spill] sm:$0xff] }
 0x4ae   :  { %5670 = vpow2.f32 %v1803_v18  ;;  %v1811_v34 = vmul.f32 1.442695, %v1768_v39  ;;  %v1780_v21 = vsub.f32 %v9144_v56, %v7370_v26  ;;  %v9147_v26 = vld [vmem:[#allocation105_spill] sm:$0xff]  ;;  %v9149_v0 = vld [vmem:[#allocation110_spill] sm:$0xff] }
 0x4af   :  { %v5657_v54 = vpop.eup %5656  ;;  %5672 = vpow2.f32 %v2890_v46  ;;  %v1823_v52 = vmul.f32 1.442695, %v1774_v53  ;;  %v1831_v18 = vmul.f32 1.442695, %v1778_v30  ;;  %v1786_v19 = vsub.f32 %v9147_v26, %v7387_v2  ;;  %v9150_v2 = vld [vmem:[#allocation113_spill] sm:$0xff] }
 0x4b0   :  { %5674 = vpow2.f32 %v1807_v28  ;;  %v1835_v35 = vmul.f32 1.442695, %v1780_v21  ;;  %v1784_v28 = vsub.f32 %v9146_v15, %v7380_v29  ;;  %v9152_v41 = vld [vmem:[#allocation117_spill] sm:$0xff] }
 0x4b1   :  { %2965 = vperm.xlu0 %5617, %v5653_v31   ;;  %5676 = vpow2.f32 %v1811_v34 }
 0x4b2   :  { %5678 = vpow2.f32 %v1815_v1  ;;  %v1843_v63 = vmul.f32 1.442695, %v1784_v28  ;;  %v2831_v1 = vsub.f32 %v9149_v0, %v7400_v20  ;;  %v9157_v0 = vld [vmem:[#allocation124_spill] sm:$0xff] }
 0x4b3   :  { %v5659_v17 = vpop.eup %5658  ;;  %5680 = vpow2.f32 %v1819_v10 }
 0x4b4   :  { %v5661_v45 = vpop.eup %5660  ;;  %5682 = vpow2.f32 %v1823_v52  ;;  %v2864_v10 = vmul.f32 1.442695, %v2831_v1 }
 0x4b5   :  { %2971 = vperm.xlu0 %5617, %v5655_v9   ;;  %v1827_v9 = vmul.f32 1.442695, %v1776_v27  ;;  %v2837_v27 = vsub.f32 %v9152_v41, %v7429_v43  ;;  %v9155_v43 = vld [vmem:[#allocation123_spill] sm:$0xff] }
 0x4b6   :  { %v5663_v3 = vpop.eup %5662  ;;  %v2843_v21 = vsub.f32 %v9155_v43, %v7479_v48  ;;  %v9161_v43 = vld [vmem:[#allocation129_spill] sm:$0xff] }
 0x4b7   :  { %v5665_v32 = vpop.eup %5664  ;;  %5684 = vpow2.f32 %v1827_v9  ;;  %v2876_v47 = vmul.f32 1.442695, %v2837_v27 }
 0x4b8   :  { %v5667_v37 = vpop.eup %5666  ;;  %5686 = vpow2.f32 %v1831_v18 }
 0x4b9   :  { %2977 = vperm.xlu0 %5617, %v5657_v54   ;;  %v1782_v54 = vsub.f32 %v9145_v16, %v7375_v36  ;;  %5688 = vpow2.f32 %v1835_v35  ;;  %v9148_v36 = vld [vmem:[#allocation107_spill] sm:$0xff] }
 0x4ba   :  { %v5669_v4 = vpop.eup %5668 }
 0x4bb   :  { %v5671_v31 = vpop.eup %5670 }
 0x4bc   :  { %v5673_v49 = vpop.eup %5672 }
 0x4bd   :  { %1889 = vperm.xlu1 %5616, %v5659_v17   ;;  %2983 = vperm.xlu0 %5617, %v5661_v45   ;;  %v5675_v44 = vpop.eup %5674  ;;  %v1839_v17 = vmul.f32 1.442695, %v1782_v54  ;;  %v2888_v54 = vmul.f32 1.442695, %v2843_v21 }
 0x4be   :  { %v5677_v58 = vpop.eup %5676 }
 0x4bf   :  { %v5679_v46 = vpop.eup %5678  ;;  %5690 = vpow2.f32 %v1839_v17 }
 0x4c0   :  { %v5681_v39 = vpop.eup %5680  ;;  %5692 = vpow2.f32 %v1843_v63 }
 0x4c1   :  { %1895 = vperm.xlu1 %5616, %v5663_v3   ;;  %2989 = vperm.xlu0 %5617, %v5665_v32   ;;  %v5683_v45 = vpop.eup %5682  ;;  %v1788_v3 = vsub.f32 %v9148_v36, %v7392_v55  ;;  %v1847_v32 = vmul.f32 1.442695, %v1786_v19  ;;  %v9151_v55 = vld [vmem:[#allocation115_spill] sm:$0xff] }
 0x4c2   :  { %v2835_v53 = vsub.f32 %v9151_v55, %v7410_v62  ;;  %v9154_v62 = vld [vmem:[#allocation121_spill] sm:$0xff] }
 0x4c3   :  { %5694 = vpow2.f32 %v1847_v32  ;;  %v1851_v29 = vmul.f32 1.442695, %v1788_v3  ;;  %v2841_v9 = vsub.f32 %v9154_v62, %v7466_v8 }
 0x4c4   :  { %v5685_v34 = vpop.eup %5684  ;;  %v2872_v20 = vmul.f32 1.442695, %v2835_v53  ;;  %v9159_v53 = vld [vmem:[#allocation127_spill] sm:$0xff] }
 0x4c5   :  { %1901 = vperm.xlu1 %5616, %v5667_v37   ;;  %2995 = vperm.xlu0 %5617, %v5669_v4   ;;  %v5687_v61 = vpop.eup %5686  ;;  %5696 = vpow2.f32 %v1851_v29  ;;  %v2833_v4 = vsub.f32 %v9150_v2, %v7404_v6  ;;  %v2884_v18 = vmul.f32 1.442695, %v2841_v9 }
 0x4c6   :  { %v5689_v37 = vpop.eup %5688  ;;  %5698 = vpow2.f32 %v2864_v10 }
 0x4c9   :  { %1907 = vperm.xlu1 %5616, %v5671_v31   ;;  %3001 = vperm.xlu0 %5617, %v5673_v49   ;;  %v2868_v31 = vmul.f32 1.442695, %v2833_v4 }
 0x4cb   :  { %5700 = vpow2.f32 %v2868_v31 }
 0x4cc   :  { %v5691_v38 = vpop.eup %5690  ;;  %5702 = vpow2.f32 %v2872_v20 }
 0x4cd   :  { %1913 = vperm.xlu1 %5616, %v5675_v44   ;;  %v5693_v49 = vpop.eup %5692  ;;  %v9153_v44 = vld [vmem:[#allocation119_spill] sm:$0xff]  ;;  %5704 = vpow2.f32 %v2876_v47  ;;  %v9160_v47 = vld [vmem:[#allocation128_spill] sm:$0xff] }
 0x4ce   :  { %v2839_v6 = vsub.f32 %v9153_v44, %v7448_v22  ;;  %v9156_v22 = vld [vmem:[#allocation125_spill] sm:$0xff] }
 0x4cf   :  { %v2845_v16 = vsub.f32 %v9156_v22, %v7487_v33 }
 0x4d0   :  { %v5695_v52 = vpop.eup %5694 }
 0x4d1   :  { %1919 = vperm.xlu1 %5616, %v5677_v58   ;;  %v2880_v58 = vmul.f32 1.442695, %v2839_v6  ;;  %v2892_v8 = vmul.f32 1.442695, %v2845_v16 }
 0x4d2   :  { %v5697_v30 = vpop.eup %5696 }
 0x4d3   :  { %v5699_v56 = vpop.eup %5698  ;;  %5706 = vpow2.f32 %v2880_v58 }
 0x4d4   :  { %5708 = vpow2.f32 %v2884_v18 }
 0x4d5   :  { %1925 = vperm.xlu1 %5616, %v5679_v46   ;;  %5710 = vpow2.f32 %v2888_v54 }
 0x4d6   :  { %5712 = vpow2.f32 %v2892_v8 }
 0x4d8   :  { %v5701_v46 = vpop.eup %5700 }
 0x4d9   :  { %1931 = vperm.xlu1 %5616, %v5681_v39   ;;  %v5703_v35 = vpop.eup %5702 }
 0x4da   :  { %v5705_v39 = vpop.eup %5704 }
 0x4dd   :  { %1937 = vperm.xlu1 %5616, %v5683_v45  }
 0x4e0   :  { %v5707_v28 = vpop.eup %5706 }
 0x4e1   :  { %1943 = vperm.xlu1 %5616, %v5685_v34   ;;  %v5709_v17 = vpop.eup %5708 }
 0x4e2   :  { %v5711_v45 = vpop.eup %5710 }
 0x4e3   :  { %v5713_v33 = vpop.eup %5712 }
 0x4e5   :  { %1949 = vperm.xlu1 %5616, %v5687_v61  }
 0x4e8   :  { %v7535_v15 = vpop.permute.xlu0 %1886 }
 0x4e9   :  { %1955 = vperm.xlu1 %5616, %v5689_v37   ;;  %v9158_v37 = vld [vmem:[#allocation126_spill] sm:$0xff] }
 0x4ec   :  { %v7537_v48 = vpop.permute.xlu0 %1892 }
 0x4ed   :  { %1961 = vperm.xlu1 %5616, %v5691_v38  }
 0x4f0   :  { %v7539_v26 = vpop.permute.xlu0 %1898 }
 0x4f1   :  { %1967 = vperm.xlu1 %5616, %v5693_v49  }
 0x4f4   :  { %v7541_v19 = vpop.permute.xlu0 %1904 }
 0x4f5   :  { %1973 = vperm.xlu1 %5616, %v5695_v52  }
 0x4f8   :  { %v7543_v63 = vpop.permute.xlu0 %1910 }
 0x4f9   :  { %1979 = vperm.xlu1 %5616, %v5697_v30  }
 0x4fc   :  { %v7545_v34 = vpop.permute.xlu0 %1916 }
 0x4fd   :  { %2962 = vperm.xlu1 %5616, %v5699_v56  }
 0x500   :  { %v7547_v36 = vpop.permute.xlu0 %1922 }
 0x501   :  { %2968 = vperm.xlu1 %5616, %v5701_v46  }
 0x504   :  { %v7549_v3 = vpop.permute.xlu0 %1928 }
 0x505   :  { %2974 = vperm.xlu1 %5616, %v5703_v35   ;;  %v9162_v35 = vld [vmem:[#allocation130_spill] sm:$0xff] }
 0x508   :  { %v7555_v4 = vpop.permute.xlu0 %1934 }
 0x509   :  { %2980 = vperm.xlu1 %5616, %v5705_v39  }
 0x50c   :  { %v7566_v6 = vpop.permute.xlu0 %1940 }
 0x50d   :  { %2986 = vperm.xlu1 %5616, %v5707_v28  }
 0x511   :  { %2992 = vperm.xlu1 %5616, %v5709_v17  }
 0x515   :  { %2998 = vperm.xlu1 %5616, %v5711_v45  }
 0x519   :  { %3004 = vperm.xlu1 %5616, %v5713_v33  }
 0x535   :  { %v2747_v32 = vpop.xlane.xlu1 %2746 }
 0x536   :  { %v2785_v61 = vrot.slane %v2747_v32, %v9114_v11  ;;  %v2789_v29 = vrot.slane %v2747_v32, %v9115_v59  ;;  %v2793_v38 = vrot.slane %v2747_v32, %v9116_v40  ;;  %v2797_v20 = vrot.slane %v2747_v32, %v9117_v57 }
 0x537   :  { %v2805_v22 = vrot.slane %v2747_v32, %v9119_v60  ;;  %v9225_v60 = vld [vmem:[#allocation68_spill] sm:$0xff] }
 0x538   :  { %v2846_v1 = vsub.f32 %v9157_v0, %v2785_v61  ;;  %v2847_v2 = vsub.f32 %v9158_v37, %v2785_v61  ;;  %v2848_v55 = vsub.f32 %v7265_v13, %v2789_v29  ;;  %v2849_v31 = vsub.f32 %v9159_v53, %v2789_v29 }
 0x539   :  { %v7557_v10 = vpop.permute.xlu1 %1889  ;;  %v2850_v52 = vsub.f32 %v7270_v23, %v2793_v38  ;;  %v2851_v30 = vsub.f32 %v9160_v47, %v2793_v38  ;;  %v2801_v13 = vrot.slane %v2747_v32, %v9118_v50  ;;  %v2852_v58 = vsub.f32 %v7275_v42, %v2797_v20  ;;  %v7572_v23 = vpop.permute.xlu0 %1946 }
 0x53a   :  { %v2894_v49 = vmul.f32 1.442695, %v2846_v1  ;;  %v2896_v41 = vmul.f32 1.442695, %v2847_v2  ;;  %v2898_v44 = vmul.f32 1.442695, %v2848_v55  ;;  %v2853_v21 = vsub.f32 %v9161_v43, %v2797_v20 }
 0x53b   :  { %v2900_v62 = vmul.f32 1.442695, %v2849_v31  ;;  %v2902_v56 = vmul.f32 1.442695, %v2850_v52  ;;  %v2904_v18 = vmul.f32 1.442695, %v2851_v30  ;;  %v2854_v16 = vsub.f32 %v7280_v7, %v2801_v13 }
 0x53c   :  { %5714 = vpow2.f32 %v2894_v49  ;;  %v2906_v54 = vmul.f32 1.442695, %v2852_v58  ;;  %v2855_v8 = vsub.f32 %v9162_v35, %v2801_v13  ;;  %v2908_v39 = vmul.f32 1.442695, %v2853_v21  ;;  %v9163_v7 = vld [vmem:[#allocation131_spill] sm:$0xff]  ;;  %v9164_v20 = vld [vmem:[#allocation132_spill] sm:$0xff] }
 0x53d   :  { %v7562_v27 = vpop.permute.xlu1 %1895  ;;  %5716 = vpow2.f32 %v2896_v41  ;;  %v2809_v42 = vrot.slane %v2747_v32, %v9120_v12  ;;  %v2856_v17 = vsub.f32 %v7285_v14, %v2805_v22  ;;  %v2910_v45 = vmul.f32 1.442695, %v2854_v16  ;;  %v7581_v29 = vpop.permute.xlu0 %1952  ;;  %v9166_v58 = vld [vmem:[#allocation133_spill] sm:$0xff] }
 0x53e   :  { %5718 = vpow2.f32 %v2898_v44  ;;  %v1984_v61 = vrot.slane %v7535_v15, %v7152_v25  ;;  %v2857_v0 = vsub.f32 %v9163_v7, %v2805_v22  ;;  %v2912_v1 = vmul.f32 1.442695, %v2855_v8 }
 0x53f   :  { %5720 = vpow2.f32 %v2900_v62  ;;  %v1993_v2 = vrot.slane %v7537_v48, %v7152_v25  ;;  %v2002_v38 = vrot.slane %v7539_v26, %v7152_v25  ;;  %v2011_v14 = vrot.slane %v7541_v19, %v7152_v25 }
 0x540   :  { %5722 = vpow2.f32 %v2902_v56  ;;  %v1997_v55 = vrot.slane %v7562_v27, %v7155_v5  ;;  %v2020_v15 = vrot.slane %v7543_v63, %v7152_v25  ;;  %v2813_v53 = vrot.slane %v2747_v32, %v9121_v24  ;;  %v9223_v24 = vld [vmem:[#allocation63_spill] sm:$0xff] }
 0x541   :  { %v1902_v9 = vpop.permute.xlu1 %1901  ;;  %5724 = vpow2.f32 %v2904_v18  ;;  %v2858_v31 = vsub.f32 %v7290_v51, %v2809_v42  ;;  %v2914_v26 = vmul.f32 1.442695, %v2856_v17  ;;  %v1988_v19 = vrot.slane %v7557_v10, %v7155_v5  ;;  %v7608_v62 = vpop.permute.xlu0 %1958 }
 0x542   :  { %5726 = vpow2.f32 %v2906_v54  ;;  %v2006_v49 = vrot.slane %v1902_v9, %v7155_v5  ;;  %v2859_v52 = vsub.f32 %v9164_v20, %v2809_v42  ;;  %v2916_v63 = vmul.f32 1.442695, %v2857_v0  ;;  %v9165_v9 = vld [vmem:[#allocation15_spill] sm:$0xff] }
 0x543   :  { %5728 = vpow2.f32 %v2908_v39  ;;  %v2029_v51 = vrot.slane %v7545_v34, %v7152_v25  ;;  %v2038_v47 = vrot.slane %v7547_v36, %v7152_v25  ;;  %v1998_v30 = vsel %vm1508_vm3, %v1997_v55, %v1993_v2 }
 0x544   :  { %5730 = vpow2.f32 %v2910_v45  ;;  %v2860_v13 = vsub.f32 %v9165_v9, %v2813_v53  ;;  %v2861_v56 = vsub.f32 %v9166_v58, %v2813_v53  ;;  %v2918_v43 = vmul.f32 1.442695, %v2858_v31  ;;  %v9167_v9 = vld [vmem:[#allocation25_spill] sm:$0xff]  ;;  %v9168_v58 = vld [vmem:[#allocation24_spill] sm:$0xff] }
 0x545   :  { %v1908_v46 = vpop.permute.xlu1 %1907  ;;  %5732 = vpow2.f32 %v2912_v1  ;;  %v2007_v21 = vsel %vm1508_vm3, %v2006_v49, %v2002_v38  ;;  %v1989_v34 = vsel %vm1508_vm3, %v1988_v19, %v1984_v61  ;;  %v2920_v16 = vmul.f32 1.442695, %v2859_v52 }
 0x546   :  { %v2015_v41 = vrot.slane %v1908_v46, %v7155_v5  ;;  %5734 = vpow2.f32 %v2914_v26  ;;  %v2125_v54 = vsel %vm1645_vm4, %v1998_v30, %v1989_v34  ;;  %v2922_v61 = vmul.f32 1.442695, %v2860_v13 }
 0x547   :  { %5736 = vpow2.f32 %v2916_v63  ;;  %v2126_v39 = vsel %vm1647_vm5, %v2007_v21, %v2125_v54  ;;  %v2924_v2 = vmul.f32 1.442695, %v2861_v56  ;;  %v2074_v34 = vrot.slane %v7572_v23, %v7152_v25 }
 0x548   :  { %v2016_v36 = vsel %vm1508_vm3, %v2015_v41, %v2011_v14  ;;  %5738 = vpow2.f32 %v2918_v43  ;;  %v2065_v43 = vrot.slane %v7566_v6, %v7152_v25  ;;  %v2092_v23 = vrot.slane %v7608_v62, %v7152_v25 }
 0x549   :  { %v1914_v28 = vpop.permute.xlu1 %1913  ;;  %v5715_v33 = vpop.eup %5714  ;;  %v2127_v17 = vsel %vm1649_vm6, %v2016_v36, %v2126_v39  ;;  %5740 = vpow2.f32 %v2920_v16  ;;  %v2083_v16 = vrot.slane %v7581_v29, %v7152_v25  ;;  %v9170_v39 = vld [vmem:[#allocation39_spill] sm:$0xff] }
 0x54a   :  { %v5717_v37 = vpop.eup %5716  ;;  %3007 = vperm.xlu0 %5617, %v5715_v33   ;;  %v2024_v32 = vrot.slane %v1914_v28, %v7155_v5  ;;  %v2047_v28 = vrot.slane %v7549_v3, %v7152_v25  ;;  %5742 = vpow2.f32 %v2922_v61 }
 0x54b   :  { %3010 = vperm.xlu1 %5616, %v5717_v37   ;;  %v5719_v27 = vpop.eup %5718  ;;  %v7626_v37 = vpop.permute.xlu0 %1964  ;;  %5744 = vpow2.f32 %v2924_v2 }
 0x54c   :  { %v5721_v44 = vpop.eup %5720  ;;  %v2025_v35 = vsel %vm1508_vm3, %v2024_v32, %v2020_v15  ;;  %v2101_v29 = vrot.slane %v7626_v37, %v7152_v25 }
 0x54d   :  { %v1920_v48 = vpop.permute.xlu1 %1919  ;;  %v5723_v22 = vpop.eup %5722  ;;  %v2128_v0 = vsel %vm1651_vm7, %v2025_v35, %v2127_v17  ;;  %v9169_v35 = vld [vmem:[#allocation50_spill] sm:$0xff] }
 0x54e   :  { %v2033_v10 = vrot.slane %v1920_v48, %v7155_v5  ;;  %3013 = vperm.xlu0 %5617, %v5719_v27   ;;  %v5725_v8 = vpop.eup %5724 }
 0x54f   :  { %3016 = vperm.xlu1 %5616, %v5721_v44   ;;  %v5727_v1 = vpop.eup %5726  ;;  %v1971_v48 = vpop.permute.xlu0 %1970 }
 0x550   :  { %v2034_v42 = vsel %vm1508_vm3, %v2033_v10, %v2029_v51  ;;  %v5729_v3 = vpop.eup %5728 }
 0x551   :  { %v1926_v18 = vpop.permute.xlu1 %1925  ;;  %v2129_v38 = vsel %vm1653_vm8, %v2034_v42, %v2128_v0  ;;  %v5731_v31 = vpop.eup %5730  ;;  %v9171_v0 = vld [vmem:[#allocation53_spill] sm:$0xff] }
 0x552   :  { %v2042_v46 = vrot.slane %v1926_v18, %v7155_v5  ;;  %3019 = vperm.xlu0 %5617, %v5723_v22   ;;  %v5733_v49 = vpop.eup %5732  ;;  %v2056_v22 = vrot.slane %v7555_v4, %v7152_v25 }
 0x553   :  { %3022 = vperm.xlu1 %5616, %v5725_v8   ;;  %v5735_v19 = vpop.eup %5734  ;;  %v1977_v52 = vpop.permute.xlu0 %1976 }
 0x554   :  { %v2043_v33 = vsel %vm1508_vm3, %v2042_v46, %v2038_v47  ;;  %v5737_v41 = vpop.eup %5736 }
 0x555   :  { %v1932_v45 = vpop.permute.xlu1 %1931  ;;  %v2130_v55 = vsel %vm1655_vm9, %v2043_v33, %v2129_v38  ;;  %v5739_v20 = vpop.eup %5738  ;;  %v9172_v38 = vld [vmem:[#allocation40_spill] sm:$0xff] }
 0x556   :  { %v2051_v7 = vrot.slane %v1932_v45, %v7155_v5  ;;  %3025 = vperm.xlu0 %5617, %v5727_v1   ;;  %v5741_v63 = vpop.eup %5740  ;;  %v2110_v45 = vrot.slane %v1971_v48, %v7152_v25 }
 0x557   :  { %3028 = vperm.xlu1 %5616, %v5729_v3   ;;  %v5743_v44 = vpop.eup %5742  ;;  %v7636_v47 = vpop.permute.xlu0 %2959 }
 0x558   :  { %v2052_v14 = vsel %vm1508_vm3, %v2051_v7, %v2047_v28  ;;  %v5745_v51 = vpop.eup %5744 }
 0x559   :  { %v1938_v15 = vpop.permute.xlu1 %1937  ;;  %v7632_v53 = vsel %vm1657_vm10, %v2052_v14, %v2130_v55  ;;  %v2119_v14 = vrot.slane %v1977_v52, %v7152_v25  ;;  %v9175_v52 = vld [vmem:[#allocation58_spill] sm:$0xff] }
 0x55a   :  { %5573 = vmatprep.mubr.msk.f32.mxu1 %vm1668_vm11, %v7632_v53  ;;  %3031 = vperm.xlu0 %5617, %v5731_v31   ;;  %v2060_v21 = vrot.slane %v1938_v15, %v7155_v5 }
 0x55b   :  { %3034 = vperm.xlu1 %5616, %v5733_v49   ;;  %v2966_v36 = vpop.permute.xlu0 %2965  ;;  %v9173_v49 = vld [vmem:[#allocation56_spill] sm:$0xff] }
 0x55c   :  { %v2061_v42 = vsel %vm1508_vm3, %v2060_v21, %v2056_v22 }
 0x55d   :  { %v1944_v26 = vpop.permute.xlu1 %1943 }
 0x55e   :  { %3037 = vperm.xlu0 %5617, %v5735_v19   ;;  %v2069_v10 = vrot.slane %v1944_v26, %v7155_v5  ;;  %v9174_v19 = vld [vmem:[#allocation42_spill] sm:$0xff] }
 0x55f   :  { %3040 = vperm.xlu1 %5616, %v5737_v41   ;;  %v2972_v1 = vpop.permute.xlu0 %2971 }
 0x560   :  { %v2070_v54 = vsel %vm1508_vm3, %v2069_v10, %v2065_v43 }
 0x561   :  { %v1950_v27 = vpop.permute.xlu1 %1949  ;;  %v2132_v33 = vsel %vm1645_vm4, %v2070_v54, %v2061_v42 }
 0x562   :  { %3043 = vperm.xlu0 %5617, %v5739_v20   ;;  %v2078_v13 = vrot.slane %v1950_v27, %v7155_v5 }
 0x563   :  { %3046 = vperm.xlu1 %5616, %v5741_v63   ;;  %v2978_v20 = vpop.permute.xlu0 %2977  ;;  %v9176_v63 = vld [vmem:[#allocation43_spill] sm:$0xff] }
 0x564   :  { %v2079_v8 = vsel %vm1508_vm3, %v2078_v13, %v2074_v34  ;;  %v3066_v34 = vrot.slane %v2966_v36, %v7152_v25 }
 0x565   :  { %v1956_v32 = vpop.permute.xlu1 %1955  ;;  %v2133_v61 = vsel %vm1647_vm5, %v2079_v8, %v2132_v33 }
 0x566   :  { %3049 = vperm.xlu0 %5617, %v5743_v44   ;;  %v2087_v18 = vrot.slane %v1956_v32, %v7155_v5 }
 0x567   :  { %3052 = vperm.xlu1 %5616, %v5745_v51   ;;  %v2984_v44 = vpop.permute.xlu0 %2983 }
 0x568   :  { %v2088_v28 = vsel %vm1508_vm3, %v2087_v18, %v2083_v16  ;;  %v3075_v16 = vrot.slane %v2972_v1, %v7152_v25 }
 0x569   :  { %v1962_v30 = vpop.permute.xlu1 %1961  ;;  %v2134_v37 = vsel %vm1649_vm6, %v2088_v28, %v2133_v61 }
 0x56a   :  { %3220 = vrot.lane.b32.xlu0 %v9167_v9, %s6007_s15  ;;  %v2096_v46 = vrot.slane %v1962_v30, %v7155_v5 }
 0x56b   :  { %3222 = vrot.lane.b32.xlu1 %v9168_v58, %s6007_s15  ;;  %v2990_v10 = vpop.permute.xlu0 %2989 }
 0x56c   :  { %v2097_v62 = vsel %vm1508_vm3, %v2096_v46, %v2092_v23  ;;  %v3084_v23 = vrot.slane %v2978_v20, %v7152_v25  ;;  %v3102_v28 = vrot.slane %v2990_v10, %v7152_v25  ;;  %v9178_v10 = vld [vmem:[#allocation64_spill] sm:$0xff] }
 0x56d   :  { %v1968_v56 = vpop.permute.xlu1 %1967  ;;  %v2135_v55 = vsel %vm1651_vm7, %v2097_v62, %v2134_v37 }
 0x56e   :  { %v2105_v6 = vrot.slane %v1968_v56, %v7155_v5  ;;  %3309 = vrot.lane.b32.xlu0 %v9169_v35, %s6008_s16 }
 0x56f   :  { %3311 = vrot.lane.b32.xlu1 %v9170_v39, %s6008_s16  ;;  %v2996_v43 = vpop.permute.xlu0 %2995 }
 0x570   :  { %v2106_v7 = vsel %vm1508_vm3, %v2105_v6, %v2101_v29  ;;  %v3057_v6 = vrot.slane %v7636_v47, %v7152_v25  ;;  %v3093_v29 = vrot.slane %v2984_v44, %v7152_v25  ;;  %v3111_v47 = vrot.slane %v2996_v43, %v7152_v25 }
 0x571   :  { %v1974_v4 = vpop.permute.xlu1 %1973  ;;  %v2136_v31 = vsel %vm1653_vm8, %v2106_v7, %v2135_v55 }
 0x572   :  { %v2114_v17 = vrot.slane %v1974_v4, %v7155_v5  ;;  %3313 = vrot.lane.b32.xlu0 %v9171_v0, %s6008_s16 }
 0x573   :  { %3315 = vrot.lane.b32.xlu1 %v9172_v38, %s6008_s16  ;;  %v3002_v62 = vpop.permute.xlu0 %3001 }
 0x574   :  { %v2115_v2 = vsel %vm1508_vm3, %v2114_v17, %v2110_v45  ;;  %v3120_v55 = vrot.slane %v3002_v62, %v7152_v25 }
 0x575   :  { %v1980_v3 = vpop.permute.xlu1 %1979  ;;  %v2137_v26 = vsel %vm1655_vm9, %v2115_v2, %v2136_v31 }
 0x576   :  { %v2123_v15 = vrot.slane %v1980_v3, %v7155_v5  ;;  %3317 = vrot.lane.b32.xlu0 %v9173_v49, %s6008_s16 }
 0x577   :  { %3319 = vrot.lane.b32.xlu1 %v9174_v19, %s6008_s16 }
 0x578   :  { %v2124_v48 = vsel %vm1508_vm3, %v2123_v15, %v2119_v14 }
 0x579   :  { %v2963_v41 = vpop.permute.xlu1 %2962  ;;  %v2138_v27 = vsel %vm1657_vm10, %v2124_v48, %v2137_v26 }
 0x57a   :  { %5574 = vmatmul.mubr.msk.f32.vlgmr.msra.gmra.mxu1 %vm1668_vm11, %v2138_v27  ;;  %3321 = vrot.lane.b32.xlu0 %v9175_v52, %s6008_s16  ;;  %v3061_v46 = vrot.slane %v2963_v41, %v7155_v5 }
 0x57b   :  { %3323 = vrot.lane.b32.xlu1 %v9176_v63, %s6008_s16 }
 0x57c   :  { %v3062_v17 = vsel %vm1508_vm3, %v3061_v46, %v3057_v6  ;;  %v9183_v46 = vld [vmem:[#allocation75_spill] sm:$0xff] }
 0x57d   :  { %v2969_v32 = vpop.permute.xlu1 %2968 }
 0x57e   :  { %v3070_v56 = vrot.slane %v2969_v32, %v7155_v5  ;;  %v2141_v32 = vsel %vm1668_vm11, %v7632_v53, 0.0  ;;  %v9180_v53 = vld [vmem:[#allocation70_spill] sm:$0xff] }
 0x580   :  { %v3071_v8 = vsel %vm1508_vm3, %v3070_v56, %v3066_v34  ;;  %v9181_v56 = vld [vmem:[#allocation72_spill] sm:$0xff] }
 0x581   :  { %v2975_v51 = vpop.permute.xlu1 %2974  ;;  %v3198_v61 = vsel %vm1645_vm4, %v3071_v8, %v3062_v17  ;;  %v9185_v8 = vld [vmem:[#allocation78_spill] sm:$0xff] }
 0x582   :  { %v3079_v21 = vrot.slane %v2975_v51, %v7155_v5  ;;  %v2144_v51 = vsel %vm1668_vm11, %v2138_v27, 0.0  ;;  %v9182_v27 = vld [vmem:[#allocation73_spill] sm:$0xff] }
 0x584   :  { %v3080_v36 = vsel %vm1508_vm3, %v3079_v21, %v3075_v16 }
 0x585   :  { %v2981_v30 = vpop.permute.xlu1 %2980  ;;  %v3199_v1 = vsel %vm1647_vm5, %v3080_v36, %v3198_v61  ;;  %v9186_v36 = vld [vmem:[#allocation80_spill] sm:$0xff] }
 0x586   :  { %v3088_v22 = vrot.slane %v2981_v30, %v7155_v5  ;;  %v9177_v30 = vld [vmem:[#allocation61_spill] sm:$0xff] }
 0x588   :  { %v3089_v45 = vsel %vm1508_vm3, %v3088_v22, %v3084_v23 }
 0x589   :  { %v2987_v13 = vpop.permute.xlu1 %2986  ;;  %v3200_v2 = vsel %vm1649_vm6, %v3089_v45, %v3199_v1 }
 0x58a   :  { %v3097_v54 = vrot.slane %v2987_v13, %v7155_v5  ;;  %v9179_v13 = vld [vmem:[#allocation66_spill] sm:$0xff] }
 0x58c   :  { %v3098_v7 = vsel %vm1508_vm3, %v3097_v54, %v3093_v29  ;;  %v9184_v54 = vld [vmem:[#allocation77_spill] sm:$0xff] }
 0x58d   :  { %v2993_v18 = vpop.permute.xlu1 %2992  ;;  %v3201_v15 = vsel %vm1651_vm7, %v3098_v7, %v3200_v2 }
 0x58e   :  { %v3106_v4 = vrot.slane %v2993_v18, %v7155_v5 }
 0x590   :  { %v3107_v37 = vsel %vm1508_vm3, %v3106_v4, %v3102_v28 }
 0x591   :  { %v2999_v42 = vpop.permute.xlu1 %2998  ;;  %v3202_v48 = vsel %vm1653_vm8, %v3107_v37, %v3201_v15  ;;  %v9187_v37 = vld [vmem:[#allocation82_spill] sm:$0xff] }
 0x592   :  { %v3115_v33 = vrot.slane %v2999_v42, %v7155_v5 }
 0x594   :  { %v3116_v3 = vsel %vm1508_vm3, %v3115_v33, %v3111_v47 }
 0x595   :  { %v3005_v14 = vpop.permute.xlu1 %3004  ;;  %v3203_v41 = vsel %vm1655_vm9, %v3116_v3, %v3202_v48 }
 0x596   :  { %v3124_v31 = vrot.slane %v3005_v14, %v7155_v5 }
 0x598   :  { %v3125_v26 = vsel %vm1508_vm3, %v3124_v31, %v3120_v55 }
 0x599   :  { %v3204_v20 = vsel %vm1657_vm10, %v3125_v26, %v3203_v41  ;;  %2142 = vadd.xlane.f32.xlu0 %v2141_v32 }
 0x59a   :  { %5580 = vmatprep.mubr.msk.f32.mxu0 %vm1668_vm11, %v3204_v20  ;;  %v3214_v44 = vsel %vm1668_vm11, %v3204_v20, 0.0 }
 0x59d   :  { %3215 = vadd.xlane.f32.xlu0 %v3214_v44 }
 0x59f   :  { %2145 = vadd.xlane.f32.xlu1 %v2144_v51  ;;  %v9188_v51 = vld [vmem:[#allocation83_spill] sm:$0xff] }
 0x5b3   :  { %3325 = vrot.lane.b32.xlu0 %v9177_v30, %s6008_s16 }
 0x5b7   :  { %3329 = vrot.lane.b32.xlu0 %v9178_v10, %s6008_s16 }
 0x5bb   :  { %3333 = vrot.lane.b32.xlu0 %v9179_v13, %s6008_s16 }
 0x5bf   :  { %3337 = vrot.lane.b32.xlu0 %v9180_v53, %s6008_s16 }
 0x5c3   :  { %3341 = vrot.lane.b32.xlu0 %v9181_v56, %s6008_s16 }
 0x5c5   :  { %v3008_v43 = vpop.permute.xlu0 %3007 }
 0x5c6   :  { %v3011_v21 = vpop.permute.xlu1 %3010  ;;  %v3129_v62 = vrot.slane %v3008_v43, %v7152_v25 }
 0x5c7   :  { %3345 = vrot.lane.b32.xlu0 %v9182_v27, %s6008_s16  ;;  %v3133_v61 = vrot.slane %v3011_v21, %v7155_v5 }
 0x5c9   :  { %v3014_v18 = vpop.permute.xlu0 %3013  ;;  %v3134_v20 = vsel %vm1508_vm3, %v3133_v61, %v3129_v62 }
 0x5ca   :  { %v3017_v34 = vpop.permute.xlu1 %3016  ;;  %v3138_v42 = vrot.slane %v3014_v18, %v7152_v25 }
 0x5cb   :  { %3349 = vrot.lane.b32.xlu0 %v9183_v46, %s6008_s16  ;;  %v3142_v28 = vrot.slane %v3017_v34, %v7155_v5 }
 0x5cd   :  { %v3020_v22 = vpop.permute.xlu0 %3019  ;;  %v3143_v14 = vsel %vm1508_vm3, %v3142_v28, %v3138_v42 }
 0x5ce   :  { %v3023_v16 = vpop.permute.xlu1 %3022  ;;  %v3147_v45 = vrot.slane %v3020_v22, %v7152_v25  ;;  %v3205_v43 = vsel %vm1645_vm4, %v3143_v14, %v3134_v20 }
 0x5cf   :  { %3353 = vrot.lane.b32.xlu0 %v9184_v54, %s6008_s16  ;;  %v3151_v33 = vrot.slane %v3023_v16, %v7155_v5 }
 0x5d1   :  { %v3026_v6 = vpop.permute.xlu0 %3025  ;;  %v3152_v48 = vsel %vm1508_vm3, %v3151_v33, %v3147_v45 }
 0x5d2   :  { %v3029_v23 = vpop.permute.xlu1 %3028  ;;  %v3156_v7 = vrot.slane %v3026_v6, %v7152_v25  ;;  %v3206_v18 = vsel %vm1647_vm5, %v3152_v48, %v3205_v43 }
 0x5d3   :  { %3357 = vrot.lane.b32.xlu0 %v9185_v8, %s6008_s16  ;;  %v3160_v1 = vrot.slane %v3029_v23, %v7155_v5 }
 0x5d5   :  { %v3032_v4 = vpop.permute.xlu0 %3031  ;;  %v3161_v32 = vsel %vm1508_vm3, %v3160_v1, %v3156_v7 }
 0x5d6   :  { %v3035_v29 = vpop.permute.xlu1 %3034  ;;  %v3165_v2 = vrot.slane %v3032_v4, %v7152_v25  ;;  %v3207_v16 = vsel %vm1649_vm6, %v3161_v32, %v3206_v18  ;;  %v9193_v32 = vld [vmem:[#allocation51_spill] sm:$0xff] }
 0x5d7   :  { %3361 = vrot.lane.b32.xlu0 %v9186_v36, %s6008_s16  ;;  %v3169_v3 = vrot.slane %v3035_v29, %v7155_v5 }
 0x5d9   :  { %v3038_v17 = vpop.permute.xlu0 %3037  ;;  %v3170_v21 = vsel %vm1508_vm3, %v3169_v3, %v3165_v2  ;;  %v9189_v2 = vld [vmem:[#allocation44_spill] sm:$0xff]  ;;  %v9190_v3 = vld [vmem:[#allocation45_spill] sm:$0xff] }
 0x5da   :  { %v3041_v47 = vpop.permute.xlu1 %3040  ;;  %v3174_v55 = vrot.slane %v3038_v17, %v7152_v25  ;;  %v3208_v29 = vsel %vm1651_vm7, %v3170_v21, %v3207_v16  ;;  %v9194_v21 = vld [vmem:[#allocation54_spill] sm:$0xff] }
 0x5db   :  { %3365 = vrot.lane.b32.xlu0 %v9187_v37, %s6008_s16  ;;  %v3178_v15 = vrot.slane %v3041_v47, %v7155_v5  ;;  %v9197_v16 = vld [vmem:[#allocation62_spill] sm:$0xff] }
 0x5dd   :  { %v3044_v31 = vpop.permute.xlu0 %3043  ;;  %v3179_v34 = vsel %vm1508_vm3, %v3178_v15, %v3174_v55 }
 0x5de   :  { %v3183_v26 = vrot.slane %v3044_v31, %v7152_v25  ;;  %v3047_v41 = vpop.permute.xlu1 %3046  ;;  %v3209_v28 = vsel %vm1653_vm8, %v3179_v34, %v3208_v29  ;;  %v9191_v31 = vld [vmem:[#allocation47_spill] sm:$0xff]  ;;  %v9195_v34 = vld [vmem:[#allocation57_spill] sm:$0xff] }
 0x5df   :  { %v3187_v44 = vrot.slane %v3047_v41, %v7155_v5  ;;  %3369 = vrot.lane.b32.xlu0 %v9188_v51, %s6008_s16  ;;  %v9192_v41 = vld [vmem:[#allocation49_spill] sm:$0xff] }
 0x5e0   :  { %v9200_v29 = vld [vmem:[#allocation69_spill] sm:$0xff] }
 0x5e1   :  { %v3050_v22 = vpop.permute.xlu0 %3049  ;;  %v3188_v6 = vsel %vm1508_vm3, %v3187_v44, %v3183_v26 }
 0x5e2   :  { %v3192_v23 = vrot.slane %v3050_v22, %v7152_v25  ;;  %v3053_v4 = vpop.permute.xlu1 %3052  ;;  %v3210_v45 = vsel %vm1655_vm9, %v3188_v6, %v3209_v28  ;;  %v9196_v22 = vld [vmem:[#allocation59_spill] sm:$0xff]  ;;  %v9198_v6 = vld [vmem:[#allocation65_spill] sm:$0xff] }
 0x5e3   :  { %v3196_v42 = vrot.slane %v3053_v4, %v7155_v5 }
 0x5e5   :  { %v3197_v17 = vsel %vm1508_vm3, %v3196_v42, %v3192_v23  ;;  %v3221_v61 = vpop.permute.xlu0 %3220  ;;  %v9199_v23 = vld [vmem:[#allocation67_spill] sm:$0xff] }
 0x5e6   :  { %v3223_v33 = vpop.permute.xlu1 %3222  ;;  %v3211_v47 = vsel %vm1657_vm10, %v3197_v17, %v3210_v45 }
 0x5e7   :  { %5576 = vmatprep.subr.mxu0 %v3223_v33  ;;  %v3217_v62 = vsel %vm1668_vm11, %v3211_v47, 0.0 }
 0x5e8   :  { %3218 = vadd.xlane.f32.xlu1 %v3217_v62  ;;  %5577 = vmatpush3.msra.mxu0 %v3223_v33 }
 0x5e9   :  { %5578 = vmatprep.subr.mxu0 %v3221_v61  ;;  %v3310_v7 = vpop.permute.xlu0 %3309 }
 0x5ea   :  { %5579 = vmatpush3.msra.mxu0 %v3221_v61  ;;  %v3312_v1 = vpop.permute.xlu1 %3311  ;;  %v3405_v14 = vsel %vm87_vm0, %v3310_v7, 0.0 }
 0x5eb   :  { %5581 = vmatmul.mubr.msk.f32.vlgmr.msra.gmra.mxu0 %vm1668_vm11, %v3211_v47  ;;  %v3408_v62 = vsel %vm87_vm0, %v3312_v1, 0.0 }
 0x5ed   :  { %v3314_v55 = vpop.permute.xlu0 %3313 }
 0x5ee   :  { %v3316_v15 = vpop.permute.xlu1 %3315  ;;  %v3411_v48 = vsel %vm87_vm0, %v3314_v55, 0.0 }
 0x5ef   :  { %v3414_v20 = vsel %vm87_vm0, %v3316_v15, 0.0 }
 0x5f1   :  { %v3318_v4 = vpop.permute.xlu0 %3317 }
 0x5f2   :  { %v3320_v26 = vpop.permute.xlu1 %3319  ;;  %v3417_v61 = vsel %vm87_vm0, %v3318_v4, 0.0 }
 0x5f3   :  { %v3420_v44 = vsel %vm87_vm0, %v3320_v26, 0.0 }
 0x5f5   :  { %v3322_v42 = vpop.permute.xlu0 %3321 }
 0x5f6   :  { %v3324_v43 = vpop.permute.xlu1 %3323 }
 0x5f7   :  { %v3426_v18 = vsel %vm87_vm0, %v3324_v43, 0.0 }
 0x5f9   :  { %3327 = vrot.lane.b32.xlu1 %v9189_v2, %s6008_s16 }
 0x5fd   :  { %3331 = vrot.lane.b32.xlu1 %v9190_v3, %s6008_s16 }
 0x5fe   :  { %3406 = vadd.xlane.f32.xlu0 %v3405_v14  ;;  %v3423_v14 = vsel %vm87_vm0, %v3322_v42, 0.0 }
 0x601   :  { %3335 = vrot.lane.b32.xlu1 %v9191_v31, %s6008_s16 }
 0x602   :  { %3412 = vadd.xlane.f32.xlu0 %v3411_v48 }
 0x605   :  { %3339 = vrot.lane.b32.xlu1 %v9192_v41, %s6008_s16 }
 0x606   :  { %3415 = vadd.xlane.f32.xlu0 %v3414_v20 }
 0x609   :  { %3343 = vrot.lane.b32.xlu1 %v9193_v32, %s6008_s16 }
 0x60a   :  { %3421 = vadd.xlane.f32.xlu0 %v3420_v44 }
 0x60d   :  { %3347 = vrot.lane.b32.xlu1 %v9194_v21, %s6008_s16 }
 0x60e   :  { %3427 = vadd.xlane.f32.xlu0 %v3426_v18 }
 0x611   :  { %3351 = vrot.lane.b32.xlu1 %v9195_v34, %s6008_s16 }
 0x615   :  { %3355 = vrot.lane.b32.xlu1 %v9196_v22, %s6008_s16 }
 0x619   :  { %3359 = vrot.lane.b32.xlu1 %v9197_v16, %s6008_s16 }
 0x61d   :  { %3363 = vrot.lane.b32.xlu1 %v9198_v6, %s6008_s16 }
 0x621   :  { %3367 = vrot.lane.b32.xlu1 %v9199_v23, %s6008_s16 }
 0x622   :  { %v7817_v28 = vpop.xlane.xlu0 %2142 }
 0x623   :  { %9201 = vst [vmem:[#allocation104_spill] sm:$0xff] %v7817_v28 }
 0x625   :  { %3371 = vrot.lane.b32.xlu1 %v9200_v29, %s6008_s16 }
 0x626   :  { %v7819_v17 = vpop.xlane.xlu0 %3215 }
 0x627   :  { %9202 = vst [vmem:[#allocation106_spill] sm:$0xff] %v7819_v17  ;;  %v9217_v17 = vld [vmem:[#allocation52_spill] sm:$0xff] }
 0x62a   :  { %v3326_v45 = vpop.permute.xlu0 %3325 }
 0x62b   :  { %v3429_v15 = vsel %vm87_vm0, %v3326_v45, 0.0 }
 0x62e   :  { %v3330_v33 = vpop.permute.xlu0 %3329 }
 0x62f   :  { %v3435_v48 = vsel %vm87_vm0, %v3330_v33, 0.0  ;;  %v7831_v33 = vpop.xlane.xlu1 %2145 }
 0x630   :  { %9203 = vst [vmem:[#allocation108_spill] sm:$0xff] %v7831_v33 }
 0x632   :  { %v3334_v47 = vpop.permute.xlu0 %3333 }
 0x633   :  { %v3441_v20 = vsel %vm87_vm0, %v3334_v47, 0.0 }
 0x636   :  { %v3338_v7 = vpop.permute.xlu0 %3337 }
 0x637   :  { %v3447_v44 = vsel %vm87_vm0, %v3338_v7, 0.0 }
 0x63a   :  { %v3342_v55 = vpop.permute.xlu0 %3341 }
 0x63b   :  { %v3453_v43 = vsel %vm87_vm0, %v3342_v55, 0.0 }
 0x63e   :  { %v3346_v26 = vpop.permute.xlu0 %3345 }
 0x63f   :  { %v3459_v4 = vsel %vm87_vm0, %v3346_v26, 0.0 }
 0x642   :  { %v3350_v1 = vpop.permute.xlu0 %3349 }
 0x643   :  { %v3465_v45 = vsel %vm87_vm0, %v3350_v1, 0.0 }
 0x646   :  { %v3354_v18 = vpop.permute.xlu0 %3353 }
 0x647   :  { %v3471_v47 = vsel %vm87_vm0, %v3354_v18, 0.0 }
 0x649   :  { %3409 = vadd.xlane.f32.xlu1 %v3408_v62 }
 0x64a   :  { %v3358_v42 = vpop.permute.xlu0 %3357 }
 0x64b   :  { %v3477_v7 = vsel %vm87_vm0, %v3358_v42, 0.0 }
 0x64d   :  { %3418 = vadd.xlane.f32.xlu1 %v3417_v61 }
 0x64e   :  { %v3362_v62 = vpop.permute.xlu0 %3361 }
 0x651   :  { %3424 = vadd.xlane.f32.xlu1 %v3423_v14 }
 0x655   :  { %3430 = vadd.xlane.f32.xlu1 %v3429_v15  ;;  %v3366_v15 = vpop.permute.xlu0 %3365 }
 0x656   :  { %v3489_v1 = vsel %vm87_vm0, %v3366_v15, 0.0 }
 0x659   :  { %3436 = vadd.xlane.f32.xlu1 %v3435_v48  ;;  %v3483_v48 = vsel %vm87_vm0, %v3362_v62, 0.0 }
 0x65d   :  { %3442 = vadd.xlane.f32.xlu1 %v3441_v20 }
 0x661   :  { %3448 = vadd.xlane.f32.xlu1 %v3447_v44  ;;  %v3370_v44 = vpop.permute.xlu0 %3369 }
 0x665   :  { %3454 = vadd.xlane.f32.xlu1 %v3453_v43 }
 0x669   :  { %3460 = vadd.xlane.f32.xlu1 %v3459_v4  ;;  %v3495_v4 = vsel %vm87_vm0, %v3370_v44, 0.0 }
 0x66d   :  { %3466 = vadd.xlane.f32.xlu1 %v3465_v45 }
 0x671   :  { %3472 = vadd.xlane.f32.xlu1 %v3471_v47  ;;  %v7834_v61 = vpop.xlane.xlu1 %3218 }
 0x672   :  { %9204 = vst [vmem:[#allocation109_spill] sm:$0xff] %v7834_v61 }
 0x675   :  { %3478 = vadd.xlane.f32.xlu1 %v3477_v7  ;;  %v3328_v14 = vpop.permute.xlu1 %3327 }
 0x676   :  { %v3432_v55 = vsel %vm87_vm0, %v3328_v14, 0.0 }
 0x677   :  { %3433 = vadd.xlane.f32.xlu0 %v3432_v55 }
 0x679   :  { %3484 = vadd.xlane.f32.xlu1 %v3483_v48  ;;  %v3332_v26 = vpop.permute.xlu1 %3331 }
 0x67a   :  { %v3438_v20 = vsel %vm87_vm0, %v3332_v26, 0.0 }
 0x67b   :  { %3439 = vadd.xlane.f32.xlu0 %v3438_v20  ;;  %v9205_v20 = vld [vmem:[#allocation26_spill] sm:$0xff] }
 0x67d   :  { %3490 = vadd.xlane.f32.xlu1 %v3489_v1  ;;  %v3336_v43 = vpop.permute.xlu1 %3335 }
 0x67e   :  { %v3444_v18 = vsel %vm87_vm0, %v3336_v43, 0.0 }
 0x67f   :  { %3445 = vadd.xlane.f32.xlu0 %v3444_v18 }
 0x681   :  { %3496 = vadd.xlane.f32.xlu1 %v3495_v4  ;;  %v3340_v42 = vpop.permute.xlu1 %3339  ;;  %v9207_v4 = vld [vmem:[#allocation48_spill] sm:$0xff] }
 0x682   :  { %v3450_v45 = vsel %vm87_vm0, %v3340_v42, 0.0 }
 0x683   :  { %3451 = vadd.xlane.f32.xlu0 %v3450_v45 }
 0x685   :  { %v3344_v47 = vpop.permute.xlu1 %3343 }
 0x686   :  { %v3456_v62 = vsel %vm87_vm0, %v3344_v47, 0.0 }
 0x687   :  { %3457 = vadd.xlane.f32.xlu0 %v3456_v62  ;;  %v3407_v7 = vpop.xlane.xlu0 %3406 }
 0x688   :  { %v7848_v1 = vadd.f32 %v3407_v7, %v9205_v20 }
 0x689   :  { %v3348_v14 = vpop.permute.xlu1 %3347 }
 0x68a   :  { %v3462_v55 = vsel %vm87_vm0, %v3348_v14, 0.0  ;;  %9206 = vst [vmem:[#allocation111_spill] sm:$0xff] %v7848_v1  ;;  %v9209_v14 = vld [vmem:[#allocation27_spill] sm:$0xff] }
 0x68b   :  { %3463 = vadd.xlane.f32.xlu0 %v3462_v55  ;;  %v3413_v15 = vpop.xlane.xlu0 %3412 }
 0x68c   :  { %v7853_v42 = vadd.f32 %v3413_v15, %v9207_v4 }
 0x68d   :  { %v3352_v48 = vpop.permute.xlu1 %3351 }
 0x68e   :  { %v3468_v26 = vsel %vm87_vm0, %v3352_v48, 0.0  ;;  %9208 = vst [vmem:[#allocation112_spill] sm:$0xff] %v7853_v42 }
 0x68f   :  { %3469 = vadd.xlane.f32.xlu0 %v3468_v26  ;;  %v3416_v44 = vpop.xlane.xlu0 %3415  ;;  %v9211_v26 = vld [vmem:[#allocation28_spill] sm:$0xff] }
 0x690   :  { %v7858_v7 = vadd.f32 %v3416_v44, %v9209_v14 }
 0x691   :  { %v3356_v43 = vpop.permute.xlu1 %3355 }
 0x692   :  { %3566 = vperm.xlu1 %5616, %v7848_v1   ;;  %v3474_v18 = vsel %vm87_vm0, %v3356_v43, 0.0  ;;  %9210 = vst [vmem:[#allocation114_spill] sm:$0xff] %v7858_v7 }
 0x693   :  { %3475 = vadd.xlane.f32.xlu0 %v3474_v18  ;;  %v3422_v62 = vpop.xlane.xlu0 %3421 }
 0x694   :  { %v7863_v43 = vadd.f32 %v3422_v62, %v9211_v26 }
 0x695   :  { %v3360_v45 = vpop.permute.xlu1 %3359 }
 0x696   :  { %3572 = vperm.xlu1 %5616, %v7853_v42   ;;  %v3480_v47 = vsel %vm87_vm0, %v3360_v45, 0.0  ;;  %9212 = vst [vmem:[#allocation93_spill] sm:$0xff] %v7863_v43 }
 0x697   :  { %3481 = vadd.xlane.f32.xlu0 %v3480_v47  ;;  %v3428_v15 = vpop.xlane.xlu0 %3427  ;;  %v9213_v47 = vld [vmem:[#allocation29_spill] sm:$0xff] }
 0x698   :  { %v7868_v33 = vadd.f32 %v3428_v15, %v9213_v47 }
 0x699   :  { %v3364_v55 = vpop.permute.xlu1 %3363 }
 0x69a   :  { %3575 = vperm.xlu1 %5616, %v7858_v7   ;;  %v3486_v48 = vsel %vm87_vm0, %v3364_v55, 0.0  ;;  %9214 = vst [vmem:[#allocation116_spill] sm:$0xff] %v7868_v33 }
 0x69b   :  { %3487 = vadd.xlane.f32.xlu0 %v3486_v48  ;;  %v9215_v48 = vld [vmem:[#allocation46_spill] sm:$0xff] }
 0x69d   :  { %v3368_v18 = vpop.permute.xlu1 %3367 }
 0x69e   :  { %3581 = vperm.xlu1 %5616, %v7863_v43   ;;  %v3492_v45 = vsel %vm87_vm0, %v3368_v18, 0.0  ;;  %v9219_v18 = vld [vmem:[#allocation55_spill] sm:$0xff] }
 0x69f   :  { %3493 = vadd.xlane.f32.xlu0 %v3492_v45 }
 0x6a1   :  { %v3372_v44 = vpop.permute.xlu1 %3371 }
 0x6a2   :  { %3587 = vperm.xlu1 %5616, %v7868_v33   ;;  %v3498_v28 = vsel %vm87_vm0, %v3372_v44, 0.0  ;;  %v9227_v33 = vld [vmem:[#allocation71_spill] sm:$0xff] }
 0x6a3   :  { %3499 = vadd.xlane.f32.xlu0 %v3498_v28  ;;  %v9221_v28 = vld [vmem:[#allocation60_spill] sm:$0xff] }
 0x6d2   :  { %v3410_v55 = vpop.xlane.xlu1 %3409 }
 0x6d3   :  { %v7873_v62 = vadd.f32 %v3410_v55, %v9215_v48 }
 0x6d5   :  { %9216 = vst [vmem:[#allocation90_spill] sm:$0xff] %v7873_v62  ;;  %3569 = vperm.xlu0 %5617, %v7873_v62  }
 0x6d6   :  { %v3419_v61 = vpop.xlane.xlu1 %3418 }
 0x6d7   :  { %v7877_v9 = vadd.f32 %v3419_v61, %v9217_v17 }
 0x6d9   :  { %9218 = vst [vmem:[#allocation118_spill] sm:$0xff] %v7877_v9  ;;  %3578 = vperm.xlu0 %5617, %v7877_v9  }
 0x6da   :  { %v3425_v15 = vpop.xlane.xlu1 %3424 }
 0x6db   :  { %v7881_v45 = vadd.f32 %v3425_v15, %v9219_v18 }
 0x6dd   :  { %9220 = vst [vmem:[#allocation91_spill] sm:$0xff] %v7881_v45  ;;  %3584 = vperm.xlu0 %5617, %v7881_v45  }
 0x6de   :  { %v3431_v44 = vpop.xlane.xlu1 %3430 }
 0x6df   :  { %v7885_v58 = vadd.f32 %v3431_v44, %v9221_v28 }
 0x6e1   :  { %9222 = vst [vmem:[#allocation120_spill] sm:$0xff] %v7885_v58  ;;  %3590 = vperm.xlu0 %5617, %v7885_v58   ;;  %v9229_v58 = vld [vmem:[#allocation30_spill] sm:$0xff] }
 0x6e2   :  { %v3437_v55 = vpop.xlane.xlu1 %3436 }
 0x6e3   :  { %v7889_v12 = vadd.f32 %v3437_v55, %v9223_v24 }
 0x6e5   :  { %9224 = vst [vmem:[#allocation92_spill] sm:$0xff] %v7889_v12  ;;  %3596 = vperm.xlu0 %5617, %v7889_v12   ;;  %v9231_v12 = vld [vmem:[#allocation31_spill] sm:$0xff] }
 0x6e6   :  { %v3443_v61 = vpop.xlane.xlu1 %3442 }
 0x6e7   :  { %v7893_v50 = vadd.f32 %v3443_v61, %v9225_v60 }
 0x6e9   :  { %9226 = vst [vmem:[#allocation122_spill] sm:$0xff] %v7893_v50  ;;  %3602 = vperm.xlu0 %5617, %v7893_v50   ;;  %v9233_v50 = vld [vmem:[#allocation32_spill] sm:$0xff] }
 0x6ea   :  { %v3449_v15 = vpop.xlane.xlu1 %3448 }
 0x6eb   :  { %v7897_v45 = vadd.f32 %v3449_v15, %v9227_v33 }
 0x6ed   :  { %9228 = vst [vmem:[#allocation94_spill] sm:$0xff] %v7897_v45  ;;  %3608 = vperm.xlu0 %5617, %v7897_v45   ;;  %v9235_v45 = vld [vmem:[#allocation33_spill] sm:$0xff] }
 0x700   :  { %v3434_v44 = vpop.xlane.xlu0 %3433 }
 0x701   :  { %v7901_v57 = vadd.f32 %v3434_v44, %v9229_v58 }
 0x703   :  { %9230 = vst [vmem:[#allocation95_spill] sm:$0xff] %v7901_v57  ;;  %3593 = vperm.xlu1 %5616, %v7901_v57   ;;  %v9237_v57 = vld [vmem:[#allocation34_spill] sm:$0xff] }
 0x704   :  { %v3440_v55 = vpop.xlane.xlu0 %3439 }
 0x705   :  { %v7905_v24 = vadd.f32 %v3440_v55, %v9231_v12 }
 0x707   :  { %9232 = vst [vmem:[#allocation96_spill] sm:$0xff] %v7905_v24  ;;  %3599 = vperm.xlu1 %5616, %v7905_v24   ;;  %v9239_v24 = vld [vmem:[#allocation35_spill] sm:$0xff] }
 0x708   :  { %v3446_v61 = vpop.xlane.xlu0 %3445 }
 0x709   :  { %v7909_v60 = vadd.f32 %v3446_v61, %v9233_v50 }
 0x70b   :  { %9234 = vst [vmem:[#allocation97_spill] sm:$0xff] %v7909_v60  ;;  %3605 = vperm.xlu1 %5616, %v7909_v60   ;;  %v9241_v60 = vld [vmem:[#allocation36_spill] sm:$0xff] }
 0x70c   :  { %v3452_v15 = vpop.xlane.xlu0 %3451 }
 0x70d   :  { %v7913_v33 = vadd.f32 %v3452_v15, %v9235_v45 }
 0x70f   :  { %9236 = vst [vmem:[#allocation98_spill] sm:$0xff] %v7913_v33  ;;  %3611 = vperm.xlu1 %5616, %v7913_v33   ;;  %v9243_v33 = vld [vmem:[#allocation37_spill] sm:$0xff] }
 0x710   :  { %v3458_v44 = vpop.xlane.xlu0 %3457 }
 0x711   :  { %v7917_v58 = vadd.f32 %v3458_v44, %v9237_v57 }
 0x713   :  { %9238 = vst [vmem:[#allocation99_spill] sm:$0xff] %v7917_v58  ;;  %3617 = vperm.xlu1 %5616, %v7917_v58   ;;  %v9245_v58 = vld [vmem:[#allocation38_spill] sm:$0xff] }
 0x714   :  { %v3464_v55 = vpop.xlane.xlu0 %3463 }
 0x715   :  { %v7921_v12 = vadd.f32 %v3464_v55, %v9239_v24 }
 0x717   :  { %9240 = vst [vmem:[#allocation100_spill] sm:$0xff] %v7921_v12  ;;  %3623 = vperm.xlu1 %5616, %v7921_v12   ;;  %v9247_v12 = vld [vmem:[#allocation41_spill] sm:$0xff] }
 0x718   :  { %v3470_v61 = vpop.xlane.xlu0 %3469 }
 0x719   :  { %v7925_v50 = vadd.f32 %v3470_v61, %v9241_v60 }
 0x71b   :  { %9242 = vst [vmem:[#allocation101_spill] sm:$0xff] %v7925_v50  ;;  %3629 = vperm.xlu1 %5616, %v7925_v50   ;;  %v9249_v50 = vld [vmem:[#allocation87_spill] sm:$0xff] }
 0x71c   :  { %v3476_v15 = vpop.xlane.xlu0 %3475 }
 0x71d   :  { %v7929_v45 = vadd.f32 %v3476_v15, %v9243_v33 }
 0x71f   :  { %9244 = vst [vmem:[#allocation102_spill] sm:$0xff] %v7929_v45  ;;  %3635 = vperm.xlu1 %5616, %v7929_v45   ;;  %v9251_v45 = vld [vmem:[#allocation89_spill] sm:$0xff] }
 0x720   :  { %v3482_v44 = vpop.xlane.xlu0 %3481 }
 0x721   :  { %v7933_v28 = vadd.f32 %v3482_v44, %v9245_v58  ;;  %v3455_v44 = vpop.xlane.xlu1 %3454 }
 0x723   :  { %9246 = vst [vmem:[#allocation103_spill] sm:$0xff] %v7933_v28  ;;  %3641 = vperm.xlu1 %5616, %v7933_v28  }
 0x724   :  { %v3488_v55 = vpop.xlane.xlu0 %3487 }
 0x725   :  { %v7937_v47 = vadd.f32 %v3488_v55, %v9247_v12  ;;  %v3461_v28 = vpop.xlane.xlu1 %3460 }
 0x727   :  { %9248 = vst [vmem:[#allocation105_spill] sm:$0xff] %v7937_v47  ;;  %3647 = vperm.xlu1 %5616, %v7937_v47  }
 0x728   :  { %v3494_v61 = vpop.xlane.xlu0 %3493 }
 0x729   :  { %v7941_v60 = vadd.f32 %v3494_v61, %v9249_v50  ;;  %v3467_v58 = vpop.xlane.xlu1 %3466 }
 0x72b   :  { %9250 = vst [vmem:[#allocation107_spill] sm:$0xff] %v7941_v60  ;;  %3653 = vperm.xlu1 %5616, %v7941_v60  }
 0x72c   :  { %v3500_v15 = vpop.xlane.xlu0 %3499 }
 0x72d   :  { %v7945_v33 = vadd.f32 %v3500_v15, %v9251_v45  ;;  %v3473_v18 = vpop.xlane.xlu1 %3472 }
 0x72f   :  { %9252 = vst [vmem:[#allocation110_spill] sm:$0xff] %v7945_v33  ;;  %3659 = vperm.xlu1 %5616, %v7945_v33  }
 0x731   :  { %v3479_v55 = vpop.xlane.xlu1 %3478 }
 0x735   :  { %v3485_v12 = vpop.xlane.xlu1 %3484 }
 0x739   :  { %v7948_v24 = vpop.xlane.xlu1 %3490 }
 0x73d   :  { %v7950_v47 = vpop.xlane.xlu1 %3496 }
 0x741   :  { %v3567_v61 = vpop.permute.xlu1 %3566 }
 0x742   :  { %v3664_v43 = vrot.slane %v3567_v61, %v7152_v25 }
 0x745   :  { %v3573_v57 = vpop.permute.xlu1 %3572 }
 0x746   :  { %v3673_v59 = vrot.slane %v3573_v57, %v7152_v25 }
 0x749   :  { %v3576_v26 = vpop.permute.xlu1 %3575 }
 0x74a   :  { %v3677_v1 = vrot.slane %v3576_v26, %v7155_v5 }
 0x74c   :  { %v3678_v26 = vsel %vm1508_vm3, %v3677_v1, %v3673_v59 }
 0x74d   :  { %v3582_v15 = vpop.permute.xlu1 %3581 }
 0x74e   :  { %v3686_v40 = vrot.slane %v3582_v15, %v7155_v5 }
 0x750   :  { %v3570_v50 = vpop.permute.xlu0 %3569 }
 0x751   :  { %v3588_v14 = vpop.permute.xlu1 %3587  ;;  %v3668_v4 = vrot.slane %v3570_v50, %v7155_v5 }
 0x752   :  { %v3695_v11 = vrot.slane %v3588_v14, %v7155_v5 }
 0x753   :  { %v3669_v50 = vsel %vm1508_vm3, %v3668_v4, %v3664_v43 }
 0x754   :  { %v3579_v60 = vpop.permute.xlu0 %3578  ;;  %v3805_v57 = vsel %vm1645_vm4, %v3678_v26, %v3669_v50  ;;  %v9253_v50 = vld [vmem:[#allocation74_spill] sm:$0xff] }
 0x755   :  { %v3682_v20 = vrot.slane %v3579_v60, %v7152_v25 }
 0x757   :  { %v3687_v29 = vsel %vm1508_vm3, %v3686_v40, %v3682_v20 }
 0x758   :  { %v3585_v17 = vpop.permute.xlu0 %3584  ;;  %v3806_v40 = vsel %vm1647_vm5, %v3687_v29, %v3805_v57 }
 0x759   :  { %v3691_v7 = vrot.slane %v3585_v17, %v7152_v25 }
 0x75b   :  { %v3696_v17 = vsel %vm1508_vm3, %v3695_v11, %v3691_v7 }
 0x75c   :  { %v3591_v45 = vpop.permute.xlu0 %3590  ;;  %v3807_v43 = vsel %vm1649_vm6, %v3696_v17, %v3806_v40  ;;  %v9255_v17 = vld [vmem:[#allocation79_spill] sm:$0xff] }
 0x75d   :  { %v3700_v61 = vrot.slane %v3591_v45, %v7152_v25 }
 0x760   :  { %v3597_v33 = vpop.permute.xlu0 %3596 }
 0x761   :  { %v3709_v15 = vrot.slane %v3597_v33, %v7152_v25 }
 0x764   :  { %v3603_v9 = vpop.permute.xlu0 %3602 }
 0x765   :  { %v3718_v14 = vrot.slane %v3603_v9, %v7152_v25 }
 0x768   :  { %v3609_v4 = vpop.permute.xlu0 %3608 }
 0x769   :  { %v3727_v33 = vrot.slane %v3609_v4, %v7152_v25  ;;  %v9258_v4 = vld [vmem:[#allocation85_spill] sm:$0xff] }
 0x77e   :  { %v3594_v48 = vpop.permute.xlu1 %3593 }
 0x77f   :  { %v3704_v62 = vrot.slane %v3594_v48, %v7155_v5 }
 0x782   :  { %v3600_v42 = vpop.permute.xlu1 %3599 }
 0x783   :  { %v3713_v60 = vrot.slane %v3600_v42, %v7155_v5  ;;  %v3705_v42 = vsel %vm1508_vm3, %v3704_v62, %v3700_v61  ;;  %v9254_v61 = vld [vmem:[#allocation76_spill] sm:$0xff] }
 0x784   :  { %v7989_v26 = vadd.f32 %v3461_v28, %v9254_v61  ;;  %v8005_v28 = vadd.f32 %v3485_v12, %v9258_v4 }
 0x785   :  { %v3714_v20 = vsel %vm1508_vm3, %v3713_v60, %v3709_v15  ;;  %v7985_v60 = vadd.f32 %v3455_v44, %v9253_v50  ;;  %v7993_v15 = vadd.f32 %v3467_v58, %v9255_v17 }
 0x786   :  { %v3606_v23 = vpop.permute.xlu1 %3605  ;;  %9259 = vst [vmem:[#allocation113_spill] sm:$0xff] %v8005_v28 }
 0x787   :  { %v3722_v48 = vrot.slane %v3606_v23, %v7155_v5  ;;  %v3808_v23 = vsel %vm1651_vm7, %v3705_v42, %v3807_v43  ;;  %v9260_v42 = vld [vmem:[#allocation86_spill] sm:$0xff] }
 0x788   :  { %v3809_v9 = vsel %vm1653_vm8, %v3714_v20, %v3808_v23  ;;  %v8010_v58 = vadd.f32 %v7948_v24, %v9260_v42 }
 0x789   :  { %v3723_v59 = vsel %vm1508_vm3, %v3722_v48, %v3718_v14  ;;  %v9256_v48 = vld [vmem:[#allocation81_spill] sm:$0xff]  ;;  %v9257_v14 = vld [vmem:[#allocation84_spill] sm:$0xff] }
 0x78a   :  { %v3612_v11 = vpop.permute.xlu1 %3611  ;;  %v3810_v62 = vsel %vm1655_vm9, %v3723_v59, %v3809_v9  ;;  %v7997_v57 = vadd.f32 %v3473_v18, %v9256_v48  ;;  %v8001_v44 = vadd.f32 %v3479_v55, %v9257_v14  ;;  %9261 = vst [vmem:[#allocation115_spill] sm:$0xff] %v8010_v58  ;;  %v9262_v18 = vld [vmem:[#allocation88_spill] sm:$0xff] }
 0x78b   :  { %v3731_v1 = vrot.slane %v3612_v11, %v7155_v5  ;;  %v8015_v40 = vadd.f32 %v7950_v47, %v9262_v18 }
 0x78d   :  { %v3732_v7 = vsel %vm1508_vm3, %v3731_v1, %v3727_v33  ;;  %9263 = vst [vmem:[#allocation117_spill] sm:$0xff] %v8015_v40 }
 0x78e   :  { %v3811_v29 = vsel %vm1657_vm10, %v3732_v7, %v3810_v62  ;;  %v3618_v12 = vpop.permute.xlu1 %3617 }
 0x78f   :  { %v3821_v45 = vsel %vm1668_vm11, %v3811_v29, -inf  ;;  %v3740_v43 = vrot.slane %v3618_v12, %v7155_v5 }
 0x790   :  { %3822 = vmax.xlane.f32.xlu0 %v3821_v45 }
 0x792   :  { %v3624_v24 = vpop.permute.xlu1 %3623 }
 0x7a6   :  { %3614 = vperm.xlu0 %5617, %v7985_v60  }
 0x7aa   :  { %3620 = vperm.xlu0 %5617, %v7989_v26  }
 0x7ae   :  { %3626 = vperm.xlu0 %5617, %v7993_v15  }
 0x7b2   :  { %3632 = vperm.xlu0 %5617, %v7997_v57  }
 0x7b6   :  { %3638 = vperm.xlu0 %5617, %v8001_v44  }
 0x7ba   :  { %3644 = vperm.xlu0 %5617, %v8005_v28  }
 0x7be   :  { %3650 = vperm.xlu0 %5617, %v8010_v58  }
 0x7c2   :  { %3656 = vperm.xlu0 %5617, %v8015_v40  }
 0x7c6   :  { %4388 = vrot.lane.b32.xlu0 %v9169_v35, %s6009_s17  ;;  %v3630_v35 = vpop.permute.xlu1 %3629 }
 0x7c7   :  { %v3758_v55 = vrot.slane %v3630_v35, %v7155_v5 }
 0x7ca   :  { %4392 = vrot.lane.b32.xlu0 %v9171_v0, %s6009_s17 }
 0x7ce   :  { %4396 = vrot.lane.b32.xlu0 %v9173_v49, %s6009_s17 }
 0x7d2   :  { %4420 = vrot.lane.b32.xlu0 %v9181_v56, %s6009_s17 }
 0x7d6   :  { %4424 = vrot.lane.b32.xlu0 %v9182_v27, %s6009_s17 }
 0x7da   :  { %4400 = vrot.lane.b32.xlu0 %v9175_v52, %s6009_s17  ;;  %v3636_v52 = vpop.permute.xlu1 %3635 }
 0x7db   :  { %v3767_v59 = vrot.slane %v3636_v52, %v7155_v5 }
 0x7de   :  { %4428 = vrot.lane.b32.xlu0 %v9183_v46, %s6009_s17 }
 0x7e2   :  { %4404 = vrot.lane.b32.xlu0 %v9177_v30, %s6009_s17 }
 0x7e6   :  { %4432 = vrot.lane.b32.xlu0 %v9184_v54, %s6009_s17 }
 0x7ea   :  { %4408 = vrot.lane.b32.xlu0 %v9178_v10, %s6009_s17  ;;  %v3642_v10 = vpop.permute.xlu1 %3641 }
 0x7eb   :  { %v3776_v23 = vrot.slane %v3642_v10, %v7155_v5 }
 0x7ee   :  { %4436 = vrot.lane.b32.xlu0 %v9185_v8, %s6009_s17  ;;  %v3648_v27 = vpop.permute.xlu1 %3647 }
 0x7ef   :  { %v3785_v7 = vrot.slane %v3648_v27, %v7155_v5 }
 0x7f2   :  { %4412 = vrot.lane.b32.xlu0 %v9179_v13, %s6009_s17  ;;  %v3654_v54 = vpop.permute.xlu1 %3653 }
 0x7f3   :  { %v3794_v12 = vrot.slane %v3654_v54, %v7155_v5 }
 0x7f6   :  { %4440 = vrot.lane.b32.xlu0 %v9186_v36, %s6009_s17 }
 0x7fa   :  { %4416 = vrot.lane.b32.xlu0 %v9180_v53, %s6009_s17 }
 0x7fe   :  { %4444 = vrot.lane.b32.xlu0 %v9187_v37, %s6009_s17  ;;  %v3749_v37 = vrot.slane %v3624_v24, %v7155_v5  ;;  %v3660_v24 = vpop.permute.xlu1 %3659 }
 0x7ff   :  { %v3803_v27 = vrot.slane %v3660_v24, %v7155_v5 }
 0x802   :  { %4448 = vrot.lane.b32.xlu0 %v9188_v51, %s6009_s17 }
 0x819   :  { %v8050_v0 = vpop.xlane.xlu0 %3822 }
 0x821   :  { %v3615_v49 = vpop.permute.xlu0 %3614 }
 0x822   :  { %v3736_v51 = vrot.slane %v3615_v49, %v7152_v25 }
 0x824   :  { %v3741_v62 = vsel %vm1508_vm3, %v3740_v43, %v3736_v51 }
 0x825   :  { %v3621_v30 = vpop.permute.xlu0 %3620 }
 0x826   :  { %v3745_v53 = vrot.slane %v3621_v30, %v7152_v25 }
 0x828   :  { %v3750_v11 = vsel %vm1508_vm3, %v3749_v37, %v3745_v53 }
 0x829   :  { %v3627_v13 = vpop.permute.xlu0 %3626  ;;  %v3812_v35 = vsel %vm1645_vm4, %v3750_v11, %v3741_v62 }
 0x82a   :  { %v3754_v8 = vrot.slane %v3627_v13, %v7152_v25 }
 0x82c   :  { %v3759_v1 = vsel %vm1508_vm3, %v3758_v55, %v3754_v8 }
 0x82d   :  { %v3633_v56 = vpop.permute.xlu0 %3632  ;;  %v3813_v52 = vsel %vm1647_vm5, %v3759_v1, %v3812_v35 }
 0x82e   :  { %v3763_v47 = vrot.slane %v3633_v56, %v7152_v25 }
 0x830   :  { %v3768_v29 = vsel %vm1508_vm3, %v3767_v59, %v3763_v47 }
 0x831   :  { %v3639_v46 = vpop.permute.xlu0 %3638  ;;  %v3814_v10 = vsel %vm1649_vm6, %v3768_v29, %v3813_v52 }
 0x832   :  { %v3772_v20 = vrot.slane %v3639_v46, %v7152_v25 }
 0x834   :  { %v3777_v49 = vsel %vm1508_vm3, %v3776_v23, %v3772_v20 }
 0x835   :  { %v3645_v36 = vpop.permute.xlu0 %3644  ;;  %v3815_v46 = vsel %vm1651_vm7, %v3777_v49, %v3814_v10 }
 0x836   :  { %v3781_v33 = vrot.slane %v3645_v36, %v7152_v25 }
 0x838   :  { %v3786_v30 = vsel %vm1508_vm3, %v3785_v7, %v3781_v33 }
 0x839   :  { %v3651_v9 = vpop.permute.xlu0 %3650  ;;  %v3816_v54 = vsel %vm1653_vm8, %v3786_v30, %v3815_v46 }
 0x83a   :  { %v3790_v45 = vrot.slane %v3651_v9, %v7152_v25 }
 0x83c   :  { %v3795_v13 = vsel %vm1508_vm3, %v3794_v12, %v3790_v45 }
 0x83d   :  { %v3657_v56 = vpop.permute.xlu0 %3656  ;;  %v3817_v36 = vsel %vm1655_vm9, %v3795_v13, %v3816_v54 }
 0x83e   :  { %v3799_v53 = vrot.slane %v3657_v56, %v7152_v25 }
 0x840   :  { %v3804_v8 = vsel %vm1508_vm3, %v3803_v27, %v3799_v53 }
 0x841   :  { %v4389_v37 = vpop.permute.xlu0 %4388  ;;  %v3818_v51 = vsel %vm1657_vm10, %v3804_v8, %v3817_v36 }
 0x842   :  { %v4484_v47 = vsel %vm87_vm0, %v4389_v37, 0.0  ;;  %v3824_v55 = vsel %vm1668_vm11, %v3818_v51, -inf }
 0x843   :  { %4485 = vadd.xlane.f32.xlu0 %v4484_v47  ;;  %3825 = vmax.xlane.f32.xlu1 %v3824_v55 }
 0x845   :  { %v4393_v20 = vpop.permute.xlu0 %4392 }
 0x846   :  { %v4490_v43 = vsel %vm87_vm0, %v4393_v20, 0.0 }
 0x847   :  { %4491 = vadd.xlane.f32.xlu0 %v4490_v43 }
 0x854   :  { %4390 = vrot.lane.b32.xlu1 %v9170_v39, %s6009_s17  ;;  %v9264_v39 = vld [vmem:[#allocation67_spill] sm:$0xff] }
 0x858   :  { %4394 = vrot.lane.b32.xlu1 %v9172_v38, %s6009_s17  ;;  %v9265_v38 = vld [vmem:[#allocation69_spill] sm:$0xff] }
 0x85c   :  { %4398 = vrot.lane.b32.xlu1 %v9174_v19, %s6009_s17  ;;  %v4397_v19 = vpop.permute.xlu0 %4396 }
 0x85d   :  { %v4496_v59 = vsel %vm87_vm0, %v4397_v19, 0.0 }
 0x860   :  { %4422 = vrot.lane.b32.xlu1 %v9193_v32, %s6009_s17 }
 0x864   :  { %4426 = vrot.lane.b32.xlu1 %v9194_v21, %s6009_s17 }
 0x868   :  { %4402 = vrot.lane.b32.xlu1 %v9176_v63, %s6009_s17  ;;  %v4421_v63 = vpop.permute.xlu0 %4420 }
 0x869   :  { %v4532_v1 = vsel %vm87_vm0, %v4421_v63, 0.0 }
 0x86c   :  { %4430 = vrot.lane.b32.xlu1 %v9195_v34, %s6009_s17 }
 0x870   :  { %4406 = vrot.lane.b32.xlu1 %v9189_v2, %s6009_s17  ;;  %v4425_v2 = vpop.permute.xlu0 %4424 }
 0x871   :  { %v4538_v29 = vsel %vm87_vm0, %v4425_v2, 0.0 }
 0x874   :  { %4434 = vrot.lane.b32.xlu1 %v9196_v22, %s6009_s17  ;;  %v4401_v21 = vpop.permute.xlu0 %4400 }
 0x875   :  { %v4502_v24 = vsel %vm87_vm0, %v4401_v21, 0.0 }
 0x878   :  { %4410 = vrot.lane.b32.xlu1 %v9190_v3, %s6009_s17  ;;  %v4429_v34 = vpop.permute.xlu0 %4428 }
 0x879   :  { %v4544_v30 = vsel %vm87_vm0, %v4429_v34, 0.0 }
 0x87c   :  { %4438 = vrot.lane.b32.xlu1 %v9197_v16, %s6009_s17  ;;  %v4405_v33 = vpop.permute.xlu0 %4404 }
 0x87d   :  { %v4508_v27 = vsel %vm87_vm0, %v4405_v33, 0.0  ;;  %v9267_v33 = vld [vmem:[#allocation17_spill] sm:$0xff] }
 0x880   :  { %4414 = vrot.lane.b32.xlu1 %v9191_v31, %s6009_s17  ;;  %v4433_v62 = vpop.permute.xlu0 %4432 }
 0x881   :  { %v4550_v54 = vsel %vm87_vm0, %v4433_v62, 0.0 }
 0x884   :  { %4442 = vrot.lane.b32.xlu1 %v9198_v6, %s6009_s17  ;;  %v4409_v49 = vpop.permute.xlu0 %4408 }
 0x885   :  { %v4514_v51 = vsel %vm87_vm0, %v4409_v49, 0.0 }
 0x888   :  { %4418 = vrot.lane.b32.xlu1 %v9192_v41, %s6009_s17  ;;  %v4437_v56 = vpop.permute.xlu0 %4436 }
 0x889   :  { %v4556_v43 = vsel %vm87_vm0, %v4437_v56, 0.0  ;;  %v9272_v56 = vld [vmem:[#allocation93_spill] sm:$0xff] }
 0x88c   :  { %4446 = vrot.lane.b32.xlu1 %v9264_v39, %s6009_s17  ;;  %v4413_v36 = vpop.permute.xlu0 %4412 }
 0x88d   :  { %v4520_v19 = vsel %vm87_vm0, %v4413_v36, 0.0 }
 0x890   :  { %4450 = vrot.lane.b32.xlu1 %v9265_v38, %s6009_s17  ;;  %v4441_v20 = vpop.permute.xlu0 %4440 }
 0x891   :  { %v4562_v21 = vsel %vm87_vm0, %v4441_v20, 0.0 }
 0x894   :  { %v4417_v2 = vpop.permute.xlu0 %4416 }
 0x8cc   :  { %v8118_v3 = vpop.xlane.xlu1 %3825 }
 0x8d0   :  { %v4391_v32 = vpop.permute.xlu1 %4390 }
 0x8d1   :  { %v4487_v22 = vsel %vm87_vm0, %v4391_v32, 0.0 }
 0x8d2   :  { %4488 = vadd.xlane.f32.xlu1 %v4487_v22  ;;  %v4445_v22 = vpop.permute.xlu0 %4444 }
 0x8d4   :  { %v4395_v31 = vpop.permute.xlu1 %4394 }
 0x8d5   :  { %v4493_v16 = vsel %vm87_vm0, %v4395_v31, 0.0 }
 0x8d6   :  { %4494 = vadd.xlane.f32.xlu0 %v4493_v16  ;;  %4497 = vadd.xlane.f32.xlu1 %v4496_v59  ;;  %v9266_v16 = vld [vmem:[#allocation16_spill] sm:$0xff] }
 0x8d7   :  { %v8325_v28 = vrot.slane %v8118_v3, %v9266_v16 }
 0x8d8   :  { %v4399_v41 = vpop.permute.xlu1 %4398 }
 0x8d9   :  { %v4499_v6 = vsel %vm87_vm0, %v4399_v41, 0.0  ;;  %v3832_v41 = vrot.slane %v8050_v0, %v9266_v16 }
 0x8da   :  { %4500 = vadd.xlane.f32.xlu0 %v4499_v6  ;;  %4533 = vadd.xlane.f32.xlu1 %v4532_v1  ;;  %v4526_v6 = vsel %vm87_vm0, %v4417_v2, 0.0  ;;  %v9268_v1 = vld [vmem:[#allocation90_spill] sm:$0xff] }
 0x8db   :  { %v9275_v2 = vld [vmem:[#allocation26_spill] sm:$0xff] }
 0x8dc   :  { %v4423_v11 = vpop.permute.xlu1 %4422 }
 0x8dd   :  { %v4535_v23 = vsel %vm87_vm0, %v4423_v11, 0.0 }
 0x8de   :  { %4536 = vadd.xlane.f32.xlu0 %v4535_v23  ;;  %4539 = vadd.xlane.f32.xlu1 %v4538_v29  ;;  %v3836_v23 = vrot.slane %v8050_v0, %v9267_v33  ;;  %v4449_v29 = vpop.permute.xlu0 %4448 }
 0x8e0   :  { %v4427_v9 = vpop.permute.xlu1 %4426 }
 0x8e1   :  { %v4541_v7 = vsel %vm87_vm0, %v4427_v9, 0.0  ;;  %v3910_v9 = vsub.f32 %v9268_v1, %v3832_v41 }
 0x8e2   :  { %4542 = vadd.xlane.f32.xlu0 %v4541_v7  ;;  %4503 = vadd.xlane.f32.xlu1 %v4502_v24  ;;  %v4568_v7 = vsel %vm87_vm0, %v4445_v22, 0.0 }
 0x8e4   :  { %v4403_v45 = vpop.permute.xlu1 %4402 }
 0x8e5   :  { %v4505_v12 = vsel %vm87_vm0, %v4403_v45, 0.0 }
 0x8e6   :  { %4506 = vadd.xlane.f32.xlu0 %v4505_v12  ;;  %4545 = vadd.xlane.f32.xlu1 %v4544_v30  ;;  %v9269_v12 = vld [vmem:[#allocation18_spill] sm:$0xff]  ;;  %v4574_v30 = vsel %vm87_vm0, %v4449_v29, 0.0 }
 0x8e7   :  { %v3840_v24 = vrot.slane %v8050_v0, %v9269_v12 }
 0x8e8   :  { %v4431_v35 = vpop.permute.xlu1 %4430 }
 0x8e9   :  { %v4547_v52 = vsel %vm87_vm0, %v4431_v35, 0.0  ;;  %v9270_v35 = vld [vmem:[#allocation114_spill] sm:$0xff] }
 0x8ea   :  { %4548 = vadd.xlane.f32.xlu0 %v4547_v52  ;;  %4509 = vadd.xlane.f32.xlu1 %v4508_v27  ;;  %v3912_v49 = vsub.f32 %v9270_v35, %v3836_v23  ;;  %v3943_v52 = vmul.f32 1.442695, %v3910_v9  ;;  %v3914_v27 = vsub.f32 %v9272_v56, %v3840_v24 }
 0x8ec   :  { %v4407_v10 = vpop.permute.xlu1 %4406  ;;  %5746 = vpow2.f32 %v3943_v52  ;;  %v3951_v36 = vmul.f32 1.442695, %v3914_v27 }
 0x8ed   :  { %v4511_v13 = vsel %vm87_vm0, %v4407_v10, 0.0  ;;  %v9271_v10 = vld [vmem:[#allocation111_spill] sm:$0xff] }
 0x8ee   :  { %4512 = vadd.xlane.f32.xlu0 %v4511_v13  ;;  %4551 = vadd.xlane.f32.xlu1 %v4550_v54  ;;  %v3909_v13 = vsub.f32 %v9271_v10, %v3832_v41 }
 0x8f0   :  { %v4435_v46 = vpop.permute.xlu1 %4434 }
 0x8f1   :  { %v4553_v53 = vsel %vm87_vm0, %v4435_v46, 0.0  ;;  %v3947_v46 = vmul.f32 1.442695, %v3912_v49 }
 0x8f2   :  { %4554 = vadd.xlane.f32.xlu0 %v4553_v53  ;;  %4515 = vadd.xlane.f32.xlu1 %v4514_v51  ;;  %v9273_v53 = vld [vmem:[#allocation112_spill] sm:$0xff] }
 0x8f3   :  { %v3911_v54 = vsub.f32 %v9273_v53, %v3836_v23  ;;  %5748 = vpow2.f32 %v3947_v46  ;;  %v9278_v23 = vld [vmem:[#allocation27_spill] sm:$0xff] }
 0x8f4   :  { %v4411_v8 = vpop.permute.xlu1 %4410  ;;  %v9282_v46 = vld [vmem:[#allocation35_spill] sm:$0xff] }
 0x8f5   :  { %v4517_v37 = vsel %vm87_vm0, %v4411_v8, 0.0  ;;  %v3941_v8 = vmul.f32 1.442695, %v3909_v13 }
 0x8f6   :  { %4518 = vadd.xlane.f32.xlu0 %v4517_v37  ;;  %4557 = vadd.xlane.f32.xlu1 %v4556_v43  ;;  %v9274_v37 = vld [vmem:[#allocation118_spill] sm:$0xff] }
 0x8f7   :  { %v3913_v51 = vsub.f32 %v9274_v37, %v3840_v24  ;;  %5750 = vpow2.f32 %v3941_v8  ;;  %v9283_v8 = vld [vmem:[#allocation55_spill] sm:$0xff]  ;;  %v9284_v37 = vld [vmem:[#allocation29_spill] sm:$0xff] }
 0x8f8   :  { %v4439_v47 = vpop.permute.xlu1 %4438  ;;  %5752 = vpow2.f32 %v3951_v36 }
 0x8f9   :  { %v4559_v55 = vsel %vm87_vm0, %v4439_v47, 0.0  ;;  %v3945_v47 = vmul.f32 1.442695, %v3911_v54  ;;  %v5747_v20 = vpop.eup %5746 }
 0x8fa   :  { %4560 = vadd.xlane.f32.xlu0 %v4559_v55  ;;  %4521 = vadd.xlane.f32.xlu1 %v4520_v19  ;;  %v3949_v55 = vmul.f32 1.442695, %v3913_v51 }
 0x8fb   :  { %5754 = vpow2.f32 %v3945_v47 }
 0x8fc   :  { %v4415_v39 = vpop.permute.xlu1 %4414  ;;  %5756 = vpow2.f32 %v3949_v55 }
 0x8fd   :  { %v4523_v38 = vsel %vm87_vm0, %v4415_v39, 0.0 }
 0x8fe   :  { %4524 = vadd.xlane.f32.xlu0 %v4523_v38  ;;  %4563 = vadd.xlane.f32.xlu1 %v4562_v21  ;;  %v4486_v38 = vpop.xlane.xlu0 %4485 }
 0x900   :  { %v4443_v63 = vpop.permute.xlu1 %4442  ;;  %v5749_v43 = vpop.eup %5748 }
 0x901   :  { %v4565_v32 = vsel %vm87_vm0, %v4443_v63, 0.0 }
 0x902   :  { %4566 = vadd.xlane.f32.xlu0 %v4565_v32  ;;  %4527 = vadd.xlane.f32.xlu1 %v4526_v6  ;;  %v8163_v32 = vadd.f32 %v4486_v38, %v9275_v2  ;;  %v4492_v21 = vpop.xlane.xlu0 %4491  ;;  %v9287_v2 = vld [vmem:[#allocation30_spill] sm:$0xff] }
 0x904   :  { %v4419_v31 = vpop.permute.xlu1 %4418  ;;  %v5751_v39 = vpop.eup %5750 }
 0x905   :  { %v4529_v34 = vsel %vm87_vm0, %v4419_v31, 0.0  ;;  %v5753_v19 = vpop.eup %5752 }
 0x906   :  { %4530 = vadd.xlane.f32.xlu0 %v4529_v34  ;;  %4569 = vadd.xlane.f32.xlu1 %v4568_v7  ;;  %v9276_v34 = vld [vmem:[#allocation48_spill] sm:$0xff] }
 0x907   :  { %v8167_v22 = vadd.f32 %v4492_v21, %v9276_v34 }
 0x908   :  { %v4447_v59 = vpop.permute.xlu1 %4446  ;;  %v5755_v63 = vpop.eup %5754 }
 0x909   :  { %v4571_v11 = vsel %vm87_vm0, %v4447_v59, 0.0  ;;  %v5757_v31 = vpop.eup %5756  ;;  %v9277_v59 = vld [vmem:[#allocation46_spill] sm:$0xff] }
 0x90a   :  { %4572 = vadd.xlane.f32.xlu0 %v4571_v11  ;;  %4575 = vadd.xlane.f32.xlu1 %v4574_v30  ;;  %v9281_v30 = vld [vmem:[#allocation34_spill] sm:$0xff] }
 0x90c   :  { %v4451_v62 = vpop.permute.xlu1 %4450 }
 0x90d   :  { %v4577_v45 = vsel %vm87_vm0, %v4451_v62, 0.0  ;;  %v9279_v62 = vld [vmem:[#allocation52_spill] sm:$0xff] }
 0x90e   :  { %4578 = vadd.xlane.f32.xlu0 %v4577_v45  ;;  %v9280_v45 = vld [vmem:[#allocation28_spill] sm:$0xff] }
 0x91b   :  { %4041 = vperm.xlu1 %5616, %v5747_v20   ;;  %v9285_v20 = vld [vmem:[#allocation36_spill] sm:$0xff] }
 0x91f   :  { %4047 = vperm.xlu1 %5616, %v5749_v43  }
 0x923   :  { %4053 = vperm.xlu1 %5616, %v5753_v19   ;;  %v9286_v19 = vld [vmem:[#allocation60_spill] sm:$0xff] }
 0x924   :  { %4038 = vperm.xlu0 %5617, %v5751_v39  }
 0x927   :  { %4645 = vperm.xlu1 %5616, %v8163_v32  }
 0x928   :  { %4044 = vperm.xlu0 %5617, %v5755_v63  }
 0x92b   :  { %4651 = vperm.xlu1 %5616, %v8167_v22  }
 0x92c   :  { %4050 = vperm.xlu0 %5617, %v5757_v31  }
 0x95b   :  { %v4489_v41 = vpop.xlane.xlu1 %4488 }
 0x95c   :  { %v8171_v11 = vadd.f32 %v4489_v41, %v9277_v59  ;;  %v9288_v41 = vld [vmem:[#allocation37_spill] sm:$0xff] }
 0x95e   :  { %4648 = vperm.xlu0 %5617, %v8171_v11  }
 0x95f   :  { %v4495_v6 = vpop.xlane.xlu0 %4494  ;;  %v4498_v9 = vpop.xlane.xlu1 %4497 }
 0x960   :  { %v8174_v1 = vadd.f32 %v4495_v6, %v9278_v23  ;;  %v8179_v29 = vadd.f32 %v4498_v9, %v9279_v62  ;;  %v9290_v9 = vld [vmem:[#allocation63_spill] sm:$0xff] }
 0x961   :  { %v9292_v62 = vld [vmem:[#allocation31_spill] sm:$0xff] }
 0x962   :  { %4654 = vperm.xlu1 %5616, %v8174_v1   ;;  %4657 = vperm.xlu0 %5617, %v8179_v29  }
 0x963   :  { %v4501_v7 = vpop.xlane.xlu0 %4500  ;;  %v4534_v35 = vpop.xlane.xlu1 %4533 }
 0x964   :  { %v8182_v24 = vadd.f32 %v4501_v7, %v9280_v45  ;;  %v8187_v52 = vadd.f32 %v4534_v35, %v9253_v50 }
 0x966   :  { %4660 = vperm.xlu1 %5616, %v8182_v24   ;;  %4693 = vperm.xlu0 %5617, %v8187_v52  }
 0x967   :  { %v4537_v49 = vpop.xlane.xlu0 %4536  ;;  %v4540_v13 = vpop.xlane.xlu1 %4539 }
 0x968   :  { %v8190_v10 = vadd.f32 %v4537_v49, %v9281_v30  ;;  %v8195_v27 = vadd.f32 %v4540_v13, %v9254_v61  ;;  %v9295_v30 = vld [vmem:[#allocation38_spill] sm:$0xff] }
 0x96a   :  { %4696 = vperm.xlu1 %5616, %v8190_v10   ;;  %4699 = vperm.xlu0 %5617, %v8195_v27  }
 0x96b   :  { %v4543_v56 = vpop.xlane.xlu0 %4542  ;;  %v4504_v50 = vpop.xlane.xlu1 %4503 }
 0x96c   :  { %v8198_v53 = vadd.f32 %v4543_v56, %v9282_v46  ;;  %v8203_v36 = vadd.f32 %v4504_v50, %v9283_v8  ;;  %v9297_v50 = vld [vmem:[#allocation68_spill] sm:$0xff] }
 0x96d   :  { %v9299_v8 = vld [vmem:[#allocation32_spill] sm:$0xff] }
 0x96e   :  { %4702 = vperm.xlu1 %5616, %v8198_v53   ;;  %4663 = vperm.xlu0 %5617, %v8203_v36  }
 0x96f   :  { %v4507_v54 = vpop.xlane.xlu0 %4506  ;;  %v4546_v61 = vpop.xlane.xlu1 %4545 }
 0x970   :  { %v8206_v51 = vadd.f32 %v4507_v54, %v9284_v37  ;;  %v8211_v55 = vadd.f32 %v4546_v61, %v9255_v17 }
 0x972   :  { %4666 = vperm.xlu1 %5616, %v8206_v51   ;;  %4705 = vperm.xlu0 %5617, %v8211_v55  }
 0x973   :  { %v4549_v47 = vpop.xlane.xlu0 %4548  ;;  %v4510_v39 = vpop.xlane.xlu1 %4509 }
 0x974   :  { %v8214_v43 = vadd.f32 %v4549_v47, %v9285_v20  ;;  %v8219_v63 = vadd.f32 %v4510_v39, %v9286_v19  ;;  %v9302_v20 = vld [vmem:[#allocation41_spill] sm:$0xff] }
 0x976   :  { %4708 = vperm.xlu1 %5616, %v8214_v43   ;;  %4669 = vperm.xlu0 %5617, %v8219_v63  }
 0x977   :  { %v4513_v38 = vpop.xlane.xlu0 %4512  ;;  %v4552_v17 = vpop.xlane.xlu1 %4551 }
 0x978   :  { %v8222_v21 = vadd.f32 %v4513_v38, %v9287_v2  ;;  %v8227_v34 = vadd.f32 %v4552_v17, %v9256_v48  ;;  %v9304_v2 = vld [vmem:[#allocation71_spill] sm:$0xff] }
 0x97a   :  { %4672 = vperm.xlu1 %5616, %v8222_v21   ;;  %4711 = vperm.xlu0 %5617, %v8227_v34  }
 0x97b   :  { %v4555_v31 = vpop.xlane.xlu0 %4554  ;;  %v4516_v59 = vpop.xlane.xlu1 %4515 }
 0x97c   :  { %v8230_v6 = vadd.f32 %v4555_v31, %v9288_v41  ;;  %v8235_v7 = vadd.f32 %v4516_v59, %v9290_v9  ;;  %v9306_v31 = vld [vmem:[#allocation33_spill] sm:$0xff]  ;;  %v9309_v9 = vld [vmem:[#allocation87_spill] sm:$0xff] }
 0x97e   :  { %9289 = vst [vmem:[#allocation119_spill] sm:$0xff] %v8230_v6  ;;  %4714 = vperm.xlu1 %5616, %v8230_v6   ;;  %9291 = vst [vmem:[#allocation121_spill] sm:$0xff] %v8235_v7  ;;  %4675 = vperm.xlu0 %5617, %v8235_v7  }
 0x97f   :  { %v4519_v23 = vpop.xlane.xlu0 %4518  ;;  %v4558_v48 = vpop.xlane.xlu1 %4557 }
 0x980   :  { %v8238_v45 = vadd.f32 %v4519_v23, %v9292_v62  ;;  %v8243_v49 = vadd.f32 %v4558_v48, %v9257_v14 }
 0x982   :  { %9293 = vst [vmem:[#allocation123_spill] sm:$0xff] %v8238_v45  ;;  %4678 = vperm.xlu1 %5616, %v8238_v45   ;;  %9294 = vst [vmem:[#allocation125_spill] sm:$0xff] %v8243_v49  ;;  %4717 = vperm.xlu0 %5617, %v8243_v49  }
 0x983   :  { %v4561_v35 = vpop.xlane.xlu0 %4560  ;;  %v4522_v56 = vpop.xlane.xlu1 %4521 }
 0x984   :  { %v8246_v13 = vadd.f32 %v4561_v35, %v9295_v30  ;;  %v8251_v54 = vadd.f32 %v4522_v56, %v9297_v50  ;;  %v9312_v56 = vld [vmem:[#allocation89_spill] sm:$0xff] }
 0x986   :  { %9296 = vst [vmem:[#allocation124_spill] sm:$0xff] %v8246_v13  ;;  %4720 = vperm.xlu1 %5616, %v8246_v13   ;;  %9298 = vst [vmem:[#allocation126_spill] sm:$0xff] %v8251_v54  ;;  %4681 = vperm.xlu0 %5617, %v8251_v54  }
 0x987   :  { %v4525_v46 = vpop.xlane.xlu0 %4524  ;;  %v4564_v14 = vpop.xlane.xlu1 %4563 }
 0x988   :  { %v8254_v37 = vadd.f32 %v4525_v46, %v9299_v8  ;;  %v8259_v47 = vadd.f32 %v4564_v14, %v9258_v4 }
 0x98a   :  { %9300 = vst [vmem:[#allocation127_spill] sm:$0xff] %v8254_v37  ;;  %4684 = vperm.xlu1 %5616, %v8254_v37   ;;  %9301 = vst [vmem:[#allocation128_spill] sm:$0xff] %v8259_v47  ;;  %4723 = vperm.xlu0 %5617, %v8259_v47  }
 0x98b   :  { %v4567_v61 = vpop.xlane.xlu0 %4566  ;;  %v4528_v38 = vpop.xlane.xlu1 %4527 }
 0x98c   :  { %v8262_v39 = vadd.f32 %v4567_v61, %v9302_v20  ;;  %v8267_v17 = vadd.f32 %v4528_v38, %v9304_v2 }
 0x98e   :  { %9303 = vst [vmem:[#allocation129_spill] sm:$0xff] %v8262_v39  ;;  %4726 = vperm.xlu1 %5616, %v8262_v39   ;;  %9305 = vst [vmem:[#allocation130_spill] sm:$0xff] %v8267_v17  ;;  %4687 = vperm.xlu0 %5617, %v8267_v17  }
 0x98f   :  { %v4531_v19 = vpop.xlane.xlu0 %4530  ;;  %v4570_v4 = vpop.xlane.xlu1 %4569 }
 0x990   :  { %v8270_v41 = vadd.f32 %v4531_v19, %v9306_v31  ;;  %v8275_v23 = vadd.f32 %v4570_v4, %v9260_v42 }
 0x992   :  { %9307 = vst [vmem:[#allocation131_spill] sm:$0xff] %v8270_v41  ;;  %4690 = vperm.xlu1 %5616, %v8270_v41   ;;  %9308 = vst [vmem:[#allocation132_spill] sm:$0xff] %v8275_v23  ;;  %4729 = vperm.xlu0 %5617, %v8275_v23  }
 0x993   :  { %v4573_v59 = vpop.xlane.xlu0 %4572  ;;  %v4576_v48 = vpop.xlane.xlu1 %4575 }
 0x994   :  { %v8278_v62 = vadd.f32 %v4573_v59, %v9309_v9  ;;  %v8283_v30 = vadd.f32 %v4576_v48, %v9262_v18 }
 0x996   :  { %9310 = vst [vmem:[#allocation15_spill] sm:$0xff] %v8278_v62  ;;  %4732 = vperm.xlu1 %5616, %v8278_v62   ;;  %9311 = vst [vmem:[#allocation133_spill] sm:$0xff] %v8283_v30  ;;  %4735 = vperm.xlu0 %5617, %v8283_v30  }
 0x997   :  { %v4579_v35 = vpop.xlane.xlu0 %4578  ;;  %v8290_v42 = vpop.permute.xlu1 %4041 }
 0x998   :  { %v8286_v46 = vadd.f32 %v4579_v35, %v9312_v56  ;;  %9314 = vst [vmem:[#allocation39_spill] sm:$0xff] %v8290_v42 }
 0x99a   :  { %9313 = vst [vmem:[#allocation50_spill] sm:$0xff] %v8286_v46  ;;  %4738 = vperm.xlu1 %5616, %v8286_v46  }
 0x99b   :  { %v8292_v50 = vpop.permute.xlu1 %4047 }
 0x99c   :  { %9315 = vst [vmem:[#allocation53_spill] sm:$0xff] %v8292_v50 }
 0x99f   :  { %v8294_v8 = vpop.permute.xlu0 %4038  ;;  %v8296_v14 = vpop.permute.xlu1 %4053 }
 0x9a0   :  { %9316 = vst [vmem:[#allocation40_spill] sm:$0xff] %v8294_v8  ;;  %9317 = vst [vmem:[#allocation56_spill] sm:$0xff] %v8296_v14 }
 0x9a3   :  { %v8298_v61 = vpop.permute.xlu0 %4044  ;;  %v4646_v20 = vpop.permute.xlu1 %4645 }
 0x9a4   :  { %9318 = vst [vmem:[#allocation42_spill] sm:$0xff] %v8298_v61  ;;  %v4743_v45 = vrot.slane %v4646_v20, %v7152_v25  ;;  %v8332_v20 = vrot.slane %v8118_v3, %v9267_v33 }
 0x9a7   :  { %v8300_v18 = vpop.permute.xlu0 %4050  ;;  %v4652_v38 = vpop.permute.xlu1 %4651 }
 0x9a8   :  { %9319 = vst [vmem:[#allocation58_spill] sm:$0xff] %v8300_v18  ;;  %v4752_v37 = vrot.slane %v4652_v38, %v7152_v25 }
 0x9d9   :  { %v4649_v19 = vpop.permute.xlu0 %4648 }
 0x9da   :  { %v4747_v54 = vrot.slane %v4649_v19, %v7155_v5 }
 0x9dd   :  { %v4655_v2 = vpop.permute.xlu1 %4654  ;;  %v4658_v31 = vpop.permute.xlu0 %4657 }
 0x9de   :  { %v4756_v17 = vrot.slane %v4655_v2, %v7155_v5  ;;  %v4761_v13 = vrot.slane %v4658_v31, %v7152_v25 }
 0x9e0   :  { %v4757_v7 = vsel %vm1508_vm3, %v4756_v17, %v4752_v37  ;;  %v4748_v37 = vsel %vm1508_vm3, %v4747_v54, %v4743_v45 }
 0x9e1   :  { %v4661_v4 = vpop.permute.xlu1 %4660  ;;  %v8302_v59 = vpop.permute.xlu0 %4693 }
 0x9e2   :  { %v4765_v40 = vrot.slane %v4661_v4, %v7155_v5 }
 0x9e4   :  { %v4766_v38 = vsel %vm1508_vm3, %v4765_v40, %v4761_v13 }
 0x9e5   :  { %v8304_v9 = vpop.permute.xlu1 %4696  ;;  %v4700_v48 = vpop.permute.xlu0 %4699 }
 0x9e6   :  { %v4819_v45 = vrot.slane %v8304_v9, %v7155_v5  ;;  %v4824_v54 = vrot.slane %v4700_v48, %v7152_v25 }
 0x9e9   :  { %v4703_v35 = vpop.permute.xlu1 %4702  ;;  %v4664_v56 = vpop.permute.xlu0 %4663 }
 0x9ea   :  { %v4770_v2 = vrot.slane %v4664_v56, %v7152_v25  ;;  %v4884_v56 = vsel %vm1645_vm4, %v4757_v7, %v4748_v37  ;;  %v4828_v40 = vrot.slane %v4703_v35, %v7155_v5 }
 0x9eb   :  { %v4885_v6 = vsel %vm1647_vm5, %v4766_v38, %v4884_v56 }
 0x9ed   :  { %v4667_v42 = vpop.permute.xlu1 %4666  ;;  %v4706_v8 = vpop.permute.xlu0 %4705 }
 0x9ee   :  { %v4774_v58 = vrot.slane %v4667_v42, %v7155_v5  ;;  %v4833_v48 = vrot.slane %v4706_v8, %v7152_v25 }
 0x9f0   :  { %v4775_v17 = vsel %vm1508_vm3, %v4774_v58, %v4770_v2 }
 0x9f1   :  { %v4709_v14 = vpop.permute.xlu1 %4708  ;;  %v4670_v50 = vpop.permute.xlu0 %4669  ;;  %v4886_v7 = vsel %vm1649_vm6, %v4775_v17, %v4885_v6 }
 0x9f2   :  { %v4779_v42 = vrot.slane %v4670_v50, %v7152_v25 }
 0x9f5   :  { %v4673_v61 = vpop.permute.xlu1 %4672  ;;  %v8306_v46 = vpop.permute.xlu0 %4711 }
 0x9f6   :  { %v4783_v49 = vrot.slane %v4673_v61, %v7155_v5 }
 0x9f8   :  { %v4784_v13 = vsel %vm1508_vm3, %v4783_v49, %v4779_v42  ;;  %v4842_v42 = vrot.slane %v8306_v46, %v7152_v25 }
 0x9f9   :  { %v4715_v18 = vpop.permute.xlu1 %4714  ;;  %v4676_v30 = vpop.permute.xlu0 %4675  ;;  %v4887_v2 = vsel %vm1651_vm7, %v4784_v13, %v4886_v7 }
 0x9fd   :  { %v4679_v62 = vpop.permute.xlu1 %4678  ;;  %v8308_v23 = vpop.permute.xlu0 %4717 }
 0x9fe   :  { %v4792_v4 = vrot.slane %v4679_v62, %v7155_v5  ;;  %v4788_v62 = vrot.slane %v4676_v30, %v7152_v25  ;;  %v4837_v30 = vrot.slane %v4709_v14, %v7155_v5  ;;  %v4851_v8 = vrot.slane %v8308_v23, %v7152_v25 }
 0xa00   :  { %v4793_v58 = vsel %vm1508_vm3, %v4792_v4, %v4788_v62  ;;  %v4829_v4 = vsel %vm1508_vm3, %v4828_v40, %v4824_v54  ;;  %v4838_v62 = vsel %vm1508_vm3, %v4837_v30, %v4833_v48 }
 0xa01   :  { %v8310_v41 = vpop.permute.xlu1 %4720  ;;  %v4682_v39 = vpop.permute.xlu0 %4681  ;;  %v4888_v14 = vsel %vm1653_vm8, %v4793_v58, %v4887_v2 }
 0xa02   :  { %v4797_v50 = vrot.slane %v4682_v39, %v7152_v25  ;;  %v4855_v6 = vrot.slane %v8310_v41, %v7155_v5 }
 0xa04   :  { %v4856_v58 = vsel %vm1508_vm3, %v4855_v6, %v4851_v8 }
 0xa05   :  { %v4685_v47 = vpop.permute.xlu1 %4684  ;;  %v4724_v19 = vpop.permute.xlu0 %4723 }
 0xa06   :  { %v4801_v31 = vrot.slane %v4685_v47, %v7155_v5  ;;  %v4815_v47 = vrot.slane %v8302_v59, %v7152_v25  ;;  %v4846_v59 = vrot.slane %v4715_v18, %v7155_v5  ;;  %v4860_v46 = vrot.slane %v4724_v19, %v7152_v25 }
 0xa08   :  { %v4802_v49 = vsel %vm1508_vm3, %v4801_v31, %v4797_v50  ;;  %v4820_v17 = vsel %vm1508_vm3, %v4819_v45, %v4815_v47  ;;  %v4847_v13 = vsel %vm1508_vm3, %v4846_v59, %v4842_v42  ;;  %v3925_v47 = vsub.f32 %v7985_v60, %v8325_v28 }
 0xa09   :  { %v4727_v61 = vpop.permute.xlu1 %4726  ;;  %v4688_v35 = vpop.permute.xlu0 %4687  ;;  %v4889_v37 = vsel %vm1655_vm9, %v4802_v49, %v4888_v14  ;;  %v4891_v45 = vsel %vm1645_vm4, %v4829_v4, %v4820_v17 }
 0xa0a   :  { %v4806_v38 = vrot.slane %v4688_v35, %v7152_v25  ;;  %v4864_v31 = vrot.slane %v4727_v61, %v7155_v5  ;;  %v4892_v54 = vsel %vm1647_vm5, %v4838_v62, %v4891_v45  ;;  %v3973_v4 = vmul.f32 1.442695, %v3925_v47 }
 0xa0b   :  { %v4893_v19 = vsel %vm1649_vm6, %v4847_v13, %v4892_v54 }
 0xa0c   :  { %v4865_v7 = vsel %vm1508_vm3, %v4864_v31, %v4860_v46  ;;  %v4894_v2 = vsel %vm1651_vm7, %v4856_v58, %v4893_v19  ;;  %5758 = vpow2.f32 %v3973_v4 }
 0xa0d   :  { %v4691_v39 = vpop.permute.xlu1 %4690  ;;  %v4730_v56 = vpop.permute.xlu0 %4729  ;;  %v4895_v48 = vsel %vm1653_vm8, %v4865_v7, %v4894_v2  ;;  %v9323_v7 = vld [vmem:[#allocation91_spill] sm:$0xff]  ;;  %v9325_v2 = vld [vmem:[#allocation101_spill] sm:$0xff] }
 0xa0e   :  { %v4810_v9 = vrot.slane %v4691_v39, %v7155_v5  ;;  %v4869_v23 = vrot.slane %v4730_v56, %v7152_v25  ;;  %v9320_v39 = vld [vmem:[#allocation99_spill] sm:$0xff] }
 0xa0f   :  { %v3926_v60 = vsub.f32 %v9320_v39, %v8325_v28  ;;  %v9321_v28 = vld [vmem:[#allocation100_spill] sm:$0xff] }
 0xa10   :  { %v4811_v18 = vsel %vm1508_vm3, %v4810_v9, %v4806_v38  ;;  %v3927_v9 = vsub.f32 %v7989_v26, %v8332_v20  ;;  %v3928_v31 = vsub.f32 %v9321_v28, %v8332_v20 }
 0xa11   :  { %v4733_v41 = vpop.permute.xlu1 %4732  ;;  %v4890_v40 = vsel %vm1657_vm10, %v4811_v18, %v4889_v37  ;;  %v4736_v30 = vpop.permute.xlu0 %4735  ;;  %v3975_v18 = vmul.f32 1.442695, %v3926_v60 }
 0xa12   :  { %v4873_v61 = vrot.slane %v4733_v41, %v7155_v5  ;;  %v4900_v50 = vsel %vm1668_vm11, %v4890_v40, -inf  ;;  %v4878_v59 = vrot.slane %v4736_v30, %v7152_v25  ;;  %v3977_v17 = vmul.f32 1.442695, %v3927_v9 }
 0xa13   :  { %4901 = vmax.xlane.f32.xlu0 %v4900_v50  ;;  %5760 = vpow2.f32 %v3975_v18  ;;  %v3979_v26 = vmul.f32 1.442695, %v3928_v31  ;;  %v9322_v50 = vld [vmem:[#allocation19_spill] sm:$0xff]  ;;  %v3872_v30 = vrot.slane %v8118_v3, %v9269_v12 }
 0xa14   :  { %v4874_v49 = vsel %vm1508_vm3, %v4873_v61, %v4869_v23  ;;  %5762 = vpow2.f32 %v3977_v17  ;;  %v3844_v47 = vrot.slane %v8050_v0, %v9322_v50 }
 0xa15   :  { %v4739_v35 = vpop.permute.xlu1 %4738  ;;  %v4896_v14 = vsel %vm1655_vm9, %v4874_v49, %v4895_v48  ;;  %5764 = vpow2.f32 %v3979_v26  ;;  %v3929_v60 = vsub.f32 %v7993_v15, %v3872_v30 }
 0xa16   :  { %v4882_v38 = vrot.slane %v4739_v35, %v7155_v5  ;;  %v3915_v19 = vsub.f32 %v9323_v7, %v3844_v47  ;;  %v9324_v35 = vld [vmem:[#allocation116_spill] sm:$0xff] }
 0xa17   :  { %v3981_v9 = vmul.f32 1.442695, %v3929_v60 }
 0xa18   :  { %v4883_v6 = vsel %vm1508_vm3, %v4882_v38, %v4878_v59  ;;  %v3953_v39 = vmul.f32 1.442695, %v3915_v19  ;;  %v3930_v59 = vsub.f32 %v9325_v2, %v3872_v30 }
 0xa19   :  { %v4897_v42 = vsel %vm1657_vm10, %v4883_v6, %v4896_v14  ;;  %v5759_v62 = vpop.eup %5758 }
 0xa1a   :  { %v4903_v37 = vsel %vm1668_vm11, %v4897_v42, -inf  ;;  %v3983_v6 = vmul.f32 1.442695, %v3930_v59 }
 0xa1b   :  { %4904 = vmax.xlane.f32.xlu1 %v4903_v37 }
 0xa20   :  { %v5761_v8 = vpop.eup %5760 }
 0xa21   :  { %v5763_v56 = vpop.eup %5762 }
 0xa22   :  { %v5765_v41 = vpop.eup %5764 }
 0xa29   :  { %4086 = vperm.xlu0 %5617, %v5759_v62  }
 0xa2c   :  { %4089 = vperm.xlu1 %5616, %v5761_v8  }
 0xa2d   :  { %4092 = vperm.xlu0 %5617, %v5763_v56  }
 0xa30   :  { %4095 = vperm.xlu1 %5616, %v5765_v41  }
 0xa9c   :  { %v8397_v40 = vpop.xlane.xlu0 %4901 }
 0xa9d   :  { %v4911_v20 = vrot.slane %v8397_v40, %v9266_v16  ;;  %v4915_v13 = vrot.slane %v8397_v40, %v9267_v33  ;;  %v4923_v30 = vrot.slane %v8397_v40, %v9322_v50 }
 0xa9f   :  { %v4988_v46 = vsub.f32 %v8163_v32, %v4911_v20  ;;  %v4989_v61 = vsub.f32 %v8171_v11, %v4911_v20  ;;  %v4990_v45 = vsub.f32 %v8167_v22, %v4915_v13  ;;  %v4991_v58 = vsub.f32 %v8174_v1, %v4915_v13 }
 0xaa0   :  { %v3916_v32 = vsub.f32 %v9324_v35, %v3844_v47  ;;  %v4919_v22 = vrot.slane %v8397_v40, %v9269_v12  ;;  %v3876_v47 = vrot.slane %v8118_v3, %v9322_v50  ;;  %v4995_v59 = vsub.f32 %v8206_v51, %v4923_v30 }
 0xaa1   :  { %v5020_v23 = vmul.f32 1.442695, %v4988_v46  ;;  %v5022_v54 = vmul.f32 1.442695, %v4989_v61  ;;  %v5024_v49 = vmul.f32 1.442695, %v4990_v45 }
 0xaa2   :  { %v5026_v11 = vmul.f32 1.442695, %v4991_v58  ;;  %v3955_v1 = vmul.f32 1.442695, %v3916_v32  ;;  %v4992_v4 = vsub.f32 %v8179_v29, %v4919_v22  ;;  %v4993_v15 = vsub.f32 %v8182_v24, %v4919_v22  ;;  %v9327_v46 = vld [vmem:[#allocation120_spill] sm:$0xff]  ;;  %v9328_v58 = vld [vmem:[#allocation95_spill] sm:$0xff] }
 0xaa3   :  { %5766 = vpow2.f32 %v5020_v23  ;;  %v3931_v19 = vsub.f32 %v7997_v57, %v3876_v47  ;;  %v9329_v32 = vld [vmem:[#allocation102_spill] sm:$0xff]  ;;  %v4994_v22 = vsub.f32 %v8203_v36, %v4923_v30  ;;  %v5034_v36 = vmul.f32 1.442695, %v4995_v59 }
 0xaa4   :  { %5768 = vpow2.f32 %v5022_v54  ;;  %v8417_v38 = vpop.xlane.xlu1 %4904  ;;  %v5028_v14 = vmul.f32 1.442695, %v4992_v4  ;;  %v5030_v18 = vmul.f32 1.442695, %v4993_v15  ;;  %v4087_v37 = vpop.permute.xlu0 %4086  ;;  %v9330_v4 = vld [vmem:[#allocation21_spill] sm:$0xff]  ;;  %v9336_v30 = vld [vmem:[#allocation122_spill] sm:$0xff] }
 0xaa5   :  { %5770 = vpow2.f32 %v5024_v49  ;;  %v4943_v48 = vrot.slane %v8417_v38, %v9266_v16  ;;  %v4947_v42 = vrot.slane %v8417_v38, %v9267_v33  ;;  %v9326_v16 = vld [vmem:[#allocation20_spill] sm:$0xff]  ;;  %v4208_v24 = vrot.slane %v4087_v37, %v7152_v25 }
 0xaa6   :  { %5772 = vpow2.f32 %v5026_v11  ;;  %v3848_v62 = vrot.slane %v8050_v0, %v9326_v16  ;;  %v3932_v11 = vsub.f32 %v9329_v32, %v3876_v47  ;;  %v3985_v60 = vmul.f32 1.442695, %v3931_v19 }
 0xaa7   :  { %5774 = vpow2.f32 %v3953_v39  ;;  %v5004_v28 = vsub.f32 %v8187_v52, %v4943_v48  ;;  %v5005_v29 = vsub.f32 %v8190_v10, %v4943_v48  ;;  %v5006_v33 = vsub.f32 %v8195_v27, %v4947_v42 }
 0xaa8   :  { %5776 = vpow2.f32 %v3955_v1  ;;  %v4090_v26 = vpop.permute.xlu1 %4089  ;;  %v5007_v56 = vsub.f32 %v8198_v53, %v4947_v42  ;;  %v3917_v61 = vsub.f32 %v9327_v46, %v3848_v62  ;;  %v3918_v23 = vsub.f32 %v9328_v58, %v3848_v62 }
 0xaa9   :  { %5778 = vpow2.f32 %v3981_v9  ;;  %v5052_v8 = vmul.f32 1.442695, %v5004_v28  ;;  %v5054_v41 = vmul.f32 1.442695, %v5005_v29  ;;  %v4212_v10 = vrot.slane %v4090_v26, %v7155_v5  ;;  %v9331_v28 = vld [vmem:[#allocation92_spill] sm:$0xff] }
 0xaaa   :  { %5780 = vpow2.f32 %v3983_v6  ;;  %v5056_v27 = vmul.f32 1.442695, %v5006_v33  ;;  %v5058_v53 = vmul.f32 1.442695, %v5007_v56  ;;  %v3957_v7 = vmul.f32 1.442695, %v3917_v61 }
 0xaab   :  { %5782 = vpow2.f32 %v5028_v14  ;;  %v8434_v13 = vsel %vm1508_vm3, %v4212_v10, %v4208_v24  ;;  %v3959_v35 = vmul.f32 1.442695, %v3918_v23  ;;  %v4951_v1 = vrot.slane %v8417_v38, %v9269_v12  ;;  %v9332_v29 = vld [vmem:[#allocation96_spill] sm:$0xff] }
 0xaac   :  { %5784 = vpow2.f32 %v5030_v18  ;;  %v3987_v2 = vmul.f32 1.442695, %v3932_v11  ;;  %v3852_v48 = vrot.slane %v8050_v0, %v9330_v4  ;;  %v5032_v6 = vmul.f32 1.442695, %v4994_v22  ;;  %v9337_v11 = vld [vmem:[#allocation97_spill] sm:$0xff] }
 0xaad   :  { %5786 = vpow2.f32 %v5052_v8  ;;  %v5008_v15 = vsub.f32 %v8211_v55, %v4951_v1  ;;  %v5009_v12 = vsub.f32 %v8214_v43, %v4951_v1  ;;  %v4927_v24 = vrot.slane %v8397_v40, %v9326_v16  ;;  %v9338_v1 = vld [vmem:[#allocation113_spill] sm:$0xff] }
 0xaae   :  { %5788 = vpow2.f32 %v5054_v41  ;;  %v3919_v51 = vsub.f32 %v9331_v28, %v3852_v48  ;;  %v4955_v46 = vrot.slane %v8417_v38, %v9322_v50 }
 0xaaf   :  { %5790 = vpow2.f32 %v5056_v27  ;;  %v5060_v18 = vmul.f32 1.442695, %v5008_v15  ;;  %v5062_v55 = vmul.f32 1.442695, %v5009_v12  ;;  %v4997_v47 = vsub.f32 %v8222_v21, %v4927_v24 }
 0xab0   :  { %v5767_v31 = vpop.eup %5766  ;;  %5792 = vpow2.f32 %v5058_v53  ;;  %v3961_v62 = vmul.f32 1.442695, %v3919_v51  ;;  %v5010_v53 = vsub.f32 %v8227_v34, %v4955_v46 }
 0xab1   :  { %v5769_v17 = vpop.eup %5768  ;;  %5117 = vperm.xlu0 %5617, %v5767_v31   ;;  %5794 = vpow2.f32 %v3957_v7  ;;  %v3880_v31 = vrot.slane %v8118_v3, %v9326_v16  ;;  %v9335_v7 = vld [vmem:[#allocation119_spill] sm:$0xff] }
 0xab2   :  { %5120 = vperm.xlu1 %5616, %v5769_v17   ;;  %v5771_v52 = vpop.eup %5770  ;;  %5796 = vpow2.f32 %v3959_v35  ;;  %v3920_v17 = vsub.f32 %v9332_v29, %v3852_v48  ;;  %v5011_v50 = vsub.f32 %v9335_v7, %v4955_v46  ;;  %v5064_v35 = vmul.f32 1.442695, %v5010_v53  ;;  %v9339_v48 = vld [vmem:[#allocation105_spill] sm:$0xff]  ;;  %v9342_v29 = vld [vmem:[#allocation23_spill] sm:$0xff] }
 0xab3   :  { %v5773_v20 = vpop.eup %5772  ;;  %5798 = vpow2.f32 %v3985_v60  ;;  %v3933_v43 = vsub.f32 %v8001_v44, %v3880_v31 }
 0xab4   :  { %v5775_v45 = vpop.eup %5774  ;;  %5800 = vpow2.f32 %v3987_v2  ;;  %v3963_v8 = vmul.f32 1.442695, %v3920_v17  ;;  %v5066_v34 = vmul.f32 1.442695, %v5011_v50  ;;  %v4931_v2 = vrot.slane %v8397_v40, %v9330_v4 }
 0xab5   :  { %5123 = vperm.xlu0 %5617, %v5771_v52   ;;  %v5777_v54 = vpop.eup %5776  ;;  %5802 = vpow2.f32 %v5032_v6  ;;  %v9333_v52 = vld [vmem:[#allocation103_spill] sm:$0xff]  ;;  %v3989_v10 = vmul.f32 1.442695, %v3933_v43  ;;  %v3860_v17 = vrot.slane %v8050_v0, %v9342_v29 }
 0xab6   :  { %5126 = vperm.xlu1 %5616, %v5773_v20   ;;  %v5779_v49 = vpop.eup %5778  ;;  %5804 = vpow2.f32 %v5034_v36  ;;  %v3934_v56 = vsub.f32 %v9333_v52, %v3880_v31  ;;  %v4996_v20 = vsub.f32 %v8219_v63, %v4927_v24  ;;  %v5038_v63 = vmul.f32 1.442695, %v4997_v47  ;;  %v9340_v36 = vld [vmem:[#allocation121_spill] sm:$0xff]  ;;  %v9341_v31 = vld [vmem:[#allocation123_spill] sm:$0xff]  ;;  %v9345_v52 = vld [vmem:[#allocation94_spill] sm:$0xff] }
 0xab7   :  { %v5781_v39 = vpop.eup %5780  ;;  %5806 = vpow2.f32 %v5060_v18  ;;  %v4998_v12 = vsub.f32 %v9340_v36, %v4931_v2  ;;  %v4999_v18 = vsub.f32 %v9341_v31, %v4931_v2 }
 0xab8   :  { %v5783_v57 = vpop.eup %5782  ;;  %5808 = vpow2.f32 %v5062_v55  ;;  %v3991_v61 = vmul.f32 1.442695, %v3934_v56  ;;  %v5036_v23 = vmul.f32 1.442695, %v4996_v20  ;;  %v3923_v56 = vsub.f32 %v9345_v52, %v3860_v17  ;;  %v9346_v20 = vld [vmem:[#allocation98_spill] sm:$0xff] }
 0xab9   :  { %4056 = vperm.xlu0 %5617, %v5775_v45   ;;  %v5785_v9 = vpop.eup %5784  ;;  %5810 = vpow2.f32 %v3961_v62  ;;  %v9334_v45 = vld [vmem:[#allocation22_spill] sm:$0xff]  ;;  %v5040_v55 = vmul.f32 1.442695, %v4998_v12  ;;  %v5042_v24 = vmul.f32 1.442695, %v4999_v18  ;;  %v3924_v46 = vsub.f32 %v9346_v20, %v3860_v17 }
 0xaba   :  { %4059 = vperm.xlu1 %5616, %v5777_v54   ;;  %v5787_v14 = vpop.eup %5786  ;;  %5812 = vpow2.f32 %v3963_v8  ;;  %v3856_v58 = vrot.slane %v8050_v0, %v9334_v45  ;;  %v3969_v47 = vmul.f32 1.442695, %v3923_v56  ;;  %v9354_v12 = vld [vmem:[#allocation110_spill] sm:$0xff]  ;;  %v4967_v17 = vrot.slane %v8417_v38, %v9334_v45 }
 0xabb   :  { %v5789_v42 = vpop.eup %5788  ;;  %5814 = vpow2.f32 %v3989_v10  ;;  %v9355_v18 = vld [vmem:[#allocation130_spill] sm:$0xff] }
 0xabc   :  { %v5791_v37 = vpop.eup %5790  ;;  %5816 = vpow2.f32 %v3991_v61  ;;  %v3921_v21 = vsub.f32 %v9336_v30, %v3856_v58  ;;  %v9349_v30 = vld [vmem:[#allocation126_spill] sm:$0xff] }
 0xabd   :  { %4098 = vperm.xlu0 %5617, %v5779_v49   ;;  %v5793_v26 = vpop.eup %5792  ;;  %v3884_v49 = vrot.slane %v8118_v3, %v9330_v4  ;;  %5818 = vpow2.f32 %v5036_v23  ;;  %v4935_v23 = vrot.slane %v8397_v40, %v9334_v45 }
 0xabe   :  { %4101 = vperm.xlu1 %5616, %v5781_v39   ;;  %v5795_v33 = vpop.eup %5794  ;;  %v3922_v39 = vsub.f32 %v9337_v11, %v3856_v58  ;;  %5820 = vpow2.f32 %v5038_v63  ;;  %v3965_v22 = vmul.f32 1.442695, %v3921_v21  ;;  %v9348_v63 = vld [vmem:[#allocation107_spill] sm:$0xff] }
 0xabf   :  { %v5797_v41 = vpop.eup %5796  ;;  %5822 = vpow2.f32 %v5064_v35  ;;  %v3936_v6 = vsub.f32 %v9339_v48, %v3884_v49  ;;  %v5000_v21 = vsub.f32 %v9349_v30, %v4935_v23  ;;  %v9350_v11 = vld [vmem:[#allocation127_spill] sm:$0xff] }
 0xac0   :  { %v5799_v44 = vpop.eup %5798  ;;  %5824 = vpow2.f32 %v5066_v34 }
 0xac1   :  { %5129 = vperm.xlu0 %5617, %v5783_v57   ;;  %v5801_v27 = vpop.eup %5800  ;;  %v3935_v57 = vsub.f32 %v9338_v1, %v3884_v49  ;;  %5826 = vpow2.f32 %v3965_v22  ;;  %v3995_v51 = vmul.f32 1.442695, %v3936_v6  ;;  %v4963_v49 = vrot.slane %v8417_v38, %v9330_v4  ;;  %v9351_v1 = vld [vmem:[#allocation128_spill] sm:$0xff]  ;;  %v9353_v6 = vld [vmem:[#allocation117_spill] sm:$0xff] }
 0xac2   :  { %5132 = vperm.xlu1 %5616, %v5785_v9   ;;  %v5803_v54 = vpop.eup %5802  ;;  %v3967_v9 = vmul.f32 1.442695, %v3922_v39  ;;  %v5001_v39 = vsub.f32 %v9350_v11, %v4935_v23  ;;  %v5044_v22 = vmul.f32 1.442695, %v5000_v21  ;;  %v4093_v11 = vpop.permute.xlu0 %4092 }
 0xac3   :  { %v5805_v19 = vpop.eup %5804 }
 0xac4   :  { %v5807_v32 = vpop.eup %5806  ;;  %5828 = vpow2.f32 %v3967_v9  ;;  %v9352_v9 = vld [vmem:[#allocation129_spill] sm:$0xff] }
 0xac5   :  { %5165 = vperm.xlu0 %5617, %v5787_v14   ;;  %v5809_v60 = vpop.eup %5808  ;;  %v3993_v14 = vmul.f32 1.442695, %v3935_v57  ;;  %v5014_v57 = vsub.f32 %v9351_v1, %v4963_v49  ;;  %v5015_v4 = vsub.f32 %v9352_v9, %v4963_v49 }
 0xac6   :  { %5168 = vperm.xlu1 %5616, %v5789_v42   ;;  %v5811_v59 = vpop.eup %5810  ;;  %v4959_v42 = vrot.slane %v8417_v38, %v9326_v16 }
 0xac7   :  { %v5813_v15 = vpop.eup %5812  ;;  %5830 = vpow2.f32 %v3993_v14  ;;  %v4939_v14 = vrot.slane %v8397_v40, %v9342_v29  ;;  %v5072_v36 = vmul.f32 1.442695, %v5014_v57  ;;  %v9356_v40 = vld [vmem:[#allocation131_spill] sm:$0xff] }
 0xac8   :  { %v5815_v28 = vpop.eup %5814  ;;  %5832 = vpow2.f32 %v3995_v51 }
 0xac9   :  { %5171 = vperm.xlu0 %5617, %v5791_v37   ;;  %v5817_v37 = vpop.eup %5816  ;;  %5834 = vpow2.f32 %v5040_v55 }
 0xaca   :  { %5174 = vperm.xlu1 %5616, %v5793_v26   ;;  %v9343_v26 = vld [vmem:[#allocation125_spill] sm:$0xff]  ;;  %v5819_v43 = vpop.eup %5818  ;;  %5836 = vpow2.f32 %v5042_v24 }
 0xacb   :  { %v5012_v62 = vsub.f32 %v9343_v26, %v4959_v42  ;;  %v5821_v8 = vpop.eup %5820 }
 0xacc   :  { %v5823_v0 = vpop.eup %5822 }
 0xacd   :  { %4062 = vperm.xlu0 %5617, %v5795_v33   ;;  %v9344_v33 = vld [vmem:[#allocation124_spill] sm:$0xff]  ;;  %v5068_v10 = vmul.f32 1.442695, %v5012_v62  ;;  %v5825_v61 = vpop.eup %5824  ;;  %v5003_v62 = vsub.f32 %v9356_v40, %v4939_v14 }
 0xace   :  { %4065 = vperm.xlu1 %5616, %v5797_v41   ;;  %v5013_v16 = vsub.f32 %v9344_v33, %v4959_v42  ;;  %v3888_v41 = vrot.slane %v8118_v3, %v9334_v45  ;;  %v5827_v53 = vpop.eup %5826  ;;  %v4971_v33 = vrot.slane %v8417_v38, %v9342_v29  ;;  %v9358_v45 = vld [vmem:[#allocation15_spill] sm:$0xff] }
 0xacf   :  { %5838 = vpow2.f32 %v5068_v10  ;;  %v5050_v56 = vmul.f32 1.442695, %v5003_v62 }
 0xad0   :  { %v3938_v7 = vsub.f32 %v9348_v63, %v3888_v41 }
 0xad1   :  { %4104 = vperm.xlu0 %5617, %v5799_v44   ;;  %v5070_v44 = vmul.f32 1.442695, %v5013_v16  ;;  %v5829_v50 = vpop.eup %5828  ;;  %v9357_v16 = vld [vmem:[#allocation132_spill] sm:$0xff] }
 0xad2   :  { %4107 = vperm.xlu1 %5616, %v5801_v27   ;;  %v9347_v27 = vld [vmem:[#allocation115_spill] sm:$0xff] }
 0xad3   :  { %v3937_v58 = vsub.f32 %v9347_v27, %v3888_v41  ;;  %5840 = vpow2.f32 %v5070_v44  ;;  %v5017_v41 = vsub.f32 %v9358_v45, %v4967_v17 }
 0xad4   :  { %5842 = vpow2.f32 %v3969_v47  ;;  %v5831_v35 = vpop.eup %5830 }
 0xad5   :  { %5135 = vperm.xlu0 %5617, %v5803_v54   ;;  %v3971_v54 = vmul.f32 1.442695, %v3924_v46  ;;  %v5833_v34 = vpop.eup %5832  ;;  %v5078_v27 = vmul.f32 1.442695, %v5017_v41 }
 0xad6   :  { %5138 = vperm.xlu1 %5616, %v5805_v19   ;;  %v3997_v19 = vmul.f32 1.442695, %v3937_v58  ;;  %v5835_v2 = vpop.eup %5834 }
 0xad7   :  { %5844 = vpow2.f32 %v3971_v54  ;;  %v5837_v48 = vpop.eup %5836 }
 0xad8   :  { %5846 = vpow2.f32 %v3997_v19 }
 0xad9   :  { %5177 = vperm.xlu0 %5617, %v5807_v32   ;;  %v3999_v32 = vmul.f32 1.442695, %v3938_v7 }
 0xada   :  { %5180 = vperm.xlu1 %5616, %v5809_v60   ;;  %v3892_v60 = vrot.slane %v8118_v3, %v9342_v29 }
 0xadb   :  { %5848 = vpow2.f32 %v3999_v32  ;;  %v9362_v32 = vld [vmem:[#allocation25_spill] sm:$0xff] }
 0xadc   :  { %5850 = vpow2.f32 %v5044_v22  ;;  %v5839_v3 = vpop.eup %5838  ;;  %v3940_v42 = vsub.f32 %v9354_v12, %v3892_v60 }
 0xadd   :  { %4068 = vperm.xlu0 %5617, %v5811_v59   ;;  %v5046_v59 = vmul.f32 1.442695, %v5001_v39  ;;  %v4096_v39 = vpop.permute.xlu1 %4095 }
 0xade   :  { %4071 = vperm.xlu1 %5616, %v5813_v15   ;;  %v3939_v15 = vsub.f32 %v9353_v6, %v3892_v60  ;;  %v4003_v26 = vmul.f32 1.442695, %v3940_v42  ;;  %v4217_v42 = vrot.slane %v4093_v11, %v7152_v25 }
 0xadf   :  { %5852 = vpow2.f32 %v5046_v59 }
 0xae0   :  { %v5841_v51 = vpop.eup %5840  ;;  %v4001_v31 = vmul.f32 1.442695, %v3939_v15  ;;  %5854 = vpow2.f32 %v5072_v36  ;;  %v4221_v15 = vrot.slane %v4096_v39, %v7155_v5 }
 0xae1   :  { %4110 = vperm.xlu0 %5617, %v5815_v28   ;;  %v5074_v28 = vmul.f32 1.442695, %v5015_v4  ;;  %v5843_v55 = vpop.eup %5842 }
 0xae2   :  { %4113 = vperm.xlu1 %5616, %v5817_v37   ;;  %v5002_v37 = vsub.f32 %v9355_v18, %v4939_v14 }
 0xae3   :  { %5856 = vpow2.f32 %v5074_v28 }
 0xae4   :  { %5858 = vpow2.f32 %v4001_v31  ;;  %v5048_v24 = vmul.f32 1.442695, %v5002_v37  ;;  %v4222_v31 = vsel %vm1508_vm3, %v4221_v15, %v4217_v42  ;;  %v9367_v15 = vld [vmem:[#allocation56_spill] sm:$0xff] }
 0xae5   :  { %5141 = vperm.xlu0 %5617, %v5819_v43   ;;  %v5845_v43 = vpop.eup %5844  ;;  %5860 = vpow2.f32 %v4003_v26 }
 0xae6   :  { %5144 = vperm.xlu1 %5616, %v5821_v8   ;;  %v5016_v8 = vsub.f32 %v9357_v16, %v4967_v17  ;;  %v5847_v52 = vpop.eup %5846  ;;  %5862 = vpow2.f32 %v5048_v24 }
 0xae7   :  { %5864 = vpow2.f32 %v5050_v56 }
 0xae8   :  { %v5849_v10 = vpop.eup %5848  ;;  %v5076_v46 = vmul.f32 1.442695, %v5016_v8 }
 0xae9   :  { %5183 = vperm.xlu0 %5617, %v5823_v0   ;;  %v9359_v0 = vld [vmem:[#allocation133_spill] sm:$0xff]  ;;  %v5851_v44 = vpop.eup %5850 }
 0xaea   :  { %5186 = vperm.xlu1 %5616, %v5825_v61   ;;  %v5018_v20 = vsub.f32 %v9359_v0, %v4971_v33  ;;  %v9360_v61 = vld [vmem:[#allocation50_spill] sm:$0xff]  ;;  %5866 = vpow2.f32 %v5076_v46 }
 0xaeb   :  { %v5019_v47 = vsub.f32 %v9360_v61, %v4971_v33  ;;  %5868 = vpow2.f32 %v5078_v27 }
 0xaec   :  { %v5853_v38 = vpop.eup %5852  ;;  %v5080_v29 = vmul.f32 1.442695, %v5018_v20 }
 0xaed   :  { %4074 = vperm.xlu0 %5617, %v5827_v53   ;;  %v5855_v58 = vpop.eup %5854  ;;  %v5082_v23 = vmul.f32 1.442695, %v5019_v47 }
 0xaee   :  { %4077 = vperm.xlu1 %5616, %v5829_v50   ;;  %5870 = vpow2.f32 %v5080_v29 }
 0xaef   :  { %5872 = vpow2.f32 %v5082_v23 }
 0xaf0   :  { %v5857_v53 = vpop.eup %5856 }
 0xaf1   :  { %4116 = vperm.xlu0 %5617, %v5831_v35   ;;  %v5859_v54 = vpop.eup %5858  ;;  %v9361_v35 = vld [vmem:[#allocation24_spill] sm:$0xff] }
 0xaf2   :  { %4119 = vperm.xlu1 %5616, %v5833_v34   ;;  %v5861_v63 = vpop.eup %5860 }
 0xaf3   :  { %v5863_v7 = vpop.eup %5862 }
 0xaf4   :  { %v5865_v50 = vpop.eup %5864 }
 0xaf5   :  { %5147 = vperm.xlu0 %5617, %v5835_v2  }
 0xaf6   :  { %5150 = vperm.xlu1 %5616, %v5837_v48  }
 0xaf7   :  { %v5867_v19 = vpop.eup %5866 }
 0xaf8   :  { %v5869_v30 = vpop.eup %5868 }
 0xaf9   :  { %5189 = vperm.xlu0 %5617, %v5839_v3  }
 0xafa   :  { %5192 = vperm.xlu1 %5616, %v5841_v51  }
 0xafb   :  { %v5871_v21 = vpop.eup %5870 }
 0xafc   :  { %v5873_v49 = vpop.eup %5872 }
 0xafd   :  { %4080 = vperm.xlu0 %5617, %v5843_v55   ;;  %v4284_v55 = vsel %vm1645_vm4, %v4222_v31, %v8434_v13 }
 0xafe   :  { %4083 = vperm.xlu1 %5616, %v5845_v43  }
 0xb01   :  { %4122 = vperm.xlu0 %5617, %v5847_v52  }
 0xb02   :  { %4125 = vperm.xlu1 %5616, %v5849_v10  }
 0xb05   :  { %5153 = vperm.xlu0 %5617, %v5851_v44  }
 0xb06   :  { %5156 = vperm.xlu1 %5616, %v5853_v38  }
 0xb09   :  { %5195 = vperm.xlu0 %5617, %v5855_v58  }
 0xb0a   :  { %5198 = vperm.xlu1 %5616, %v5857_v53  }
 0xb0d   :  { %4128 = vperm.xlu0 %5617, %v5859_v54  }
 0xb0e   :  { %4131 = vperm.xlu1 %5616, %v5861_v63  }
 0xb11   :  { %5159 = vperm.xlu0 %5617, %v5863_v7  }
 0xb12   :  { %5162 = vperm.xlu1 %5616, %v5865_v50  }
 0xb15   :  { %5201 = vperm.xlu0 %5617, %v5867_v19  }
 0xb16   :  { %5204 = vperm.xlu1 %5616, %v5869_v30  }
 0xb19   :  { %5207 = vperm.xlu0 %5617, %v5871_v21  }
 0xb1a   :  { %5210 = vperm.xlu1 %5616, %v5873_v49  }
 0xb1d   :  { %4301 = vrot.lane.b32.xlu0 %v9361_v35, %s6010_s18 }
 0xb1e   :  { %5380 = vrot.lane.b32.xlu1 %v9361_v35, %s6011_s19 }
 0xb21   :  { %4299 = vrot.lane.b32.xlu0 %v9362_v32, %s6010_s18 }
 0xb22   :  { %5378 = vrot.lane.b32.xlu1 %v9362_v32, %s6011_s19 }
 0xb2c   :  { %v5118_v34 = vpop.permute.xlu0 %5117 }
 0xb2d   :  { %v5215_v60 = vrot.slane %v5118_v34, %v7152_v25  ;;  %v5121_v22 = vpop.permute.xlu1 %5120 }
 0xb2e   :  { %v5219_v1 = vrot.slane %v5121_v22, %v7155_v5 }
 0xb30   :  { %v5220_v57 = vsel %vm1508_vm3, %v5219_v1, %v5215_v60  ;;  %v5124_v2 = vpop.permute.xlu0 %5123  ;;  %v9363_v60 = vld [vmem:[#allocation42_spill] sm:$0xff] }
 0xb31   :  { %v5224_v59 = vrot.slane %v5124_v2, %v7152_v25  ;;  %v5127_v9 = vpop.permute.xlu1 %5126  ;;  %v4145_v22 = vrot.slane %v9363_v60, %v7152_v25 }
 0xb32   :  { %v5228_v4 = vrot.slane %v5127_v9, %v7155_v5  ;;  %v9365_v9 = vld [vmem:[#allocation53_spill] sm:$0xff] }
 0xb34   :  { %v5229_v48 = vsel %vm1508_vm3, %v5228_v4, %v5224_v59  ;;  %v4057_v6 = vpop.permute.xlu0 %4056  ;;  %v4149_v4 = vrot.slane %v9365_v9, %v7155_v5 }
 0xb35   :  { %v5356_v14 = vsel %vm1645_vm4, %v5229_v48, %v5220_v57  ;;  %v4163_v36 = vrot.slane %v4057_v6, %v7152_v25  ;;  %v4060_v3 = vpop.permute.xlu1 %4059  ;;  %v9364_v57 = vld [vmem:[#allocation58_spill] sm:$0xff]  ;;  %v9366_v48 = vld [vmem:[#allocation40_spill] sm:$0xff] }
 0xb36   :  { %v4167_v12 = vrot.slane %v4060_v3, %v7155_v5  ;;  %v4154_v2 = vrot.slane %v9364_v57, %v7152_v25  ;;  %v4136_v6 = vrot.slane %v9366_v48, %v7152_v25 }
 0xb38   :  { %v8530_v28 = vsel %vm1508_vm3, %v4167_v12, %v4163_v36  ;;  %v4099_v51 = vpop.permute.xlu0 %4098  ;;  %v9368_v12 = vld [vmem:[#allocation39_spill] sm:$0xff] }
 0xb39   :  { %v4226_v18 = vrot.slane %v4099_v51, %v7152_v25  ;;  %v4102_v37 = vpop.permute.xlu1 %4101  ;;  %v4140_v42 = vrot.slane %v9368_v12, %v7155_v5  ;;  %v4150_v51 = vsel %vm1508_vm3, %v4149_v4, %v4145_v22 }
 0xb3a   :  { %v4230_v17 = vrot.slane %v4102_v37, %v7155_v5 }
 0xb3c   :  { %v4231_v26 = vsel %vm1508_vm3, %v4230_v17, %v4226_v18  ;;  %v5130_v40 = vpop.permute.xlu0 %5129 }
 0xb3d   :  { %v8539_v62 = vsel %vm1647_vm5, %v4231_v26, %v4284_v55  ;;  %v5233_v43 = vrot.slane %v5130_v40, %v7152_v25  ;;  %v5133_v24 = vpop.permute.xlu1 %5132 }
 0xb3e   :  { %v5237_v33 = vrot.slane %v5133_v24, %v7155_v5 }
 0xb40   :  { %v5238_v16 = vsel %vm1508_vm3, %v5237_v33, %v5233_v43  ;;  %v5166_v8 = vpop.permute.xlu0 %5165  ;;  %v4141_v43 = vsel %vm1508_vm3, %v4140_v42, %v4136_v6 }
 0xb41   :  { %v8545_v52 = vsel %vm1647_vm5, %v5238_v16, %v5356_v14  ;;  %v5287_v56 = vrot.slane %v5166_v8, %v7152_v25  ;;  %v5169_v13 = vpop.permute.xlu1 %5168  ;;  %v4158_v14 = vrot.slane %v9367_v15, %v7155_v5  ;;  %v4277_v24 = vsel %vm1645_vm4, %v4150_v51, %v4141_v43 }
 0xb42   :  { %v5291_v45 = vrot.slane %v5169_v13, %v7155_v5 }
 0xb43   :  { %v4159_v17 = vsel %vm1508_vm3, %v4158_v14, %v4154_v2 }
 0xb44   :  { %v5292_v41 = vsel %vm1508_vm3, %v5291_v45, %v5287_v56  ;;  %v5172_v10 = vpop.permute.xlu0 %5171  ;;  %v4278_v16 = vsel %vm1647_vm5, %v4159_v17, %v4277_v24 }
 0xb45   :  { %v5296_v0 = vrot.slane %v5172_v10, %v7152_v25  ;;  %v5175_v20 = vpop.permute.xlu1 %5174  ;;  %v4279_v13 = vsel %vm1649_vm6, %v8530_v28, %v4278_v16 }
 0xb46   :  { %v5300_v46 = vrot.slane %v5175_v20, %v7155_v5 }
 0xb48   :  { %v5301_v44 = vsel %vm1508_vm3, %v5300_v46, %v5296_v0  ;;  %v4063_v61 = vpop.permute.xlu0 %4062 }
 0xb49   :  { %v8554_v47 = vsel %vm1645_vm4, %v5301_v44, %v5292_v41  ;;  %v4066_v27 = vpop.permute.xlu1 %4065  ;;  %v4172_v36 = vrot.slane %v4063_v61, %v7152_v25 }
 0xb4a   :  { %v4176_v3 = vrot.slane %v4066_v27, %v7155_v5 }
 0xb4c   :  { %v8556_v38 = vpop.permute.xlu0 %4104  ;;  %v4177_v33 = vsel %vm1508_vm3, %v4176_v3, %v4172_v36 }
 0xb4d   :  { %v4108_v29 = vpop.permute.xlu1 %4107  ;;  %v4280_v0 = vsel %vm1651_vm7, %v4177_v33, %v4279_v13 }
 0xb50   :  { %v8558_v58 = vpop.permute.xlu0 %5135 }
 0xb51   :  { %v8560_v23 = vpop.permute.xlu1 %5138  ;;  %v5242_v4 = vrot.slane %v8558_v58, %v7152_v25 }
 0xb52   :  { %v5246_v48 = vrot.slane %v8560_v23, %v7155_v5 }
 0xb54   :  { %v8562_v53 = vpop.permute.xlu0 %5177 }
 0xb55   :  { %v8564_v54 = vpop.permute.xlu1 %5180 }
 0xb56   :  { %v5309_v43 = vrot.slane %v8564_v54, %v7155_v5 }
 0xb58   :  { %v4069_v63 = vpop.permute.xlu0 %4068 }
 0xb59   :  { %v4072_v7 = vpop.permute.xlu1 %4071  ;;  %v4181_v31 = vrot.slane %v4069_v63, %v7152_v25 }
 0xb5a   :  { %v4185_v18 = vrot.slane %v4072_v7, %v7155_v5 }
 0xb5c   :  { %v8566_v50 = vpop.permute.xlu0 %4110  ;;  %v4186_v8 = vsel %vm1508_vm3, %v4185_v18, %v4181_v31 }
 0xb5d   :  { %v8568_v19 = vpop.permute.xlu1 %4113  ;;  %v4281_v46 = vsel %vm1653_vm8, %v4186_v8, %v4280_v0  ;;  %v4244_v2 = vrot.slane %v8566_v50, %v7152_v25 }
 0xb5e   :  { %v4248_v9 = vrot.slane %v8568_v19, %v7155_v5 }
 0xb60   :  { %v8570_v30 = vpop.permute.xlu0 %5141  ;;  %v4249_v36 = vsel %vm1508_vm3, %v4248_v9, %v4244_v2 }
 0xb61   :  { %v8572_v21 = vpop.permute.xlu1 %5144  ;;  %v5251_v19 = vrot.slane %v8570_v30, %v7152_v25 }
 0xb62   :  { %v5255_v58 = vrot.slane %v8572_v21, %v7155_v5 }
 0xb64   :  { %v8574_v49 = vpop.permute.xlu0 %5183  ;;  %v5256_v17 = vsel %vm1508_vm3, %v5255_v58, %v5251_v19 }
 0xb65   :  { %v8576_v35 = vpop.permute.xlu1 %5186 }
 0xb66   :  { %v5318_v54 = vrot.slane %v8576_v35, %v7155_v5 }
 0xb68   :  { %v4075_v32 = vpop.permute.xlu0 %4074 }
 0xb69   :  { %v4078_v11 = vpop.permute.xlu1 %4077  ;;  %v4190_v55 = vrot.slane %v4075_v32, %v7152_v25  ;;  %v4235_v32 = vrot.slane %v8556_v38, %v7152_v25 }
 0xb6a   :  { %v4194_v26 = vrot.slane %v4078_v11, %v7155_v5  ;;  %v4239_v11 = vrot.slane %v4108_v29, %v7155_v5 }
 0xb6c   :  { %v8578_v39 = vpop.permute.xlu0 %4116  ;;  %v4195_v45 = vsel %vm1508_vm3, %v4194_v26, %v4190_v55  ;;  %v4240_v57 = vsel %vm1508_vm3, %v4239_v11, %v4235_v32 }
 0xb6d   :  { %v4120_v34 = vpop.permute.xlu1 %4119  ;;  %v4282_v27 = vsel %vm1655_vm9, %v4195_v45, %v4281_v46  ;;  %v4253_v38 = vrot.slane %v8578_v39, %v7152_v25  ;;  %v4286_v23 = vsel %vm1649_vm6, %v4240_v57, %v8539_v62  ;;  %v5247_v39 = vsel %vm1508_vm3, %v5246_v48, %v5242_v4 }
 0xb6e   :  { %v4257_v29 = vrot.slane %v4120_v34, %v7155_v5  ;;  %v4287_v18 = vsel %vm1651_vm7, %v4249_v36, %v4286_v23 }
 0xb70   :  { %v8582_v1 = vpop.permute.xlu0 %5147  ;;  %v4258_v34 = vsel %vm1508_vm3, %v4257_v29, %v4253_v38 }
 0xb71   :  { %v8586_v59 = vpop.permute.xlu1 %5150  ;;  %v5260_v3 = vrot.slane %v8582_v1, %v7152_v25  ;;  %v5358_v1 = vsel %vm1649_vm6, %v5247_v39, %v8545_v52  ;;  %v4288_v26 = vsel %vm1653_vm8, %v4258_v34, %v4287_v18 }
 0xb72   :  { %v5264_v12 = vrot.slane %v8586_v59, %v7155_v5  ;;  %v5305_v59 = vrot.slane %v8562_v53, %v7152_v25 }
 0xb74   :  { %v8601_v37 = vpop.permute.xlu0 %5189  ;;  %v5265_v24 = vsel %vm1508_vm3, %v5264_v12, %v5260_v3 }
 0xb75   :  { %v8606_v40 = vpop.permute.xlu1 %5192 }
 0xb78   :  { %v4081_v56 = vpop.permute.xlu0 %4080 }
 0xb79   :  { %v4199_v41 = vrot.slane %v4081_v56, %v7152_v25  ;;  %v4084_v10 = vpop.permute.xlu1 %4083  ;;  %v5359_v56 = vsel %vm1651_vm7, %v5256_v17, %v5358_v1  ;;  %v5575_v17 = vpop.f32.mrf.mxu1 }
 0xb7a   :  { %v4203_v20 = vrot.slane %v4084_v10, %v7155_v5  ;;  %v5360_v46 = vsel %vm1653_vm8, %v5265_v24, %v5359_v56 }
 0xb7b   :  { %v2217_v1 = vpop.f32.mrf.mxu1 }
 0xb7c   :  { %v4204_v44 = vsel %vm1508_vm3, %v4203_v20, %v4199_v41  ;;  %v4123_v61 = vpop.permute.xlu0 %4122  ;;  %v5314_v41 = vrot.slane %v8574_v49, %v7152_v25  ;;  %v9369_v20 = vld [vmem:[#allocation106_spill] sm:$0xff] }
 0xb7d   :  { %v4126_v63 = vpop.permute.xlu1 %4125  ;;  %v4283_v7 = vsel %vm1657_vm10, %v4204_v44, %v4282_v27  ;;  %v4262_v15 = vrot.slane %v4123_v61, %v7152_v25  ;;  %5874 = vrcp.f32 %v9369_v20  ;;  %v5323_v44 = vrot.slane %v8601_v37, %v7152_v25 }
 0xb7e   :  { %5587 = vmatprep.mubr.msk.f32.mxu1 %vm1668_vm11, %v4283_v7  ;;  %v4293_v28 = vsel %vm1668_vm11, %v4283_v7, 0.0  ;;  %v4266_v14 = vrot.slane %v4126_v63, %v7155_v5  ;;  %v5327_v61 = vrot.slane %v8606_v40, %v7155_v5 }
 0xb7f   :  { %4294 = vadd.xlane.f32.xlu0 %v4293_v28  ;;  %v5310_v28 = vsel %vm1508_vm3, %v5309_v43, %v5305_v59 }
 0xb80   :  { %v5154_v60 = vpop.permute.xlu0 %5153  ;;  %v4267_v30 = vsel %vm1508_vm3, %v4266_v14, %v4262_v15  ;;  %v5328_v57 = vsel %vm1508_vm3, %v5327_v61, %v5323_v44  ;;  %v5364_v2 = vsel %vm1647_vm5, %v5310_v28, %v8554_v47 }
 0xb81   :  { %v5157_v22 = vpop.permute.xlu1 %5156  ;;  %v5269_v21 = vrot.slane %v5154_v60, %v7152_v25  ;;  %v4289_v8 = vsel %vm1655_vm9, %v4267_v30, %v4288_v26  ;;  %v5319_v60 = vsel %vm1508_vm3, %v5318_v54, %v5314_v41  ;;  %v9370_v30 = vld [vmem:[#allocation109_spill] sm:$0xff]  ;;  %v9371_v41 = vld [vmem:[#allocation104_spill] sm:$0xff] }
 0xb82   :  { %v5273_v51 = vrot.slane %v5157_v22, %v7155_v5  ;;  %v5365_v48 = vsel %vm1649_vm6, %v5319_v60, %v5364_v2  ;;  %5876 = vrcp.f32 %v9370_v30  ;;  %v9372_v54 = vld [vmem:[#allocation108_spill] sm:$0xff] }
 0xb83   :  { %v5366_v15 = vsel %vm1651_vm7, %v5328_v57, %v5365_v48 }
 0xb84   :  { %v5196_v6 = vpop.permute.xlu0 %5195  ;;  %v5274_v13 = vsel %vm1508_vm3, %v5273_v51, %v5269_v21 }
 0xb85   :  { %v5199_v50 = vpop.permute.xlu1 %5198  ;;  %v5332_v49 = vrot.slane %v5196_v6, %v7152_v25  ;;  %v5361_v7 = vsel %vm1655_vm9, %v5274_v13, %v5360_v46 }
 0xb86   :  { %v5336_v27 = vrot.slane %v5199_v50, %v7155_v5  ;;  %v5582_v50 = vpop.f32.mrf.mxu0 }
 0xb88   :  { %v4129_v42 = vpop.permute.xlu0 %4128  ;;  %v5337_v9 = vsel %vm1508_vm3, %v5336_v27, %v5332_v49  ;;  %v3296_v34 = vpop.f32.mrf.mxu0  ;;  %v5544_v49 = vld [vmem:[#allocation8] ss:$0 sm:$0xff] }
 0xb89   :  { %v4271_v62 = vrot.slane %v4129_v42, %v7152_v25  ;;  %v4132_v31 = vpop.permute.xlu1 %4131  ;;  %v5367_v19 = vsel %vm1653_vm8, %v5337_v9, %v5366_v15 }
 0xb8a   :  { %v4275_v55 = vrot.slane %v4132_v31, %v7155_v5 }
 0xb8c   :  { %v5160_v33 = vpop.permute.xlu0 %5159  ;;  %v4276_v16 = vsel %vm1508_vm3, %v4275_v55, %v4271_v62 }
 0xb8d   :  { %v5278_v52 = vrot.slane %v5160_v33, %v7152_v25  ;;  %v5163_v45 = vpop.permute.xlu1 %5162  ;;  %v4290_v53 = vsel %vm1657_vm10, %v4276_v16, %v4289_v8 }
 0xb8e   :  { %v5282_v10 = vrot.slane %v5163_v45, %v7155_v5  ;;  %v4296_v0 = vsel %vm1668_vm11, %v4290_v53, 0.0 }
 0xb8f   :  { %4297 = vadd.xlane.f32.xlu1 %v4296_v0 }
 0xb90   :  { %v5283_v35 = vsel %vm1508_vm3, %v5282_v10, %v5278_v52  ;;  %v5202_v63 = vpop.permute.xlu0 %5201 }
 0xb91   :  { %v5341_v32 = vrot.slane %v5202_v63, %v7152_v25  ;;  %v5205_v11 = vpop.permute.xlu1 %5204  ;;  %v5362_v37 = vsel %vm1657_vm10, %v5283_v35, %v5361_v7 }
 0xb92   :  { %v5345_v40 = vrot.slane %v5205_v11, %v7155_v5  ;;  %5594 = vmatprep.mubr.msk.f32.mxu0 %vm1668_vm11, %v5362_v37  ;;  %v5372_v22 = vsel %vm1668_vm11, %v5362_v37, 0.0 }
 0xb93   :  { %5373 = vadd.xlane.f32.xlu0 %v5372_v22 }
 0xb94   :  { %v5208_v4 = vpop.permute.xlu0 %5207  ;;  %v5346_v38 = vsel %vm1508_vm3, %v5345_v40, %v5341_v32 }
 0xb95   :  { %v5350_v29 = vrot.slane %v5208_v4, %v7152_v25  ;;  %v5211_v6 = vpop.permute.xlu1 %5210  ;;  %v5368_v23 = vsel %vm1655_vm9, %v5346_v38, %v5367_v19 }
 0xb96   :  { %v5354_v14 = vrot.slane %v5211_v6, %v7155_v5  ;;  %v5875_v5 = vpop.eup %5874 }
 0xb97   :  { %v3307_v42 = vmul.f32 %v5875_v5, %v3296_v34  ;;  %v5877_v21 = vpop.eup %5876 }
 0xb98   :  { %v4302_v58 = vpop.permute.xlu0 %4301  ;;  %v5355_v47 = vsel %vm1508_vm3, %v5354_v14, %v5350_v29  ;;  %v3308_v51 = vmul.f32 %v5877_v21, %v5582_v50 }
 0xb99   :  { %v5381_v36 = vpop.permute.xlu1 %5380  ;;  %5583 = vmatprep.subr.mxu1 %v4302_v58  ;;  %v5369_v39 = vsel %vm1657_vm10, %v5355_v47, %v5368_v23 }
 0xb9a   :  { %5590 = vmatprep.subr.mxu0 %v5381_v36  ;;  %5584 = vmatpush3.msra.mxu1 %v4302_v58  ;;  %v5375_v25 = vsel %vm1668_vm11, %v5369_v39, 0.0 }
 0xb9b   :  { %5376 = vadd.xlane.f32.xlu0 %v5375_v25  ;;  %5591 = vmatpush3.msra.mxu0 %v5381_v36 }
 0xb9c   :  { %v4300_v3 = vpop.permute.xlu0 %4299 }
 0xb9d   :  { %v5379_v12 = vpop.permute.xlu1 %5378  ;;  %5585 = vmatprep.subr.mxu1 %v4300_v3 }
 0xb9e   :  { %5592 = vmatprep.subr.mxu0 %v5379_v12  ;;  %5586 = vmatpush3.msra.mxu1 %v4300_v3 }
 0xb9f   :  { %5593 = vmatpush3.msra.mxu0 %v5379_v12  ;;  %5588 = vmatmul.mubr.msk.f32.vlgmr.msra.gmra.mxu1 %vm1668_vm11, %v4290_v53 }
 0xba0   :  { %5469 = vrot.lane.b32.xlu1 %v3307_v42, %s6012_s20  ;;  %5595 = vmatmul.mubr.msk.f32.vlgmr.msra.gmra.mxu0 %vm1668_vm11, %v5369_v39 }
 0xbb1   :  { %5471 = vrot.lane.b32.xlu0 %v3308_v51, %s6012_s20 }
 0xc08   :  { %v4295_v62 = vpop.xlane.xlu0 %4294 }
 0xc09   :  { %5878 = vrcp.f32 %v4295_v62 }
 0xc16   :  { %v5879_v43 = vpop.eup %5878 }
 0xc18   :  { %v4298_v18 = vpop.xlane.xlu1 %4297 }
 0xc1c   :  { %v5374_v31 = vpop.xlane.xlu0 %5373  ;;  %v5470_v10 = vpop.permute.xlu1 %5469 }
 0xc1d   :  { %5880 = vrcp.f32 %v5374_v31 }
 0xc1e   :  { %5882 = vrcp.f32 %v4298_v18 }
 0xc24   :  { %v5377_v55 = vpop.xlane.xlu0 %5376 }
 0xc25   :  { %5884 = vrcp.f32 %v5377_v55 }
 0xc26   :  { %5886 = vrcp.f32 %v9371_v41 }
 0xc27   :  { %5888 = vrcp.f32 %v9372_v54 }
 0xc28   :  { %v5472_v20 = vpop.permute.xlu0 %5471 }
 0xc2a   :  { %v5881_v33 = vpop.eup %5880 }
 0xc2b   :  { %v5883_v13 = vpop.eup %5882 }
 0xc32   :  { %v5885_v45 = vpop.eup %5884 }
 0xc33   :  { %v5887_v0 = vpop.eup %5886 }
 0xc34   :  { %v2228_v46 = vmul.f32 %v5887_v0, %v2217_v1  ;;  %v5889_v28 = vpop.eup %5888 }
 0xc35   :  { %v2229_v11 = vmul.f32 %v5889_v28, %v5575_v17 }
 0xc36   :  { %v5491_v44 = vsel %vm87_vm0, %v2228_v46, %v5470_v10 }
 0xc37   :  { %v5492_v60 = vsel %vm87_vm0, %v2229_v11, %v5472_v20 }
 0xc5f   :  { %v5589_v59 = vpop.f32.mrf.mxu1 }
 0xc60   :  { %v5596_v26 = vpop.f32.mrf.mxu0  ;;  %v4387_v52 = vmul.f32 %v5883_v13, %v5589_v59 }
 0xc61   :  { %v4375_v24 = vpop.f32.mrf.mxu1  ;;  %v5466_v53 = vmul.f32 %v5885_v45, %v5596_v26 }
 0xc62   :  { %v4386_v16 = vmul.f32 %v5879_v43, %v4375_v24  ;;  %v5454_v8 = vpop.f32.mrf.mxu0 }
 0xc63   :  { %v5465_v56 = vmul.f32 %v5881_v33, %v5454_v8 }
 0xc64   :  { %5477 = vrot.lane.b32.xlu1 %v4386_v16, %s6013_s3 }
 0xc65   :  { %5485 = vrot.lane.b32.xlu0 %v5465_v56, %s6014_s21 }
 0xc68   :  { %5479 = vrot.lane.b32.xlu1 %v4387_v52, %s6013_s3 }
 0xc6c   :  { %5487 = vrot.lane.b32.xlu1 %v5466_v53, %s6014_s21 }
 0xcd6   :  { %v5478_v61 = vpop.permute.xlu1 %5477 }
 0xcd7   :  { %v5486_v27 = vpop.permute.xlu0 %5485  ;;  %v5493_v35 = vsel %vm1668_vm11, %v5491_v44, %v5478_v61 }
 0xcd8   :  { %v5496_v63 = vsel %vm5495_vm12, %v5493_v35, %v5486_v27 }
 0xcd9   :  { %v5505_v7 = vadd.f32 %v5544_v49, %v5496_v63 }
 0xcda   :  { %v5480_v32 = vpop.permute.xlu1 %5479 }
 0xcdb   :  { %v5507_v37 = vmax.f32 %v5505_v7, 0.0  ;;  %v5494_v40 = vsel %vm1668_vm11, %v5492_v60, %v5480_v32 }
 0xcdd   :  { %5510 = vst.msk [vmem:[#allocation10] sm:$0xff] %vm5509_vm13, %v5507_v37 }
 0xcde   :  { %v5488_v22 = vpop.permute.xlu1 %5487 }
 0xcdf   :  { %v5497_v57 = vsel %vm5495_vm12, %v5494_v40, %v5488_v22 }
 0xce0   :  { %v5506_v2 = vadd.f32 %v5544_v49, %v5497_v57 }
 0xce2   :  { %v5508_v9 = vmax.f32 %v5506_v2, 0.0 }
 0xce4   :  { %5511 = vst.msk [vmem:[#allocation10 + $0x8] sm:$0xff] %vm5509_vm13, %v5508_v9 }
 0xce5   :  { %5981 = shalt.err (!%p5978_p10)
}
 0xce6   :  { %s6016_s24 = smov 128  }
 0xce7   :  { %5523 = dma.vmem_to_hbm [thread:$0]  %s5518_s23, 256, %s8738_s8, [#allocation4], %s6016_s24, %s6016_s24, %s6012_s20  }
 0xce8   :  { %5996 = dma.done.wait [#allocation4], 256  }
 0xce9   :  { %5997 = vsyncadd [#allocation4], 4294967040 }
 0xcea   :  { %5527 = vsyncpa [#allocation3], 1 }
 0xceb   :  { %5528 = vsyncpa [#allocation6], 1 }
 0xcec   :  { %5529 = vsyncpa [#allocation9], 1 }
 0xced   :  { %5530 = vsyncpa [#allocation4], 1 }

</bundles_post_ra>
